<compile_context>
chip_gen: v7x
topology: tpu7x:2x2x1
jax: 0.10.0
libtpu: 0.0.40
codegen_flags: <defaults>
</compile_context>

<pallas_src>
import jax
import jax.numpy as jnp
from jax.experimental import pallas as pl
from jax.experimental.pallas import tpu as pltpu


# ---------------------------------------------------------------------------
# Fused kernel: LSTM stack (PyTorch gate order i, f, g, o) + attention + fc.
# ---------------------------------------------------------------------------
def _make_fused_kernel(num_layers: int, T: int, B: int):
    """Builds the fused kernel for static num_layers / T / B."""

    def kernel(*refs):
        x_ref = refs[0]                                    # [T*B, D_in] time-major rows
        lw = refs[1:1 + 3 * num_layers]                    # (w_ih_t, w_hh_t, b) per layer
        (wa1_ref, ba1_ref, wa2_ref, ba2_ref,
         wfc_ref, bfc_ref, out_ref, hs_ref) = refs[1 + 3 * num_layers:]

        H = lw[1].shape[0]                                 # w_hh_t: [H, 4H]
        TB = T * B

        layer_in = x_ref[...]                              # [T*B, D_in]
        last_outs = None
        for l in range(num_layers):
            w_ih = lw[3 * l][...]                          # [D_in_l, 4H]
            w_hh = lw[3 * l + 1][...]                      # [H, 4H]
            b = lw[3 * l + 2][...]                         # [1, 4H] (b_ih + b_hh)

            # Hoisted input projection + bias: one MXU matmul for the whole sequence.
            xg = jnp.dot(layer_in, w_ih,
                         preferred_element_type=jnp.float32) + b    # [T*B, 4H]

            h = jnp.zeros((B, H), jnp.float32)
            c = jnp.zeros((B, H), jnp.float32)
            outs = []
            for t in range(T):                             # fully unrolled (static T)
                gates = xg[t * B:(t + 1) * B, :] + jnp.dot(
                    h, w_hh, preferred_element_type=jnp.float32)    # [B, 4H]
                sg = jax.nn.sigmoid(gates)                 # one full-width sigmoid
                th = jnp.tanh(gates)                       # one full-width tanh
                i = sg[:, 0 * H:1 * H]
                f = sg[:, 1 * H:2 * H]
                g = th[:, 2 * H:3 * H]
                o = sg[:, 3 * H:4 * H]
                c = f * c + i * g
                h = o * jnp.tanh(c)
                outs.append(h)
                # Stash h so the next layer / attention can use one flat matmul.
                row = l * TB + t * B
                hs_ref[row:row + B, :] = h
            layer_in = hs_ref[l * TB:(l + 1) * TB, :]      # [T*B, H] for next stage
            last_outs = outs
            # TODO(synk): nn.LSTM inter-layer dropout is training-only; identity in eval.

        # ---- attention: Linear(H->A) -> tanh -> Linear(A->1) -> softmax over T ----
        hf = layer_in                                      # [T*B, H] last layer output
        e = jnp.tanh(jnp.dot(hf, wa1_ref[...],
                             preferred_element_type=jnp.float32)
                     + ba1_ref[...])                       # [T*B, A]
        s_col = (jnp.sum(e * wa2_ref[...], axis=1, keepdims=True)
                 + ba2_ref[0])                             # [T*B, 1]
        s = [s_col[t * B:(t + 1) * B, :] for t in range(T)]    # T x [B, 1]

        m = s[0]
        for t in range(1, T):
            m = jnp.maximum(m, s[t])
        p = [jnp.exp(st - m) for st in s]
        denom = p[0]
        for t in range(1, T):
            denom = denom + p[t]
        inv = pl.reciprocal(denom, approx=True)            # [B, 1], EUP slot

        # context = bmm(softmax(scores), lstm_out) -- accumulated per timestep.
        ctx = p[0] * last_outs[0]
        for t in range(1, T):
            ctx = ctx + p[t] * last_outs[t]
        context = ctx * inv                                # [B, H]

        # ---- fc (fc_dropout is identity in eval) + output softmax ----
        logits = (jnp.dot(context, wfc_ref[...],
                          preferred_element_type=jnp.float32)
                  + bfc_ref[...])                          # [B, O]
        lm = jnp.max(logits, axis=1, keepdims=True)
        lp = jnp.exp(logits - lm)
        # Exact reciprocal here so every row sums to 1 within 1e-5.
        out_ref[...] = lp * pl.reciprocal(jnp.sum(lp, axis=1, keepdims=True))

    return kernel


# ---------------------------------------------------------------------------
# Wrapper: one pallas_call, whole-array VMEM blocks (+ one SMEM scalar).
# ---------------------------------------------------------------------------
def lstm_model_forward(x, params):
    """x: [B, T, input_size] (batch_first, like PyTorch). Returns [B, output_size]."""
    x = x.astype(jnp.float32)
    B, T, D = x.shape
    num_layers = len(params["lstm"])
    H = params["lstm"][0]["w_hh_t"].shape[0]
    O = params["wfc_t"].shape[1]

    # Tiny layout shuffle of the raw input (time-major, flattened rows); all real
    # work happens inside the single fused pallas_call below.
    x_flat = jnp.transpose(x, (1, 0, 2)).reshape(T * B, D)

    lstm_args = []
    for layer in params["lstm"]:
        lstm_args += [layer["w_ih_t"], layer["w_hh_t"], layer["b"]]

    vmem = pl.BlockSpec(memory_space=pltpu.MemorySpace.VMEM)
    smem = pl.BlockSpec(memory_space=pltpu.MemorySpace.SMEM)
    in_specs = ([vmem] * (1 + 3 * num_layers)          # x_flat + lstm weights
                + [vmem, vmem, vmem, smem, vmem, vmem])  # wa1, ba1, wa2, ba2, wfc, bfc

    return pl.pallas_call(
        _make_fused_kernel(num_layers, T, B),
        out_shape=jax.ShapeDtypeStruct((B, O), jnp.float32),
        in_specs=in_specs,
        out_specs=vmem,
        scratch_shapes=[pltpu.VMEM((num_layers * T * B, H), jnp.float32)],
    )(x_flat, *lstm_args,
      params["wa1_t"], params["ba1"], params["wa2"], params["ba2"],
      params["wfc_t"], params["bfc"])


# ---------------------------------------------------------------------------
# Parameters (deterministic, PyTorch-style uniform init).
# ---------------------------------------------------------------------------
def init_params(key, input_size, hidden_size, num_layers, output_size,
                attention_hidden):
    def unif(k, shape, scale):
        return jax.random.uniform(k, shape, jnp.float32, -scale, scale)

    params = {"lstm": []}
    scale = 1.0 / float(hidden_size) ** 0.5
    for l in range(num_layers):
        d_in = input_size if l == 0 else hidden_size
        key, k1, k2, k3, k4 = jax.random.split(key, 5)
        w_ih = unif(k1, (4 * hidden_size, d_in), scale)
        w_hh = unif(k2, (4 * hidden_size, hidden_size), scale)
        b_ih = unif(k3, (4 * hidden_size,), scale)
        b_hh = unif(k4, (4 * hidden_size,), scale)
        params["lstm"].append({
            "w_ih_t": jnp.transpose(w_ih),                     # [d_in, 4H]
            "w_hh_t": jnp.transpose(w_hh),                     # [H, 4H]
            "b": (b_ih + b_hh).reshape(1, 4 * hidden_size),    # [1, 4H]
        })

    key, k1, k2, k3, k4, k5, k6 = jax.random.split(key, 7)
    params["wa1_t"] = jnp.transpose(
        unif(k1, (attention_hidden, hidden_size), scale))      # [H, A]
    params["ba1"] = unif(k2, (1, attention_hidden), scale)     # [1, A]
    a_scale = 1.0 / float(attention_hidden) ** 0.5
    params["wa2"] = unif(k3, (1, attention_hidden), a_scale)   # [1, A]
    params["ba2"] = unif(k4, (1,), a_scale)                    # [1]  (SMEM scalar)
    params["wfc_t"] = jnp.transpose(
        unif(k5, (output_size, hidden_size), scale))           # [H, O]
    params["bfc"] = unif(k6, (1, output_size), scale)          # [1, O]
    return params


if __name__ == "__main__":
    INPUT_SIZE, HIDDEN, OUTPUT, LAYERS = 16, 32, 3, 3
    B, T = 2, 8

    key = jax.random.PRNGKey(0)
    key, xk = jax.random.split(key)
    x = jax.random.normal(xk, (B, T, INPUT_SIZE), jnp.float32)
    params = init_params(key, INPUT_SIZE, HIDDEN, LAYERS, OUTPUT, HIDDEN)

    out = jax.jit(lstm_model_forward)(x, params)
    out = jax.block_until_ready(out)

    assert out.shape == (B, OUTPUT), out.shape
    # apply_softmax=True => rows sum to 1 (final softmax uses exact reciprocal)
    assert bool(jnp.allclose(jnp.sum(out, axis=1), 1.0, atol=1e-5))
    print("KERNEL_OK")
</pallas_src>

<mosaic_0001>
module attributes {stable_mosaic.version = 11 : i64} {
  func.func @kernel(%arg0: memref<16x16xf32, #tpu.memory_space<vmem>>, %arg1: memref<16x128xf32, #tpu.memory_space<vmem>>, %arg2: memref<32x128xf32, #tpu.memory_space<vmem>>, %arg3: memref<1x128xf32, #tpu.memory_space<vmem>>, %arg4: memref<32x128xf32, #tpu.memory_space<vmem>>, %arg5: memref<32x128xf32, #tpu.memory_space<vmem>>, %arg6: memref<1x128xf32, #tpu.memory_space<vmem>>, %arg7: memref<32x128xf32, #tpu.memory_space<vmem>>, %arg8: memref<32x128xf32, #tpu.memory_space<vmem>>, %arg9: memref<1x128xf32, #tpu.memory_space<vmem>>, %arg10: memref<32x32xf32, #tpu.memory_space<vmem>>, %arg11: memref<1x32xf32, #tpu.memory_space<vmem>>, %arg12: memref<1x32xf32, #tpu.memory_space<vmem>>, %arg13: memref<1xf32, #tpu.memory_space<smem>>, %arg14: memref<32x3xf32, #tpu.memory_space<vmem>>, %arg15: memref<1x3xf32, #tpu.memory_space<vmem>>, %arg16: memref<2x3xf32, #tpu.memory_space<vmem>>, %arg17: memref<48x32xf32, #tpu.memory_space<vmem>>) attributes {dimension_semantics = [], scalar_prefetch = 0 : i64, scratch_operands = 1 : i64, tpu.core_type = #tpu.core_type<tc>} {
    %c0 = arith.constant 0 : index
    %c0_0 = arith.constant 0 : index
    %0 = vector.load %arg0[%c0, %c0_0] : memref<16x16xf32, #tpu.memory_space<vmem>>, vector<16x16xf32>
    %c0_1 = arith.constant 0 : index
    %c0_2 = arith.constant 0 : index
    %1 = vector.load %arg1[%c0_1, %c0_2] : memref<16x128xf32, #tpu.memory_space<vmem>>, vector<16x128xf32>
    %c0_3 = arith.constant 0 : index
    %c0_4 = arith.constant 0 : index
    %2 = vector.load %arg2[%c0_3, %c0_4] : memref<32x128xf32, #tpu.memory_space<vmem>>, vector<32x128xf32>
    %c0_5 = arith.constant 0 : index
    %c0_6 = arith.constant 0 : index
    %3 = vector.load %arg3[%c0_5, %c0_6] : memref<1x128xf32, #tpu.memory_space<vmem>>, vector<1x128xf32>
    %cst = arith.constant dense<0.000000e+00> : vector<16x128xf32>
    %4 = tpu.matmul %0, %1, %cst {dimension_numbers = #tpu.dot_dimension_numbers<[1], [0], [0], [1], [0, 0, 1, 1], [], []>} : vector<16x16xf32>, vector<16x128xf32>, vector<16x128xf32> -> vector<16x128xf32>
    %5 = vector.broadcast %3 : vector<1x128xf32> to vector<16x128xf32>
    %6 = arith.addf %4, %5 : vector<16x128xf32>
    %cst_7 = arith.constant 0.000000e+00 : f32
    %7 = vector.broadcast %cst_7 : f32 to vector<2x32xf32>
    %cst_8 = arith.constant 0.000000e+00 : f32
    %8 = vector.broadcast %cst_8 : f32 to vector<2x32xf32>
    %9 = vector.extract_strided_slice %6 {offsets = [0, 0], sizes = [2, 128], strides = [1, 1]} : vector<16x128xf32> to vector<2x128xf32>
    %cst_9 = arith.constant dense<0.000000e+00> : vector<2x128xf32>
    %10 = tpu.matmul %7, %2, %cst_9 {dimension_numbers = #tpu.dot_dimension_numbers<[1], [0], [0], [1], [0, 0, 1, 1], [], []>} : vector<2x32xf32>, vector<32x128xf32>, vector<2x128xf32> -> vector<2x128xf32>
    %11 = arith.addf %9, %10 : vector<2x128xf32>
    %12 = arith.negf %11 : vector<2x128xf32>
    %13 = math.exp %12 : vector<2x128xf32>
    %cst_10 = arith.constant 1.000000e+00 : f32
    %14 = vector.broadcast %cst_10 : f32 to vector<2x128xf32>
    %15 = arith.addf %14, %13 : vector<2x128xf32>
    %16 = arith.divf %14, %15 : vector<2x128xf32>
    %17 = math.tanh %11 : vector<2x128xf32>
    %18 = vector.extract_strided_slice %16 {offsets = [0, 0], sizes = [2, 32], strides = [1, 1]} : vector<2x128xf32> to vector<2x32xf32>
    %19 = vector.extract_strided_slice %16 {offsets = [0, 32], sizes = [2, 32], strides = [1, 1]} : vector<2x128xf32> to vector<2x32xf32>
    %20 = vector.extract_strided_slice %17 {offsets = [0, 64], sizes = [2, 32], strides = [1, 1]} : vector<2x128xf32> to vector<2x32xf32>
    %21 = vector.extract_strided_slice %16 {offsets = [0, 96], sizes = [2, 32], strides = [1, 1]} : vector<2x128xf32> to vector<2x32xf32>
    %22 = arith.mulf %19, %8 : vector<2x32xf32>
    %23 = arith.mulf %18, %20 : vector<2x32xf32>
    %24 = arith.addf %22, %23 : vector<2x32xf32>
    %25 = math.tanh %24 : vector<2x32xf32>
    %26 = arith.mulf %21, %25 : vector<2x32xf32>
    %c0_11 = arith.constant 0 : index
    %c0_12 = arith.constant 0 : index
    %27 = vector.load %arg17[%c0_11, %c0_12] : memref<48x32xf32, #tpu.memory_space<vmem>>, vector<2x32xf32>
    tpu.vector_store %arg17[%c0_11, %c0_12], %26 {strides = array<i32>} : memref<48x32xf32, #tpu.memory_space<vmem>>, vector<2x32xf32>,
    %28 = vector.extract_strided_slice %6 {offsets = [2, 0], sizes = [2, 128], strides = [1, 1]} : vector<16x128xf32> to vector<2x128xf32>
    %cst_13 = arith.constant dense<0.000000e+00> : vector<2x128xf32>
    %29 = tpu.matmul %26, %2, %cst_13 {dimension_numbers = #tpu.dot_dimension_numbers<[1], [0], [0], [1], [0, 0, 1, 1], [], []>} : vector<2x32xf32>, vector<32x128xf32>, vector<2x128xf32> -> vector<2x128xf32>
    %30 = arith.addf %28, %29 : vector<2x128xf32>
    %31 = arith.negf %30 : vector<2x128xf32>
    %32 = math.exp %31 : vector<2x128xf32>
    %cst_14 = arith.constant 1.000000e+00 : f32
    %33 = vector.broadcast %cst_14 : f32 to vector<2x128xf32>
    %34 = arith.addf %33, %32 : vector<2x128xf32>
    %35 = arith.divf %33, %34 : vector<2x128xf32>
    %36 = math.tanh %30 : vector<2x128xf32>
    %37 = vector.extract_strided_slice %35 {offsets = [0, 0], sizes = [2, 32], strides = [1, 1]} : vector<2x128xf32> to vector<2x32xf32>
    %38 = vector.extract_strided_slice %35 {offsets = [0, 32], sizes = [2, 32], strides = [1, 1]} : vector<2x128xf32> to vector<2x32xf32>
    %39 = vector.extract_strided_slice %36 {offsets = [0, 64], sizes = [2, 32], strides = [1, 1]} : vector<2x128xf32> to vector<2x32xf32>
    %40 = vector.extract_strided_slice %35 {offsets = [0, 96], sizes = [2, 32], strides = [1, 1]} : vector<2x128xf32> to vector<2x32xf32>
    %41 = arith.mulf %38, %24 : vector<2x32xf32>
    %42 = arith.mulf %37, %39 : vector<2x32xf32>
    %43 = arith.addf %41, %42 : vector<2x32xf32>
    %44 = math.tanh %43 : vector<2x32xf32>
    %45 = arith.mulf %40, %44 : vector<2x32xf32>
    %c2 = arith.constant 2 : index
    %c0_15 = arith.constant 0 : index
    %46 = vector.load %arg17[%c2, %c0_15] : memref<48x32xf32, #tpu.memory_space<vmem>>, vector<2x32xf32>
    tpu.vector_store %arg17[%c2, %c0_15], %45 {strides = array<i32>} : memref<48x32xf32, #tpu.memory_space<vmem>>, vector<2x32xf32>,
    %47 = vector.extract_strided_slice %6 {offsets = [4, 0], sizes = [2, 128], strides = [1, 1]} : vector<16x128xf32> to vector<2x128xf32>
    %cst_16 = arith.constant dense<0.000000e+00> : vector<2x128xf32>
    %48 = tpu.matmul %45, %2, %cst_16 {dimension_numbers = #tpu.dot_dimension_numbers<[1], [0], [0], [1], [0, 0, 1, 1], [], []>} : vector<2x32xf32>, vector<32x128xf32>, vector<2x128xf32> -> vector<2x128xf32>
    %49 = arith.addf %47, %48 : vector<2x128xf32>
    %50 = arith.negf %49 : vector<2x128xf32>
    %51 = math.exp %50 : vector<2x128xf32>
    %cst_17 = arith.constant 1.000000e+00 : f32
    %52 = vector.broadcast %cst_17 : f32 to vector<2x128xf32>
    %53 = arith.addf %52, %51 : vector<2x128xf32>
    %54 = arith.divf %52, %53 : vector<2x128xf32>
    %55 = math.tanh %49 : vector<2x128xf32>
    %56 = vector.extract_strided_slice %54 {offsets = [0, 0], sizes = [2, 32], strides = [1, 1]} : vector<2x128xf32> to vector<2x32xf32>
    %57 = vector.extract_strided_slice %54 {offsets = [0, 32], sizes = [2, 32], strides = [1, 1]} : vector<2x128xf32> to vector<2x32xf32>
    %58 = vector.extract_strided_slice %55 {offsets = [0, 64], sizes = [2, 32], strides = [1, 1]} : vector<2x128xf32> to vector<2x32xf32>
    %59 = vector.extract_strided_slice %54 {offsets = [0, 96], sizes = [2, 32], strides = [1, 1]} : vector<2x128xf32> to vector<2x32xf32>
    %60 = arith.mulf %57, %43 : vector<2x32xf32>
    %61 = arith.mulf %56, %58 : vector<2x32xf32>
    %62 = arith.addf %60, %61 : vector<2x32xf32>
    %63 = math.tanh %62 : vector<2x32xf32>
    %64 = arith.mulf %59, %63 : vector<2x32xf32>
    %c4 = arith.constant 4 : index
    %c0_18 = arith.constant 0 : index
    %65 = vector.load %arg17[%c4, %c0_18] : memref<48x32xf32, #tpu.memory_space<vmem>>, vector<2x32xf32>
    tpu.vector_store %arg17[%c4, %c0_18], %64 {strides = array<i32>} : memref<48x32xf32, #tpu.memory_space<vmem>>, vector<2x32xf32>,
    %66 = vector.extract_strided_slice %6 {offsets = [6, 0], sizes = [2, 128], strides = [1, 1]} : vector<16x128xf32> to vector<2x128xf32>
    %cst_19 = arith.constant dense<0.000000e+00> : vector<2x128xf32>
    %67 = tpu.matmul %64, %2, %cst_19 {dimension_numbers = #tpu.dot_dimension_numbers<[1], [0], [0], [1], [0, 0, 1, 1], [], []>} : vector<2x32xf32>, vector<32x128xf32>, vector<2x128xf32> -> vector<2x128xf32>
    %68 = arith.addf %66, %67 : vector<2x128xf32>
    %69 = arith.negf %68 : vector<2x128xf32>
    %70 = math.exp %69 : vector<2x128xf32>
    %cst_20 = arith.constant 1.000000e+00 : f32
    %71 = vector.broadcast %cst_20 : f32 to vector<2x128xf32>
    %72 = arith.addf %71, %70 : vector<2x128xf32>
    %73 = arith.divf %71, %72 : vector<2x128xf32>
    %74 = math.tanh %68 : vector<2x128xf32>
    %75 = vector.extract_strided_slice %73 {offsets = [0, 0], sizes = [2, 32], strides = [1, 1]} : vector<2x128xf32> to vector<2x32xf32>
    %76 = vector.extract_strided_slice %73 {offsets = [0, 32], sizes = [2, 32], strides = [1, 1]} : vector<2x128xf32> to vector<2x32xf32>
    %77 = vector.extract_strided_slice %74 {offsets = [0, 64], sizes = [2, 32], strides = [1, 1]} : vector<2x128xf32> to vector<2x32xf32>
    %78 = vector.extract_strided_slice %73 {offsets = [0, 96], sizes = [2, 32], strides = [1, 1]} : vector<2x128xf32> to vector<2x32xf32>
    %79 = arith.mulf %76, %62 : vector<2x32xf32>
    %80 = arith.mulf %75, %77 : vector<2x32xf32>
    %81 = arith.addf %79, %80 : vector<2x32xf32>
    %82 = math.tanh %81 : vector<2x32xf32>
    %83 = arith.mulf %78, %82 : vector<2x32xf32>
    %c6 = arith.constant 6 : index
    %c0_21 = arith.constant 0 : index
    %84 = vector.load %arg17[%c6, %c0_21] : memref<48x32xf32, #tpu.memory_space<vmem>>, vector<2x32xf32>
    tpu.vector_store %arg17[%c6, %c0_21], %83 {strides = array<i32>} : memref<48x32xf32, #tpu.memory_space<vmem>>, vector<2x32xf32>,
    %85 = vector.extract_strided_slice %6 {offsets = [8, 0], sizes = [2, 128], strides = [1, 1]} : vector<16x128xf32> to vector<2x128xf32>
    %cst_22 = arith.constant dense<0.000000e+00> : vector<2x128xf32>
    %86 = tpu.matmul %83, %2, %cst_22 {dimension_numbers = #tpu.dot_dimension_numbers<[1], [0], [0], [1], [0, 0, 1, 1], [], []>} : vector<2x32xf32>, vector<32x128xf32>, vector<2x128xf32> -> vector<2x128xf32>
    %87 = arith.addf %85, %86 : vector<2x128xf32>
    %88 = arith.negf %87 : vector<2x128xf32>
    %89 = math.exp %88 : vector<2x128xf32>
    %cst_23 = arith.constant 1.000000e+00 : f32
    %90 = vector.broadcast %cst_23 : f32 to vector<2x128xf32>
    %91 = arith.addf %90, %89 : vector<2x128xf32>
    %92 = arith.divf %90, %91 : vector<2x128xf32>
    %93 = math.tanh %87 : vector<2x128xf32>
    %94 = vector.extract_strided_slice %92 {offsets = [0, 0], sizes = [2, 32], strides = [1, 1]} : vector<2x128xf32> to vector<2x32xf32>
    %95 = vector.extract_strided_slice %92 {offsets = [0, 32], sizes = [2, 32], strides = [1, 1]} : vector<2x128xf32> to vector<2x32xf32>
    %96 = vector.extract_strided_slice %93 {offsets = [0, 64], sizes = [2, 32], strides = [1, 1]} : vector<2x128xf32> to vector<2x32xf32>
    %97 = vector.extract_strided_slice %92 {offsets = [0, 96], sizes = [2, 32], strides = [1, 1]} : vector<2x128xf32> to vector<2x32xf32>
    %98 = arith.mulf %95, %81 : vector<2x32xf32>
    %99 = arith.mulf %94, %96 : vector<2x32xf32>
    %100 = arith.addf %98, %99 : vector<2x32xf32>
    %101 = math.tanh %100 : vector<2x32xf32>
    %102 = arith.mulf %97, %101 : vector<2x32xf32>
    %c8 = arith.constant 8 : index
    %c0_24 = arith.constant 0 : index
    %103 = vector.load %arg17[%c8, %c0_24] : memref<48x32xf32, #tpu.memory_space<vmem>>, vector<2x32xf32>
    tpu.vector_store %arg17[%c8, %c0_24], %102 {strides = array<i32>} : memref<48x32xf32, #tpu.memory_space<vmem>>, vector<2x32xf32>,
    %104 = vector.extract_strided_slice %6 {offsets = [10, 0], sizes = [2, 128], strides = [1, 1]} : vector<16x128xf32> to vector<2x128xf32>
    %cst_25 = arith.constant dense<0.000000e+00> : vector<2x128xf32>
    %105 = tpu.matmul %102, %2, %cst_25 {dimension_numbers = #tpu.dot_dimension_numbers<[1], [0], [0], [1], [0, 0, 1, 1], [], []>} : vector<2x32xf32>, vector<32x128xf32>, vector<2x128xf32> -> vector<2x128xf32>
    %106 = arith.addf %104, %105 : vector<2x128xf32>
    %107 = arith.negf %106 : vector<2x128xf32>
    %108 = math.exp %107 : vector<2x128xf32>
    %cst_26 = arith.constant 1.000000e+00 : f32
    %109 = vector.broadcast %cst_26 : f32 to vector<2x128xf32>
    %110 = arith.addf %109, %108 : vector<2x128xf32>
    %111 = arith.divf %109, %110 : vector<2x128xf32>
    %112 = math.tanh %106 : vector<2x128xf32>
    %113 = vector.extract_strided_slice %111 {offsets = [0, 0], sizes = [2, 32], strides = [1, 1]} : vector<2x128xf32> to vector<2x32xf32>
    %114 = vector.extract_strided_slice %111 {offsets = [0, 32], sizes = [2, 32], strides = [1, 1]} : vector<2x128xf32> to vector<2x32xf32>
    %115 = vector.extract_strided_slice %112 {offsets = [0, 64], sizes = [2, 32], strides = [1, 1]} : vector<2x128xf32> to vector<2x32xf32>
    %116 = vector.extract_strided_slice %111 {offsets = [0, 96], sizes = [2, 32], strides = [1, 1]} : vector<2x128xf32> to vector<2x32xf32>
    %117 = arith.mulf %114, %100 : vector<2x32xf32>
    %118 = arith.mulf %113, %115 : vector<2x32xf32>
    %119 = arith.addf %117, %118 : vector<2x32xf32>
    %120 = math.tanh %119 : vector<2x32xf32>
    %121 = arith.mulf %116, %120 : vector<2x32xf32>
    %c10 = arith.constant 10 : index
    %c0_27 = arith.constant 0 : index
    %122 = vector.load %arg17[%c10, %c0_27] : memref<48x32xf32, #tpu.memory_space<vmem>>, vector<2x32xf32>
    tpu.vector_store %arg17[%c10, %c0_27], %121 {strides = array<i32>} : memref<48x32xf32, #tpu.memory_space<vmem>>, vector<2x32xf32>,
    %123 = vector.extract_strided_slice %6 {offsets = [12, 0], sizes = [2, 128], strides = [1, 1]} : vector<16x128xf32> to vector<2x128xf32>
    %cst_28 = arith.constant dense<0.000000e+00> : vector<2x128xf32>
    %124 = tpu.matmul %121, %2, %cst_28 {dimension_numbers = #tpu.dot_dimension_numbers<[1], [0], [0], [1], [0, 0, 1, 1], [], []>} : vector<2x32xf32>, vector<32x128xf32>, vector<2x128xf32> -> vector<2x128xf32>
    %125 = arith.addf %123, %124 : vector<2x128xf32>
    %126 = arith.negf %125 : vector<2x128xf32>
    %127 = math.exp %126 : vector<2x128xf32>
    %cst_29 = arith.constant 1.000000e+00 : f32
    %128 = vector.broadcast %cst_29 : f32 to vector<2x128xf32>
    %129 = arith.addf %128, %127 : vector<2x128xf32>
    %130 = arith.divf %128, %129 : vector<2x128xf32>
    %131 = math.tanh %125 : vector<2x128xf32>
    %132 = vector.extract_strided_slice %130 {offsets = [0, 0], sizes = [2, 32], strides = [1, 1]} : vector<2x128xf32> to vector<2x32xf32>
    %133 = vector.extract_strided_slice %130 {offsets = [0, 32], sizes = [2, 32], strides = [1, 1]} : vector<2x128xf32> to vector<2x32xf32>
    %134 = vector.extract_strided_slice %131 {offsets = [0, 64], sizes = [2, 32], strides = [1, 1]} : vector<2x128xf32> to vector<2x32xf32>
    %135 = vector.extract_strided_slice %130 {offsets = [0, 96], sizes = [2, 32], strides = [1, 1]} : vector<2x128xf32> to vector<2x32xf32>
    %136 = arith.mulf %133, %119 : vector<2x32xf32>
    %137 = arith.mulf %132, %134 : vector<2x32xf32>
    %138 = arith.addf %136, %137 : vector<2x32xf32>
    %139 = math.tanh %138 : vector<2x32xf32>
    %140 = arith.mulf %135, %139 : vector<2x32xf32>
    %c12 = arith.constant 12 : index
    %c0_30 = arith.constant 0 : index
    %141 = vector.load %arg17[%c12, %c0_30] : memref<48x32xf32, #tpu.memory_space<vmem>>, vector<2x32xf32>
    tpu.vector_store %arg17[%c12, %c0_30], %140 {strides = array<i32>} : memref<48x32xf32, #tpu.memory_space<vmem>>, vector<2x32xf32>,
    %142 = vector.extract_strided_slice %6 {offsets = [14, 0], sizes = [2, 128], strides = [1, 1]} : vector<16x128xf32> to vector<2x128xf32>
    %cst_31 = arith.constant dense<0.000000e+00> : vector<2x128xf32>
    %143 = tpu.matmul %140, %2, %cst_31 {dimension_numbers = #tpu.dot_dimension_numbers<[1], [0], [0], [1], [0, 0, 1, 1], [], []>} : vector<2x32xf32>, vector<32x128xf32>, vector<2x128xf32> -> vector<2x128xf32>
    %144 = arith.addf %142, %143 : vector<2x128xf32>
    %145 = arith.negf %144 : vector<2x128xf32>
    %146 = math.exp %145 : vector<2x128xf32>
    %cst_32 = arith.constant 1.000000e+00 : f32
    %147 = vector.broadcast %cst_32 : f32 to vector<2x128xf32>
    %148 = arith.addf %147, %146 : vector<2x128xf32>
    %149 = arith.divf %147, %148 : vector<2x128xf32>
    %150 = math.tanh %144 : vector<2x128xf32>
    %151 = vector.extract_strided_slice %149 {offsets = [0, 0], sizes = [2, 32], strides = [1, 1]} : vector<2x128xf32> to vector<2x32xf32>
    %152 = vector.extract_strided_slice %149 {offsets = [0, 32], sizes = [2, 32], strides = [1, 1]} : vector<2x128xf32> to vector<2x32xf32>
    %153 = vector.extract_strided_slice %150 {offsets = [0, 64], sizes = [2, 32], strides = [1, 1]} : vector<2x128xf32> to vector<2x32xf32>
    %154 = vector.extract_strided_slice %149 {offsets = [0, 96], sizes = [2, 32], strides = [1, 1]} : vector<2x128xf32> to vector<2x32xf32>
    %155 = arith.mulf %152, %138 : vector<2x32xf32>
    %156 = arith.mulf %151, %153 : vector<2x32xf32>
    %157 = arith.addf %155, %156 : vector<2x32xf32>
    %158 = math.tanh %157 : vector<2x32xf32>
    %159 = arith.mulf %154, %158 : vector<2x32xf32>
    %c14 = arith.constant 14 : index
    %c0_33 = arith.constant 0 : index
    %160 = vector.load %arg17[%c14, %c0_33] : memref<48x32xf32, #tpu.memory_space<vmem>>, vector<2x32xf32>
    tpu.vector_store %arg17[%c14, %c0_33], %159 {strides = array<i32>} : memref<48x32xf32, #tpu.memory_space<vmem>>, vector<2x32xf32>,
    %c0_34 = arith.constant 0 : index
    %c0_35 = arith.constant 0 : index
    %161 = vector.load %arg17[%c0_34, %c0_35] : memref<48x32xf32, #tpu.memory_space<vmem>>, vector<16x32xf32>
    %c0_36 = arith.constant 0 : index
    %c0_37 = arith.constant 0 : index
    %162 = vector.load %arg4[%c0_36, %c0_37] : memref<32x128xf32, #tpu.memory_space<vmem>>, vector<32x128xf32>
    %c0_38 = arith.constant 0 : index
    %c0_39 = arith.constant 0 : index
    %163 = vector.load %arg5[%c0_38, %c0_39] : memref<32x128xf32, #tpu.memory_space<vmem>>, vector<32x128xf32>
    %c0_40 = arith.constant 0 : index
    %c0_41 = arith.constant 0 : index
    %164 = vector.load %arg6[%c0_40, %c0_41] : memref<1x128xf32, #tpu.memory_space<vmem>>, vector<1x128xf32>
    %cst_42 = arith.constant dense<0.000000e+00> : vector<16x128xf32>
    %165 = tpu.matmul %161, %162, %cst_42 {dimension_numbers = #tpu.dot_dimension_numbers<[1], [0], [0], [1], [0, 0, 1, 1], [], []>} : vector<16x32xf32>, vector<32x128xf32>, vector<16x128xf32> -> vector<16x128xf32>
    %166 = vector.broadcast %164 : vector<1x128xf32> to vector<16x128xf32>
    %167 = arith.addf %165, %166 : vector<16x128xf32>
    %cst_43 = arith.constant 0.000000e+00 : f32
    %168 = vector.broadcast %cst_43 : f32 to vector<2x32xf32>
    %cst_44 = arith.constant 0.000000e+00 : f32
    %169 = vector.broadcast %cst_44 : f32 to vector<2x32xf32>
    %170 = vector.extract_strided_slice %167 {offsets = [0, 0], sizes = [2, 128], strides = [1, 1]} : vector<16x128xf32> to vector<2x128xf32>
    %cst_45 = arith.constant dense<0.000000e+00> : vector<2x128xf32>
    %171 = tpu.matmul %168, %163, %cst_45 {dimension_numbers = #tpu.dot_dimension_numbers<[1], [0], [0], [1], [0, 0, 1, 1], [], []>} : vector<2x32xf32>, vector<32x128xf32>, vector<2x128xf32> -> vector<2x128xf32>
    %172 = arith.addf %170, %171 : vector<2x128xf32>
    %173 = arith.negf %172 : vector<2x128xf32>
    %174 = math.exp %173 : vector<2x128xf32>
    %cst_46 = arith.constant 1.000000e+00 : f32
    %175 = vector.broadcast %cst_46 : f32 to vector<2x128xf32>
    %176 = arith.addf %175, %174 : vector<2x128xf32>
    %177 = arith.divf %175, %176 : vector<2x128xf32>
    %178 = math.tanh %172 : vector<2x128xf32>
    %179 = vector.extract_strided_slice %177 {offsets = [0, 0], sizes = [2, 32], strides = [1, 1]} : vector<2x128xf32> to vector<2x32xf32>
    %180 = vector.extract_strided_slice %177 {offsets = [0, 32], sizes = [2, 32], strides = [1, 1]} : vector<2x128xf32> to vector<2x32xf32>
    %181 = vector.extract_strided_slice %178 {offsets = [0, 64], sizes = [2, 32], strides = [1, 1]} : vector<2x128xf32> to vector<2x32xf32>
    %182 = vector.extract_strided_slice %177 {offsets = [0, 96], sizes = [2, 32], strides = [1, 1]} : vector<2x128xf32> to vector<2x32xf32>
    %183 = arith.mulf %180, %169 : vector<2x32xf32>
    %184 = arith.mulf %179, %181 : vector<2x32xf32>
    %185 = arith.addf %183, %184 : vector<2x32xf32>
    %186 = math.tanh %185 : vector<2x32xf32>
    %187 = arith.mulf %182, %186 : vector<2x32xf32>
    %c16 = arith.constant 16 : index
    %c0_47 = arith.constant 0 : index
    %188 = vector.load %arg17[%c16, %c0_47] : memref<48x32xf32, #tpu.memory_space<vmem>>, vector<2x32xf32>
    tpu.vector_store %arg17[%c16, %c0_47], %187 {strides = array<i32>} : memref<48x32xf32, #tpu.memory_space<vmem>>, vector<2x32xf32>,
    %189 = vector.extract_strided_slice %167 {offsets = [2, 0], sizes = [2, 128], strides = [1, 1]} : vector<16x128xf32> to vector<2x128xf32>
    %cst_48 = arith.constant dense<0.000000e+00> : vector<2x128xf32>
    %190 = tpu.matmul %187, %163, %cst_48 {dimension_numbers = #tpu.dot_dimension_numbers<[1], [0], [0], [1], [0, 0, 1, 1], [], []>} : vector<2x32xf32>, vector<32x128xf32>, vector<2x128xf32> -> vector<2x128xf32>
    %191 = arith.addf %189, %190 : vector<2x128xf32>
    %192 = arith.negf %191 : vector<2x128xf32>
    %193 = math.exp %192 : vector<2x128xf32>
    %cst_49 = arith.constant 1.000000e+00 : f32
    %194 = vector.broadcast %cst_49 : f32 to vector<2x128xf32>
    %195 = arith.addf %194, %193 : vector<2x128xf32>
    %196 = arith.divf %194, %195 : vector<2x128xf32>
    %197 = math.tanh %191 : vector<2x128xf32>
    %198 = vector.extract_strided_slice %196 {offsets = [0, 0], sizes = [2, 32], strides = [1, 1]} : vector<2x128xf32> to vector<2x32xf32>
    %199 = vector.extract_strided_slice %196 {offsets = [0, 32], sizes = [2, 32], strides = [1, 1]} : vector<2x128xf32> to vector<2x32xf32>
    %200 = vector.extract_strided_slice %197 {offsets = [0, 64], sizes = [2, 32], strides = [1, 1]} : vector<2x128xf32> to vector<2x32xf32>
    %201 = vector.extract_strided_slice %196 {offsets = [0, 96], sizes = [2, 32], strides = [1, 1]} : vector<2x128xf32> to vector<2x32xf32>
    %202 = arith.mulf %199, %185 : vector<2x32xf32>
    %203 = arith.mulf %198, %200 : vector<2x32xf32>
    %204 = arith.addf %202, %203 : vector<2x32xf32>
    %205 = math.tanh %204 : vector<2x32xf32>
    %206 = arith.mulf %201, %205 : vector<2x32xf32>
    %c18 = arith.constant 18 : index
    %c0_50 = arith.constant 0 : index
    %207 = vector.load %arg17[%c18, %c0_50] : memref<48x32xf32, #tpu.memory_space<vmem>>, vector<2x32xf32>
    tpu.vector_store %arg17[%c18, %c0_50], %206 {strides = array<i32>} : memref<48x32xf32, #tpu.memory_space<vmem>>, vector<2x32xf32>,
    %208 = vector.extract_strided_slice %167 {offsets = [4, 0], sizes = [2, 128], strides = [1, 1]} : vector<16x128xf32> to vector<2x128xf32>
    %cst_51 = arith.constant dense<0.000000e+00> : vector<2x128xf32>
    %209 = tpu.matmul %206, %163, %cst_51 {dimension_numbers = #tpu.dot_dimension_numbers<[1], [0], [0], [1], [0, 0, 1, 1], [], []>} : vector<2x32xf32>, vector<32x128xf32>, vector<2x128xf32> -> vector<2x128xf32>
    %210 = arith.addf %208, %209 : vector<2x128xf32>
    %211 = arith.negf %210 : vector<2x128xf32>
    %212 = math.exp %211 : vector<2x128xf32>
    %cst_52 = arith.constant 1.000000e+00 : f32
    %213 = vector.broadcast %cst_52 : f32 to vector<2x128xf32>
    %214 = arith.addf %213, %212 : vector<2x128xf32>
    %215 = arith.divf %213, %214 : vector<2x128xf32>
    %216 = math.tanh %210 : vector<2x128xf32>
    %217 = vector.extract_strided_slice %215 {offsets = [0, 0], sizes = [2, 32], strides = [1, 1]} : vector<2x128xf32> to vector<2x32xf32>
    %218 = vector.extract_strided_slice %215 {offsets = [0, 32], sizes = [2, 32], strides = [1, 1]} : vector<2x128xf32> to vector<2x32xf32>
    %219 = vector.extract_strided_slice %216 {offsets = [0, 64], sizes = [2, 32], strides = [1, 1]} : vector<2x128xf32> to vector<2x32xf32>
    %220 = vector.extract_strided_slice %215 {offsets = [0, 96], sizes = [2, 32], strides = [1, 1]} : vector<2x128xf32> to vector<2x32xf32>
    %221 = arith.mulf %218, %204 : vector<2x32xf32>
    %222 = arith.mulf %217, %219 : vector<2x32xf32>
    %223 = arith.addf %221, %222 : vector<2x32xf32>
    %224 = math.tanh %223 : vector<2x32xf32>
    %225 = arith.mulf %220, %224 : vector<2x32xf32>
    %c20 = arith.constant 20 : index
    %c0_53 = arith.constant 0 : index
    %226 = vector.load %arg17[%c20, %c0_53] : memref<48x32xf32, #tpu.memory_space<vmem>>, vector<2x32xf32>
    tpu.vector_store %arg17[%c20, %c0_53], %225 {strides = array<i32>} : memref<48x32xf32, #tpu.memory_space<vmem>>, vector<2x32xf32>,
    %227 = vector.extract_strided_slice %167 {offsets = [6, 0], sizes = [2, 128], strides = [1, 1]} : vector<16x128xf32> to vector<2x128xf32>
    %cst_54 = arith.constant dense<0.000000e+00> : vector<2x128xf32>
    %228 = tpu.matmul %225, %163, %cst_54 {dimension_numbers = #tpu.dot_dimension_numbers<[1], [0], [0], [1], [0, 0, 1, 1], [], []>} : vector<2x32xf32>, vector<32x128xf32>, vector<2x128xf32> -> vector<2x128xf32>
    %229 = arith.addf %227, %228 : vector<2x128xf32>
    %230 = arith.negf %229 : vector<2x128xf32>
    %231 = math.exp %230 : vector<2x128xf32>
    %cst_55 = arith.constant 1.000000e+00 : f32
    %232 = vector.broadcast %cst_55 : f32 to vector<2x128xf32>
    %233 = arith.addf %232, %231 : vector<2x128xf32>
    %234 = arith.divf %232, %233 : vector<2x128xf32>
    %235 = math.tanh %229 : vector<2x128xf32>
    %236 = vector.extract_strided_slice %234 {offsets = [0, 0], sizes = [2, 32], strides = [1, 1]} : vector<2x128xf32> to vector<2x32xf32>
    %237 = vector.extract_strided_slice %234 {offsets = [0, 32], sizes = [2, 32], strides = [1, 1]} : vector<2x128xf32> to vector<2x32xf32>
    %238 = vector.extract_strided_slice %235 {offsets = [0, 64], sizes = [2, 32], strides = [1, 1]} : vector<2x128xf32> to vector<2x32xf32>
    %239 = vector.extract_strided_slice %234 {offsets = [0, 96], sizes = [2, 32], strides = [1, 1]} : vector<2x128xf32> to vector<2x32xf32>
    %240 = arith.mulf %237, %223 : vector<2x32xf32>
    %241 = arith.mulf %236, %238 : vector<2x32xf32>
    %242 = arith.addf %240, %241 : vector<2x32xf32>
    %243 = math.tanh %242 : vector<2x32xf32>
    %244 = arith.mulf %239, %243 : vector<2x32xf32>
    %c22 = arith.constant 22 : index
    %c0_56 = arith.constant 0 : index
    %245 = vector.load %arg17[%c22, %c0_56] : memref<48x32xf32, #tpu.memory_space<vmem>>, vector<2x32xf32>
    tpu.vector_store %arg17[%c22, %c0_56], %244 {strides = array<i32>} : memref<48x32xf32, #tpu.memory_space<vmem>>, vector<2x32xf32>,
    %246 = vector.extract_strided_slice %167 {offsets = [8, 0], sizes = [2, 128], strides = [1, 1]} : vector<16x128xf32> to vector<2x128xf32>
    %cst_57 = arith.constant dense<0.000000e+00> : vector<2x128xf32>
    %247 = tpu.matmul %244, %163, %cst_57 {dimension_numbers = #tpu.dot_dimension_numbers<[1], [0], [0], [1], [0, 0, 1, 1], [], []>} : vector<2x32xf32>, vector<32x128xf32>, vector<2x128xf32> -> vector<2x128xf32>
    %248 = arith.addf %246, %247 : vector<2x128xf32>
    %249 = arith.negf %248 : vector<2x128xf32>
    %250 = math.exp %249 : vector<2x128xf32>
    %cst_58 = arith.constant 1.000000e+00 : f32
    %251 = vector.broadcast %cst_58 : f32 to vector<2x128xf32>
    %252 = arith.addf %251, %250 : vector<2x128xf32>
    %253 = arith.divf %251, %252 : vector<2x128xf32>
    %254 = math.tanh %248 : vector<2x128xf32>
    %255 = vector.extract_strided_slice %253 {offsets = [0, 0], sizes = [2, 32], strides = [1, 1]} : vector<2x128xf32> to vector<2x32xf32>
    %256 = vector.extract_strided_slice %253 {offsets = [0, 32], sizes = [2, 32], strides = [1, 1]} : vector<2x128xf32> to vector<2x32xf32>
    %257 = vector.extract_strided_slice %254 {offsets = [0, 64], sizes = [2, 32], strides = [1, 1]} : vector<2x128xf32> to vector<2x32xf32>
    %258 = vector.extract_strided_slice %253 {offsets = [0, 96], sizes = [2, 32], strides = [1, 1]} : vector<2x128xf32> to vector<2x32xf32>
    %259 = arith.mulf %256, %242 : vector<2x32xf32>
    %260 = arith.mulf %255, %257 : vector<2x32xf32>
    %261 = arith.addf %259, %260 : vector<2x32xf32>
    %262 = math.tanh %261 : vector<2x32xf32>
    %263 = arith.mulf %258, %262 : vector<2x32xf32>
    %c24 = arith.constant 24 : index
    %c0_59 = arith.constant 0 : index
    %264 = vector.load %arg17[%c24, %c0_59] : memref<48x32xf32, #tpu.memory_space<vmem>>, vector<2x32xf32>
    tpu.vector_store %arg17[%c24, %c0_59], %263 {strides = array<i32>} : memref<48x32xf32, #tpu.memory_space<vmem>>, vector<2x32xf32>,
    %265 = vector.extract_strided_slice %167 {offsets = [10, 0], sizes = [2, 128], strides = [1, 1]} : vector<16x128xf32> to vector<2x128xf32>
    %cst_60 = arith.constant dense<0.000000e+00> : vector<2x128xf32>
    %266 = tpu.matmul %263, %163, %cst_60 {dimension_numbers = #tpu.dot_dimension_numbers<[1], [0], [0], [1], [0, 0, 1, 1], [], []>} : vector<2x32xf32>, vector<32x128xf32>, vector<2x128xf32> -> vector<2x128xf32>
    %267 = arith.addf %265, %266 : vector<2x128xf32>
    %268 = arith.negf %267 : vector<2x128xf32>
    %269 = math.exp %268 : vector<2x128xf32>
    %cst_61 = arith.constant 1.000000e+00 : f32
    %270 = vector.broadcast %cst_61 : f32 to vector<2x128xf32>
    %271 = arith.addf %270, %269 : vector<2x128xf32>
    %272 = arith.divf %270, %271 : vector<2x128xf32>
    %273 = math.tanh %267 : vector<2x128xf32>
    %274 = vector.extract_strided_slice %272 {offsets = [0, 0], sizes = [2, 32], strides = [1, 1]} : vector<2x128xf32> to vector<2x32xf32>
    %275 = vector.extract_strided_slice %272 {offsets = [0, 32], sizes = [2, 32], strides = [1, 1]} : vector<2x128xf32> to vector<2x32xf32>
    %276 = vector.extract_strided_slice %273 {offsets = [0, 64], sizes = [2, 32], strides = [1, 1]} : vector<2x128xf32> to vector<2x32xf32>
    %277 = vector.extract_strided_slice %272 {offsets = [0, 96], sizes = [2, 32], strides = [1, 1]} : vector<2x128xf32> to vector<2x32xf32>
    %278 = arith.mulf %275, %261 : vector<2x32xf32>
    %279 = arith.mulf %274, %276 : vector<2x32xf32>
    %280 = arith.addf %278, %279 : vector<2x32xf32>
    %281 = math.tanh %280 : vector<2x32xf32>
    %282 = arith.mulf %277, %281 : vector<2x32xf32>
    %c26 = arith.constant 26 : index
    %c0_62 = arith.constant 0 : index
    %283 = vector.load %arg17[%c26, %c0_62] : memref<48x32xf32, #tpu.memory_space<vmem>>, vector<2x32xf32>
    tpu.vector_store %arg17[%c26, %c0_62], %282 {strides = array<i32>} : memref<48x32xf32, #tpu.memory_space<vmem>>, vector<2x32xf32>,
    %284 = vector.extract_strided_slice %167 {offsets = [12, 0], sizes = [2, 128], strides = [1, 1]} : vector<16x128xf32> to vector<2x128xf32>
    %cst_63 = arith.constant dense<0.000000e+00> : vector<2x128xf32>
    %285 = tpu.matmul %282, %163, %cst_63 {dimension_numbers = #tpu.dot_dimension_numbers<[1], [0], [0], [1], [0, 0, 1, 1], [], []>} : vector<2x32xf32>, vector<32x128xf32>, vector<2x128xf32> -> vector<2x128xf32>
    %286 = arith.addf %284, %285 : vector<2x128xf32>
    %287 = arith.negf %286 : vector<2x128xf32>
    %288 = math.exp %287 : vector<2x128xf32>
    %cst_64 = arith.constant 1.000000e+00 : f32
    %289 = vector.broadcast %cst_64 : f32 to vector<2x128xf32>
    %290 = arith.addf %289, %288 : vector<2x128xf32>
    %291 = arith.divf %289, %290 : vector<2x128xf32>
    %292 = math.tanh %286 : vector<2x128xf32>
    %293 = vector.extract_strided_slice %291 {offsets = [0, 0], sizes = [2, 32], strides = [1, 1]} : vector<2x128xf32> to vector<2x32xf32>
    %294 = vector.extract_strided_slice %291 {offsets = [0, 32], sizes = [2, 32], strides = [1, 1]} : vector<2x128xf32> to vector<2x32xf32>
    %295 = vector.extract_strided_slice %292 {offsets = [0, 64], sizes = [2, 32], strides = [1, 1]} : vector<2x128xf32> to vector<2x32xf32>
    %296 = vector.extract_strided_slice %291 {offsets = [0, 96], sizes = [2, 32], strides = [1, 1]} : vector<2x128xf32> to vector<2x32xf32>
    %297 = arith.mulf %294, %280 : vector<2x32xf32>
    %298 = arith.mulf %293, %295 : vector<2x32xf32>
    %299 = arith.addf %297, %298 : vector<2x32xf32>
    %300 = math.tanh %299 : vector<2x32xf32>
    %301 = arith.mulf %296, %300 : vector<2x32xf32>
    %c28 = arith.constant 28 : index
    %c0_65 = arith.constant 0 : index
    %302 = vector.load %arg17[%c28, %c0_65] : memref<48x32xf32, #tpu.memory_space<vmem>>, vector<2x32xf32>
    tpu.vector_store %arg17[%c28, %c0_65], %301 {strides = array<i32>} : memref<48x32xf32, #tpu.memory_space<vmem>>, vector<2x32xf32>,
    %303 = vector.extract_strided_slice %167 {offsets = [14, 0], sizes = [2, 128], strides = [1, 1]} : vector<16x128xf32> to vector<2x128xf32>
    %cst_66 = arith.constant dense<0.000000e+00> : vector<2x128xf32>
    %304 = tpu.matmul %301, %163, %cst_66 {dimension_numbers = #tpu.dot_dimension_numbers<[1], [0], [0], [1], [0, 0, 1, 1], [], []>} : vector<2x32xf32>, vector<32x128xf32>, vector<2x128xf32> -> vector<2x128xf32>
    %305 = arith.addf %303, %304 : vector<2x128xf32>
    %306 = arith.negf %305 : vector<2x128xf32>
    %307 = math.exp %306 : vector<2x128xf32>
    %cst_67 = arith.constant 1.000000e+00 : f32
    %308 = vector.broadcast %cst_67 : f32 to vector<2x128xf32>
    %309 = arith.addf %308, %307 : vector<2x128xf32>
    %310 = arith.divf %308, %309 : vector<2x128xf32>
    %311 = math.tanh %305 : vector<2x128xf32>
    %312 = vector.extract_strided_slice %310 {offsets = [0, 0], sizes = [2, 32], strides = [1, 1]} : vector<2x128xf32> to vector<2x32xf32>
    %313 = vector.extract_strided_slice %310 {offsets = [0, 32], sizes = [2, 32], strides = [1, 1]} : vector<2x128xf32> to vector<2x32xf32>
    %314 = vector.extract_strided_slice %311 {offsets = [0, 64], sizes = [2, 32], strides = [1, 1]} : vector<2x128xf32> to vector<2x32xf32>
    %315 = vector.extract_strided_slice %310 {offsets = [0, 96], sizes = [2, 32], strides = [1, 1]} : vector<2x128xf32> to vector<2x32xf32>
    %316 = arith.mulf %313, %299 : vector<2x32xf32>
    %317 = arith.mulf %312, %314 : vector<2x32xf32>
    %318 = arith.addf %316, %317 : vector<2x32xf32>
    %319 = math.tanh %318 : vector<2x32xf32>
    %320 = arith.mulf %315, %319 : vector<2x32xf32>
    %c30 = arith.constant 30 : index
    %c0_68 = arith.constant 0 : index
    %321 = vector.load %arg17[%c30, %c0_68] : memref<48x32xf32, #tpu.memory_space<vmem>>, vector<2x32xf32>
    tpu.vector_store %arg17[%c30, %c0_68], %320 {strides = array<i32>} : memref<48x32xf32, #tpu.memory_space<vmem>>, vector<2x32xf32>,
    %c16_69 = arith.constant 16 : index
    %c0_70 = arith.constant 0 : index
    %322 = vector.load %arg17[%c16_69, %c0_70] : memref<48x32xf32, #tpu.memory_space<vmem>>, vector<16x32xf32>
    %c0_71 = arith.constant 0 : index
    %c0_72 = arith.constant 0 : index
    %323 = vector.load %arg7[%c0_71, %c0_72] : memref<32x128xf32, #tpu.memory_space<vmem>>, vector<32x128xf32>
    %c0_73 = arith.constant 0 : index
    %c0_74 = arith.constant 0 : index
    %324 = vector.load %arg8[%c0_73, %c0_74] : memref<32x128xf32, #tpu.memory_space<vmem>>, vector<32x128xf32>
    %c0_75 = arith.constant 0 : index
    %c0_76 = arith.constant 0 : index
    %325 = vector.load %arg9[%c0_75, %c0_76] : memref<1x128xf32, #tpu.memory_space<vmem>>, vector<1x128xf32>
    %cst_77 = arith.constant dense<0.000000e+00> : vector<16x128xf32>
    %326 = tpu.matmul %322, %323, %cst_77 {dimension_numbers = #tpu.dot_dimension_numbers<[1], [0], [0], [1], [0, 0, 1, 1], [], []>} : vector<16x32xf32>, vector<32x128xf32>, vector<16x128xf32> -> vector<16x128xf32>
    %327 = vector.broadcast %325 : vector<1x128xf32> to vector<16x128xf32>
    %328 = arith.addf %326, %327 : vector<16x128xf32>
    %cst_78 = arith.constant 0.000000e+00 : f32
    %329 = vector.broadcast %cst_78 : f32 to vector<2x32xf32>
    %cst_79 = arith.constant 0.000000e+00 : f32
    %330 = vector.broadcast %cst_79 : f32 to vector<2x32xf32>
    %331 = vector.extract_strided_slice %328 {offsets = [0, 0], sizes = [2, 128], strides = [1, 1]} : vector<16x128xf32> to vector<2x128xf32>
    %cst_80 = arith.constant dense<0.000000e+00> : vector<2x128xf32>
    %332 = tpu.matmul %329, %324, %cst_80 {dimension_numbers = #tpu.dot_dimension_numbers<[1], [0], [0], [1], [0, 0, 1, 1], [], []>} : vector<2x32xf32>, vector<32x128xf32>, vector<2x128xf32> -> vector<2x128xf32>
    %333 = arith.addf %331, %332 : vector<2x128xf32>
    %334 = arith.negf %333 : vector<2x128xf32>
    %335 = math.exp %334 : vector<2x128xf32>
    %cst_81 = arith.constant 1.000000e+00 : f32
    %336 = vector.broadcast %cst_81 : f32 to vector<2x128xf32>
    %337 = arith.addf %336, %335 : vector<2x128xf32>
    %338 = arith.divf %336, %337 : vector<2x128xf32>
    %339 = math.tanh %333 : vector<2x128xf32>
    %340 = vector.extract_strided_slice %338 {offsets = [0, 0], sizes = [2, 32], strides = [1, 1]} : vector<2x128xf32> to vector<2x32xf32>
    %341 = vector.extract_strided_slice %338 {offsets = [0, 32], sizes = [2, 32], strides = [1, 1]} : vector<2x128xf32> to vector<2x32xf32>
    %342 = vector.extract_strided_slice %339 {offsets = [0, 64], sizes = [2, 32], strides = [1, 1]} : vector<2x128xf32> to vector<2x32xf32>
    %343 = vector.extract_strided_slice %338 {offsets = [0, 96], sizes = [2, 32], strides = [1, 1]} : vector<2x128xf32> to vector<2x32xf32>
    %344 = arith.mulf %341, %330 : vector<2x32xf32>
    %345 = arith.mulf %340, %342 : vector<2x32xf32>
    %346 = arith.addf %344, %345 : vector<2x32xf32>
    %347 = math.tanh %346 : vector<2x32xf32>
    %348 = arith.mulf %343, %347 : vector<2x32xf32>
    %c32 = arith.constant 32 : index
    %c0_82 = arith.constant 0 : index
    %349 = vector.load %arg17[%c32, %c0_82] : memref<48x32xf32, #tpu.memory_space<vmem>>, vector<2x32xf32>
    tpu.vector_store %arg17[%c32, %c0_82], %348 {strides = array<i32>} : memref<48x32xf32, #tpu.memory_space<vmem>>, vector<2x32xf32>,
    %350 = vector.extract_strided_slice %328 {offsets = [2, 0], sizes = [2, 128], strides = [1, 1]} : vector<16x128xf32> to vector<2x128xf32>
    %cst_83 = arith.constant dense<0.000000e+00> : vector<2x128xf32>
    %351 = tpu.matmul %348, %324, %cst_83 {dimension_numbers = #tpu.dot_dimension_numbers<[1], [0], [0], [1], [0, 0, 1, 1], [], []>} : vector<2x32xf32>, vector<32x128xf32>, vector<2x128xf32> -> vector<2x128xf32>
    %352 = arith.addf %350, %351 : vector<2x128xf32>
    %353 = arith.negf %352 : vector<2x128xf32>
    %354 = math.exp %353 : vector<2x128xf32>
    %cst_84 = arith.constant 1.000000e+00 : f32
    %355 = vector.broadcast %cst_84 : f32 to vector<2x128xf32>
    %356 = arith.addf %355, %354 : vector<2x128xf32>
    %357 = arith.divf %355, %356 : vector<2x128xf32>
    %358 = math.tanh %352 : vector<2x128xf32>
    %359 = vector.extract_strided_slice %357 {offsets = [0, 0], sizes = [2, 32], strides = [1, 1]} : vector<2x128xf32> to vector<2x32xf32>
    %360 = vector.extract_strided_slice %357 {offsets = [0, 32], sizes = [2, 32], strides = [1, 1]} : vector<2x128xf32> to vector<2x32xf32>
    %361 = vector.extract_strided_slice %358 {offsets = [0, 64], sizes = [2, 32], strides = [1, 1]} : vector<2x128xf32> to vector<2x32xf32>
    %362 = vector.extract_strided_slice %357 {offsets = [0, 96], sizes = [2, 32], strides = [1, 1]} : vector<2x128xf32> to vector<2x32xf32>
    %363 = arith.mulf %360, %346 : vector<2x32xf32>
    %364 = arith.mulf %359, %361 : vector<2x32xf32>
    %365 = arith.addf %363, %364 : vector<2x32xf32>
    %366 = math.tanh %365 : vector<2x32xf32>
    %367 = arith.mulf %362, %366 : vector<2x32xf32>
    %c34 = arith.constant 34 : index
    %c0_85 = arith.constant 0 : index
    %368 = vector.load %arg17[%c34, %c0_85] : memref<48x32xf32, #tpu.memory_space<vmem>>, vector<2x32xf32>
    tpu.vector_store %arg17[%c34, %c0_85], %367 {strides = array<i32>} : memref<48x32xf32, #tpu.memory_space<vmem>>, vector<2x32xf32>,
    %369 = vector.extract_strided_slice %328 {offsets = [4, 0], sizes = [2, 128], strides = [1, 1]} : vector<16x128xf32> to vector<2x128xf32>
    %cst_86 = arith.constant dense<0.000000e+00> : vector<2x128xf32>
    %370 = tpu.matmul %367, %324, %cst_86 {dimension_numbers = #tpu.dot_dimension_numbers<[1], [0], [0], [1], [0, 0, 1, 1], [], []>} : vector<2x32xf32>, vector<32x128xf32>, vector<2x128xf32> -> vector<2x128xf32>
    %371 = arith.addf %369, %370 : vector<2x128xf32>
    %372 = arith.negf %371 : vector<2x128xf32>
    %373 = math.exp %372 : vector<2x128xf32>
    %cst_87 = arith.constant 1.000000e+00 : f32
    %374 = vector.broadcast %cst_87 : f32 to vector<2x128xf32>
    %375 = arith.addf %374, %373 : vector<2x128xf32>
    %376 = arith.divf %374, %375 : vector<2x128xf32>
    %377 = math.tanh %371 : vector<2x128xf32>
    %378 = vector.extract_strided_slice %376 {offsets = [0, 0], sizes = [2, 32], strides = [1, 1]} : vector<2x128xf32> to vector<2x32xf32>
    %379 = vector.extract_strided_slice %376 {offsets = [0, 32], sizes = [2, 32], strides = [1, 1]} : vector<2x128xf32> to vector<2x32xf32>
    %380 = vector.extract_strided_slice %377 {offsets = [0, 64], sizes = [2, 32], strides = [1, 1]} : vector<2x128xf32> to vector<2x32xf32>
    %381 = vector.extract_strided_slice %376 {offsets = [0, 96], sizes = [2, 32], strides = [1, 1]} : vector<2x128xf32> to vector<2x32xf32>
    %382 = arith.mulf %379, %365 : vector<2x32xf32>
    %383 = arith.mulf %378, %380 : vector<2x32xf32>
    %384 = arith.addf %382, %383 : vector<2x32xf32>
    %385 = math.tanh %384 : vector<2x32xf32>
    %386 = arith.mulf %381, %385 : vector<2x32xf32>
    %c36 = arith.constant 36 : index
    %c0_88 = arith.constant 0 : index
    %387 = vector.load %arg17[%c36, %c0_88] : memref<48x32xf32, #tpu.memory_space<vmem>>, vector<2x32xf32>
    tpu.vector_store %arg17[%c36, %c0_88], %386 {strides = array<i32>} : memref<48x32xf32, #tpu.memory_space<vmem>>, vector<2x32xf32>,
    %388 = vector.extract_strided_slice %328 {offsets = [6, 0], sizes = [2, 128], strides = [1, 1]} : vector<16x128xf32> to vector<2x128xf32>
    %cst_89 = arith.constant dense<0.000000e+00> : vector<2x128xf32>
    %389 = tpu.matmul %386, %324, %cst_89 {dimension_numbers = #tpu.dot_dimension_numbers<[1], [0], [0], [1], [0, 0, 1, 1], [], []>} : vector<2x32xf32>, vector<32x128xf32>, vector<2x128xf32> -> vector<2x128xf32>
    %390 = arith.addf %388, %389 : vector<2x128xf32>
    %391 = arith.negf %390 : vector<2x128xf32>
    %392 = math.exp %391 : vector<2x128xf32>
    %cst_90 = arith.constant 1.000000e+00 : f32
    %393 = vector.broadcast %cst_90 : f32 to vector<2x128xf32>
    %394 = arith.addf %393, %392 : vector<2x128xf32>
    %395 = arith.divf %393, %394 : vector<2x128xf32>
    %396 = math.tanh %390 : vector<2x128xf32>
    %397 = vector.extract_strided_slice %395 {offsets = [0, 0], sizes = [2, 32], strides = [1, 1]} : vector<2x128xf32> to vector<2x32xf32>
    %398 = vector.extract_strided_slice %395 {offsets = [0, 32], sizes = [2, 32], strides = [1, 1]} : vector<2x128xf32> to vector<2x32xf32>
    %399 = vector.extract_strided_slice %396 {offsets = [0, 64], sizes = [2, 32], strides = [1, 1]} : vector<2x128xf32> to vector<2x32xf32>
    %400 = vector.extract_strided_slice %395 {offsets = [0, 96], sizes = [2, 32], strides = [1, 1]} : vector<2x128xf32> to vector<2x32xf32>
    %401 = arith.mulf %398, %384 : vector<2x32xf32>
    %402 = arith.mulf %397, %399 : vector<2x32xf32>
    %403 = arith.addf %401, %402 : vector<2x32xf32>
    %404 = math.tanh %403 : vector<2x32xf32>
    %405 = arith.mulf %400, %404 : vector<2x32xf32>
    %c38 = arith.constant 38 : index
    %c0_91 = arith.constant 0 : index
    %406 = vector.load %arg17[%c38, %c0_91] : memref<48x32xf32, #tpu.memory_space<vmem>>, vector<2x32xf32>
    tpu.vector_store %arg17[%c38, %c0_91], %405 {strides = array<i32>} : memref<48x32xf32, #tpu.memory_space<vmem>>, vector<2x32xf32>,
    %407 = vector.extract_strided_slice %328 {offsets = [8, 0], sizes = [2, 128], strides = [1, 1]} : vector<16x128xf32> to vector<2x128xf32>
    %cst_92 = arith.constant dense<0.000000e+00> : vector<2x128xf32>
    %408 = tpu.matmul %405, %324, %cst_92 {dimension_numbers = #tpu.dot_dimension_numbers<[1], [0], [0], [1], [0, 0, 1, 1], [], []>} : vector<2x32xf32>, vector<32x128xf32>, vector<2x128xf32> -> vector<2x128xf32>
    %409 = arith.addf %407, %408 : vector<2x128xf32>
    %410 = arith.negf %409 : vector<2x128xf32>
    %411 = math.exp %410 : vector<2x128xf32>
    %cst_93 = arith.constant 1.000000e+00 : f32
    %412 = vector.broadcast %cst_93 : f32 to vector<2x128xf32>
    %413 = arith.addf %412, %411 : vector<2x128xf32>
    %414 = arith.divf %412, %413 : vector<2x128xf32>
    %415 = math.tanh %409 : vector<2x128xf32>
    %416 = vector.extract_strided_slice %414 {offsets = [0, 0], sizes = [2, 32], strides = [1, 1]} : vector<2x128xf32> to vector<2x32xf32>
    %417 = vector.extract_strided_slice %414 {offsets = [0, 32], sizes = [2, 32], strides = [1, 1]} : vector<2x128xf32> to vector<2x32xf32>
    %418 = vector.extract_strided_slice %415 {offsets = [0, 64], sizes = [2, 32], strides = [1, 1]} : vector<2x128xf32> to vector<2x32xf32>
    %419 = vector.extract_strided_slice %414 {offsets = [0, 96], sizes = [2, 32], strides = [1, 1]} : vector<2x128xf32> to vector<2x32xf32>
    %420 = arith.mulf %417, %403 : vector<2x32xf32>
    %421 = arith.mulf %416, %418 : vector<2x32xf32>
    %422 = arith.addf %420, %421 : vector<2x32xf32>
    %423 = math.tanh %422 : vector<2x32xf32>
    %424 = arith.mulf %419, %423 : vector<2x32xf32>
    %c40 = arith.constant 40 : index
    %c0_94 = arith.constant 0 : index
    %425 = vector.load %arg17[%c40, %c0_94] : memref<48x32xf32, #tpu.memory_space<vmem>>, vector<2x32xf32>
    tpu.vector_store %arg17[%c40, %c0_94], %424 {strides = array<i32>} : memref<48x32xf32, #tpu.memory_space<vmem>>, vector<2x32xf32>,
    %426 = vector.extract_strided_slice %328 {offsets = [10, 0], sizes = [2, 128], strides = [1, 1]} : vector<16x128xf32> to vector<2x128xf32>
    %cst_95 = arith.constant dense<0.000000e+00> : vector<2x128xf32>
    %427 = tpu.matmul %424, %324, %cst_95 {dimension_numbers = #tpu.dot_dimension_numbers<[1], [0], [0], [1], [0, 0, 1, 1], [], []>} : vector<2x32xf32>, vector<32x128xf32>, vector<2x128xf32> -> vector<2x128xf32>
    %428 = arith.addf %426, %427 : vector<2x128xf32>
    %429 = arith.negf %428 : vector<2x128xf32>
    %430 = math.exp %429 : vector<2x128xf32>
    %cst_96 = arith.constant 1.000000e+00 : f32
    %431 = vector.broadcast %cst_96 : f32 to vector<2x128xf32>
    %432 = arith.addf %431, %430 : vector<2x128xf32>
    %433 = arith.divf %431, %432 : vector<2x128xf32>
    %434 = math.tanh %428 : vector<2x128xf32>
    %435 = vector.extract_strided_slice %433 {offsets = [0, 0], sizes = [2, 32], strides = [1, 1]} : vector<2x128xf32> to vector<2x32xf32>
    %436 = vector.extract_strided_slice %433 {offsets = [0, 32], sizes = [2, 32], strides = [1, 1]} : vector<2x128xf32> to vector<2x32xf32>
    %437 = vector.extract_strided_slice %434 {offsets = [0, 64], sizes = [2, 32], strides = [1, 1]} : vector<2x128xf32> to vector<2x32xf32>
    %438 = vector.extract_strided_slice %433 {offsets = [0, 96], sizes = [2, 32], strides = [1, 1]} : vector<2x128xf32> to vector<2x32xf32>
    %439 = arith.mulf %436, %422 : vector<2x32xf32>
    %440 = arith.mulf %435, %437 : vector<2x32xf32>
    %441 = arith.addf %439, %440 : vector<2x32xf32>
    %442 = math.tanh %441 : vector<2x32xf32>
    %443 = arith.mulf %438, %442 : vector<2x32xf32>
    %c42 = arith.constant 42 : index
    %c0_97 = arith.constant 0 : index
    %444 = vector.load %arg17[%c42, %c0_97] : memref<48x32xf32, #tpu.memory_space<vmem>>, vector<2x32xf32>
    tpu.vector_store %arg17[%c42, %c0_97], %443 {strides = array<i32>} : memref<48x32xf32, #tpu.memory_space<vmem>>, vector<2x32xf32>,
    %445 = vector.extract_strided_slice %328 {offsets = [12, 0], sizes = [2, 128], strides = [1, 1]} : vector<16x128xf32> to vector<2x128xf32>
    %cst_98 = arith.constant dense<0.000000e+00> : vector<2x128xf32>
    %446 = tpu.matmul %443, %324, %cst_98 {dimension_numbers = #tpu.dot_dimension_numbers<[1], [0], [0], [1], [0, 0, 1, 1], [], []>} : vector<2x32xf32>, vector<32x128xf32>, vector<2x128xf32> -> vector<2x128xf32>
    %447 = arith.addf %445, %446 : vector<2x128xf32>
    %448 = arith.negf %447 : vector<2x128xf32>
    %449 = math.exp %448 : vector<2x128xf32>
    %cst_99 = arith.constant 1.000000e+00 : f32
    %450 = vector.broadcast %cst_99 : f32 to vector<2x128xf32>
    %451 = arith.addf %450, %449 : vector<2x128xf32>
    %452 = arith.divf %450, %451 : vector<2x128xf32>
    %453 = math.tanh %447 : vector<2x128xf32>
    %454 = vector.extract_strided_slice %452 {offsets = [0, 0], sizes = [2, 32], strides = [1, 1]} : vector<2x128xf32> to vector<2x32xf32>
    %455 = vector.extract_strided_slice %452 {offsets = [0, 32], sizes = [2, 32], strides = [1, 1]} : vector<2x128xf32> to vector<2x32xf32>
    %456 = vector.extract_strided_slice %453 {offsets = [0, 64], sizes = [2, 32], strides = [1, 1]} : vector<2x128xf32> to vector<2x32xf32>
    %457 = vector.extract_strided_slice %452 {offsets = [0, 96], sizes = [2, 32], strides = [1, 1]} : vector<2x128xf32> to vector<2x32xf32>
    %458 = arith.mulf %455, %441 : vector<2x32xf32>
    %459 = arith.mulf %454, %456 : vector<2x32xf32>
    %460 = arith.addf %458, %459 : vector<2x32xf32>
    %461 = math.tanh %460 : vector<2x32xf32>
    %462 = arith.mulf %457, %461 : vector<2x32xf32>
    %c44 = arith.constant 44 : index
    %c0_100 = arith.constant 0 : index
    %463 = vector.load %arg17[%c44, %c0_100] : memref<48x32xf32, #tpu.memory_space<vmem>>, vector<2x32xf32>
    tpu.vector_store %arg17[%c44, %c0_100], %462 {strides = array<i32>} : memref<48x32xf32, #tpu.memory_space<vmem>>, vector<2x32xf32>,
    %464 = vector.extract_strided_slice %328 {offsets = [14, 0], sizes = [2, 128], strides = [1, 1]} : vector<16x128xf32> to vector<2x128xf32>
    %cst_101 = arith.constant dense<0.000000e+00> : vector<2x128xf32>
    %465 = tpu.matmul %462, %324, %cst_101 {dimension_numbers = #tpu.dot_dimension_numbers<[1], [0], [0], [1], [0, 0, 1, 1], [], []>} : vector<2x32xf32>, vector<32x128xf32>, vector<2x128xf32> -> vector<2x128xf32>
    %466 = arith.addf %464, %465 : vector<2x128xf32>
    %467 = arith.negf %466 : vector<2x128xf32>
    %468 = math.exp %467 : vector<2x128xf32>
    %cst_102 = arith.constant 1.000000e+00 : f32
    %469 = vector.broadcast %cst_102 : f32 to vector<2x128xf32>
    %470 = arith.addf %469, %468 : vector<2x128xf32>
    %471 = arith.divf %469, %470 : vector<2x128xf32>
    %472 = math.tanh %466 : vector<2x128xf32>
    %473 = vector.extract_strided_slice %471 {offsets = [0, 0], sizes = [2, 32], strides = [1, 1]} : vector<2x128xf32> to vector<2x32xf32>
    %474 = vector.extract_strided_slice %471 {offsets = [0, 32], sizes = [2, 32], strides = [1, 1]} : vector<2x128xf32> to vector<2x32xf32>
    %475 = vector.extract_strided_slice %472 {offsets = [0, 64], sizes = [2, 32], strides = [1, 1]} : vector<2x128xf32> to vector<2x32xf32>
    %476 = vector.extract_strided_slice %471 {offsets = [0, 96], sizes = [2, 32], strides = [1, 1]} : vector<2x128xf32> to vector<2x32xf32>
    %477 = arith.mulf %474, %460 : vector<2x32xf32>
    %478 = arith.mulf %473, %475 : vector<2x32xf32>
    %479 = arith.addf %477, %478 : vector<2x32xf32>
    %480 = math.tanh %479 : vector<2x32xf32>
    %481 = arith.mulf %476, %480 : vector<2x32xf32>
    %c46 = arith.constant 46 : index
    %c0_103 = arith.constant 0 : index
    %482 = vector.load %arg17[%c46, %c0_103] : memref<48x32xf32, #tpu.memory_space<vmem>>, vector<2x32xf32>
    tpu.vector_store %arg17[%c46, %c0_103], %481 {strides = array<i32>} : memref<48x32xf32, #tpu.memory_space<vmem>>, vector<2x32xf32>,
    %c32_104 = arith.constant 32 : index
    %c0_105 = arith.constant 0 : index
    %483 = vector.load %arg17[%c32_104, %c0_105] : memref<48x32xf32, #tpu.memory_space<vmem>>, vector<16x32xf32>
    %c0_106 = arith.constant 0 : index
    %c0_107 = arith.constant 0 : index
    %484 = vector.load %arg10[%c0_106, %c0_107] : memref<32x32xf32, #tpu.memory_space<vmem>>, vector<32x32xf32>
    %cst_108 = arith.constant dense<0.000000e+00> : vector<16x32xf32>
    %485 = tpu.matmul %483, %484, %cst_108 {dimension_numbers = #tpu.dot_dimension_numbers<[1], [0], [0], [1], [0, 0, 1, 1], [], []>} : vector<16x32xf32>, vector<32x32xf32>, vector<16x32xf32> -> vector<16x32xf32>
    %c0_109 = arith.constant 0 : index
    %c0_110 = arith.constant 0 : index
    %486 = vector.load %arg11[%c0_109, %c0_110] : memref<1x32xf32, #tpu.memory_space<vmem>>, vector<1x32xf32>
    %487 = vector.broadcast %486 : vector<1x32xf32> to vector<16x32xf32>
    %488 = arith.addf %485, %487 : vector<16x32xf32>
    %489 = math.tanh %488 : vector<16x32xf32>
    %c0_111 = arith.constant 0 : index
    %c0_112 = arith.constant 0 : index
    %490 = vector.load %arg12[%c0_111, %c0_112] : memref<1x32xf32, #tpu.memory_space<vmem>>, vector<1x32xf32>
    %491 = vector.broadcast %490 : vector<1x32xf32> to vector<16x32xf32>
    %492 = arith.mulf %489, %491 : vector<16x32xf32>
    %cst_113 = arith.constant dense<0.000000e+00> : vector<16xf32>
    %493 = vector.multi_reduction <add>, %492, %cst_113 [1] : vector<16x32xf32> to vector<16xf32>
    %494 = vector.shape_cast %493 : vector<16xf32> to vector<16x1xf32>
    %c0_114 = arith.constant 0 : index
    %495 = memref.load %arg13[%c0_114] : memref<1xf32, #tpu.memory_space<smem>>
    %496 = vector.broadcast %495 : f32 to vector<16x1xf32>
    %497 = arith.addf %494, %496 : vector<16x1xf32>
    %498 = vector.extract_strided_slice %497 {offsets = [0, 0], sizes = [2, 1], strides = [1, 1]} : vector<16x1xf32> to vector<2x1xf32>
    %499 = vector.extract_strided_slice %497 {offsets = [2, 0], sizes = [2, 1], strides = [1, 1]} : vector<16x1xf32> to vector<2x1xf32>
    %500 = vector.extract_strided_slice %497 {offsets = [4, 0], sizes = [2, 1], strides = [1, 1]} : vector<16x1xf32> to vector<2x1xf32>
    %501 = vector.extract_strided_slice %497 {offsets = [6, 0], sizes = [2, 1], strides = [1, 1]} : vector<16x1xf32> to vector<2x1xf32>
    %502 = vector.extract_strided_slice %497 {offsets = [8, 0], sizes = [2, 1], strides = [1, 1]} : vector<16x1xf32> to vector<2x1xf32>
    %503 = vector.extract_strided_slice %497 {offsets = [10, 0], sizes = [2, 1], strides = [1, 1]} : vector<16x1xf32> to vector<2x1xf32>
    %504 = vector.extract_strided_slice %497 {offsets = [12, 0], sizes = [2, 1], strides = [1, 1]} : vector<16x1xf32> to vector<2x1xf32>
    %505 = vector.extract_strided_slice %497 {offsets = [14, 0], sizes = [2, 1], strides = [1, 1]} : vector<16x1xf32> to vector<2x1xf32>
    %506 = arith.maximumf %498, %499 : vector<2x1xf32>
    %507 = arith.maximumf %506, %500 : vector<2x1xf32>
    %508 = arith.maximumf %507, %501 : vector<2x1xf32>
    %509 = arith.maximumf %508, %502 : vector<2x1xf32>
    %510 = arith.maximumf %509, %503 : vector<2x1xf32>
    %511 = arith.maximumf %510, %504 : vector<2x1xf32>
    %512 = arith.maximumf %511, %505 : vector<2x1xf32>
    %513 = arith.subf %498, %512 : vector<2x1xf32>
    %514 = math.exp %513 : vector<2x1xf32>
    %515 = arith.subf %499, %512 : vector<2x1xf32>
    %516 = math.exp %515 : vector<2x1xf32>
    %517 = arith.subf %500, %512 : vector<2x1xf32>
    %518 = math.exp %517 : vector<2x1xf32>
    %519 = arith.subf %501, %512 : vector<2x1xf32>
    %520 = math.exp %519 : vector<2x1xf32>
    %521 = arith.subf %502, %512 : vector<2x1xf32>
    %522 = math.exp %521 : vector<2x1xf32>
    %523 = arith.subf %503, %512 : vector<2x1xf32>
    %524 = math.exp %523 : vector<2x1xf32>
    %525 = arith.subf %504, %512 : vector<2x1xf32>
    %526 = math.exp %525 : vector<2x1xf32>
    %527 = arith.subf %505, %512 : vector<2x1xf32>
    %528 = math.exp %527 : vector<2x1xf32>
    %529 = arith.addf %514, %516 : vector<2x1xf32>
    %530 = arith.addf %529, %518 : vector<2x1xf32>
    %531 = arith.addf %530, %520 : vector<2x1xf32>
    %532 = arith.addf %531, %522 : vector<2x1xf32>
    %533 = arith.addf %532, %524 : vector<2x1xf32>
    %534 = arith.addf %533, %526 : vector<2x1xf32>
    %535 = arith.addf %534, %528 : vector<2x1xf32>
    %536 = tpu.reciprocal %535 {approx = true} : vector<2x1xf32> -> vector<2x1xf32>
    %537 = vector.broadcast %514 : vector<2x1xf32> to vector<2x32xf32>
    %538 = arith.mulf %537, %348 : vector<2x32xf32>
    %539 = vector.broadcast %516 : vector<2x1xf32> to vector<2x32xf32>
    %540 = arith.mulf %539, %367 : vector<2x32xf32>
    %541 = arith.addf %538, %540 : vector<2x32xf32>
    %542 = vector.broadcast %518 : vector<2x1xf32> to vector<2x32xf32>
    %543 = arith.mulf %542, %386 : vector<2x32xf32>
    %544 = arith.addf %541, %543 : vector<2x32xf32>
    %545 = vector.broadcast %520 : vector<2x1xf32> to vector<2x32xf32>
    %546 = arith.mulf %545, %405 : vector<2x32xf32>
    %547 = arith.addf %544, %546 : vector<2x32xf32>
    %548 = vector.broadcast %522 : vector<2x1xf32> to vector<2x32xf32>
    %549 = arith.mulf %548, %424 : vector<2x32xf32>
    %550 = arith.addf %547, %549 : vector<2x32xf32>
    %551 = vector.broadcast %524 : vector<2x1xf32> to vector<2x32xf32>
    %552 = arith.mulf %551, %443 : vector<2x32xf32>
    %553 = arith.addf %550, %552 : vector<2x32xf32>
    %554 = vector.broadcast %526 : vector<2x1xf32> to vector<2x32xf32>
    %555 = arith.mulf %554, %462 : vector<2x32xf32>
    %556 = arith.addf %553, %555 : vector<2x32xf32>
    %557 = vector.broadcast %528 : vector<2x1xf32> to vector<2x32xf32>
    %558 = arith.mulf %557, %481 : vector<2x32xf32>
    %559 = arith.addf %556, %558 : vector<2x32xf32>
    %560 = vector.broadcast %536 : vector<2x1xf32> to vector<2x32xf32>
    %561 = arith.mulf %559, %560 : vector<2x32xf32>
    %c0_115 = arith.constant 0 : index
    %c0_116 = arith.constant 0 : index
    %562 = vector.load %arg14[%c0_115, %c0_116] : memref<32x3xf32, #tpu.memory_space<vmem>>, vector<32x3xf32>
    %cst_117 = arith.constant dense<0.000000e+00> : vector<2x3xf32>
    %563 = tpu.matmul %561, %562, %cst_117 {dimension_numbers = #tpu.dot_dimension_numbers<[1], [0], [0], [1], [0, 0, 1, 1], [], []>} : vector<2x32xf32>, vector<32x3xf32>, vector<2x3xf32> -> vector<2x3xf32>
    %c0_118 = arith.constant 0 : index
    %c0_119 = arith.constant 0 : index
    %564 = vector.load %arg15[%c0_118, %c0_119] : memref<1x3xf32, #tpu.memory_space<vmem>>, vector<1x3xf32>
    %565 = vector.broadcast %564 : vector<1x3xf32> to vector<2x3xf32>
    %566 = arith.addf %563, %565 : vector<2x3xf32>
    %cst_120 = arith.constant dense<0xFF800000> : vector<2xf32>
    %567 = vector.multi_reduction <maximumf>, %566, %cst_120 [1] : vector<2x3xf32> to vector<2xf32>
    %568 = vector.shape_cast %567 : vector<2xf32> to vector<2x1xf32>
    %569 = vector.broadcast %568 : vector<2x1xf32> to vector<2x3xf32>
    %570 = arith.subf %566, %569 : vector<2x3xf32>
    %571 = math.exp %570 : vector<2x3xf32>
    %cst_121 = arith.constant dense<0.000000e+00> : vector<2xf32>
    %572 = vector.multi_reduction <add>, %571, %cst_121 [1] : vector<2x3xf32> to vector<2xf32>
    %573 = vector.shape_cast %572 : vector<2xf32> to vector<2x1xf32>
    %574 = tpu.reciprocal %573 : vector<2x1xf32> -> vector<2x1xf32>
    %575 = vector.broadcast %574 : vector<2x1xf32> to vector<2x3xf32>
    %576 = arith.mulf %571, %575 : vector<2x3xf32>
    %c0_122 = arith.constant 0 : index
    %c0_123 = arith.constant 0 : index
    %577 = vector.load %arg16[%c0_122, %c0_123] : memref<2x3xf32, #tpu.memory_space<vmem>>, vector<2x3xf32>
    tpu.vector_store %arg16[%c0_122, %c0_123], %576 {strides = array<i32>} : memref<2x3xf32, #tpu.memory_space<vmem>>, vector<2x3xf32>,
    return
  }
}

</mosaic_0001>

<bundles_post_ra>
// kernel: lstm_model_forward.1
= control target key start
LH: loop header
LB: loop body
LE: loop exit
PB: predicated region body
PF: predicated region fallthrough
CT: control target
= control target key end

     0   :  { %s5238_s0 = inlined_call_operand.vmem [shape: f32[16,16], index: 0, kind: input, shape index: {}]   ;;  %s5239_s1 = inlined_call_operand.hbm [shape: f32[16,128], index: 1, kind: input, shape index: {}]   ;;  %s5240_s2 = inlined_call_operand.vmem [shape: f32[32,128], index: 2, kind: input, shape index: {}]   ;;  %s5241_s3 = inlined_call_operand.vmem [shape: f32[1,128], index: 3, kind: input, shape index: {}]   ;;  %s5242_s4 = inlined_call_operand.vmem [shape: f32[32,128], index: 4, kind: input, shape index: {}]   ;;  %s5243_s5 = inlined_call_operand.vmem [shape: f32[32,128], index: 5, kind: input, shape index: {}]   ;;  %s5244_s6 = inlined_call_operand.vmem [shape: f32[1,128], index: 6, kind: input, shape index: {}]   ;;  %s5245_s7 = inlined_call_operand.hbm [shape: f32[32,128], index: 7, kind: input, shape index: {}]   ;;  %s5246_s8 = inlined_call_operand.hbm [shape: f32[32,128], index: 8, kind: input, shape index: {}]   ;;  %s5247_s9 = inlined_call_operand.vmem [shape: f32[1,128], index: 9, kind: input, shape index: {}]   ;;  %s5248_s10 = inlined_call_operand.hbm [shape: f32[32,32], index: 10, kind: input, shape index: {}]   ;;  %s5249_s11 = inlined_call_operand.hbm [shape: f32[1,32], index: 11, kind: input, shape index: {}]   ;;  %s5250_s12 = inlined_call_operand.vmem [shape: f32[1,32], index: 12, kind: input, shape index: {}]   ;;  %s5251_s13 = inlined_call_operand.<no memory space> [shape: f32[1], index: 13, kind: input, shape index: {}]   ;;  %s5252_s14 = inlined_call_operand.vmem [shape: f32[32,3], index: 14, kind: input, shape index: {}]   ;;  %s5253_s15 = inlined_call_operand.hbm [shape: f32[1,3], index: 15, kind: input, shape index: {}]   ;;  %s5254_s16 = inlined_call_operand.hbm [shape: f32[2,3], index: 16, kind: output, shape index: {}]  }
   0x1   :  { %5256 = sst [smem:[#allocation21_spill]] %s5238_s0 }
   0x2   :  { %22 = vsyncpa [#allocation5], 0 }
   0x3   :  { %23 = vsyncpa [#allocation8], 0 }
   0x4   :  { %24 = vsyncpa [#allocation11], 0 }
   0x5   :  { %25 = vsyncpa [#allocation14], 0 }
   0x6   :  { %26 = vsyncpa [#allocation6], 0  ;;  %s4520_s21 = smov [#allocation7]   ;;  %s4521_s23 = smov [#allocation10]  }
   0x7   :  { %s56_s22 = sshll.u32 %s4520_s21, 4  ;;  %s82_s24 = sshll.u32 %s4521_s23, 4  ;;  %s57_s22 = int_to_ptr.vmem [resolvable:$true] %s56_s22  ;;  %s4620_s24 = int_to_ptr.vmem [resolvable:$true] %s82_s24 }
   0x8   :  { %s4356_s27 = scalar_lea.hbm %s5245_s7, 512 }
   0x9   :  { %p4357_p0 = scmp.ne.s32.totalorder %s5245_s7, %s4356_s27  ;;  %p4360_p1 = scmp.lt.u32.totalorder %s4356_s27, %s5245_s7 }
   0xb   :  { %p4362_p2 = pnand %p4360_p1, %p4357_p0 }
   0xd   :  { %4365 = shalt.err (!%p4362_p2)
}
   0xe   :  { %s4366_s17 = scalar_lea.vmem %s57_s22, 512  ;;  %p4371_p4 = scmp.lt.s32.totalorder %s57_s22, %s57_s22 }
   0xf   :  { %p4367_p3 = scmp.ne.s32.totalorder %s57_s22, %s4366_s17  ;;  %p4372_p5 = scmp.lt.s32.totalorder %s4366_s17, %s4366_s17 }
  0x11   :  { %p4373_p6 = por %p4372_p5, %p4371_p4 }
  0x13   :  { %p4374_p7 = pnand %p4373_p6, %p4367_p3 }
  0x15   :  { %4377 = shalt.err (!%p4374_p7)
}
  0x16   :  { %s4522_s18 = smov 128   ;;  %s4523_s19 = smov 8  }
  0x17   :  { %62 = dma.hbm_to_vmem [thread:$0]  %s5245_s7, 512, %s57_s22, [#allocation8], %s4522_s18, %s4522_s18, %s4523_s19  }
  0x18   :  { %s4378_s26 = scalar_lea.hbm %s5248_s10, 512 }
  0x19   :  { %p4379_p8 = scmp.ne.s32.totalorder %s5248_s10, %s4378_s26  ;;  %p4382_p9 = scmp.lt.u32.totalorder %s4378_s26, %s5248_s10 }
  0x1b   :  { %p4384_p10 = pnand %p4382_p9, %p4379_p8 }
  0x1d   :  { %4387 = shalt.err (!%p4384_p10)
}
  0x1e   :  { %s4388_s0 = scalar_lea.vmem %s4620_s24, 512  ;;  %p4393_p12 = scmp.lt.s32.totalorder %s4620_s24, %s4620_s24 }
  0x1f   :  { %p4389_p11 = scmp.ne.s32.totalorder %s4620_s24, %s4388_s0  ;;  %p4394_p13 = scmp.lt.s32.totalorder %s4388_s0, %s4388_s0 }
  0x21   :  { %p4395_p0 = por %p4394_p13, %p4393_p12 }
  0x23   :  { %p4396_p1 = pnand %p4395_p0, %p4389_p11 }
  0x25   :  { %4399 = shalt.err (!%p4396_p1)
}
  0x26   :  { %88 = dma.hbm_to_vmem [thread:$0]  %s5248_s10, 512, %s4620_s24, [#allocation11], %s4522_s18, %s4522_s18, %s4523_s19  }
  0x27   :  { %s4524_s17 = smov [#allocation4]   ;;  %s4525_s21 = smov [#allocation9]  }
  0x28   :  { %s34_s20 = sshll.u32 %s4524_s17, 4  ;;  %s68_s23 = sshll.u32 %s4525_s21, 4  ;;  %s35_s20 = int_to_ptr.vmem [resolvable:$true] %s34_s20  ;;  %s4657_s23 = int_to_ptr.vmem [resolvable:$true] %s68_s23 }
  0x29   :  { %s4400_s27 = scalar_lea.hbm %s5239_s1, 256 }
  0x2a   :  { %p4401_p2 = scmp.ne.s32.totalorder %s5239_s1, %s4400_s27  ;;  %p4404_p3 = scmp.lt.u32.totalorder %s4400_s27, %s5239_s1 }
  0x2c   :  { %p4406_p4 = pnand %p4404_p3, %p4401_p2 }
  0x2e   :  { %4409 = shalt.err (!%p4406_p4)
}
  0x2f   :  { %s4410_s10 = scalar_lea.vmem %s35_s20, 256  ;;  %p4415_p6 = scmp.lt.s32.totalorder %s35_s20, %s35_s20 }
  0x30   :  { %p4411_p5 = scmp.ne.s32.totalorder %s35_s20, %s4410_s10  ;;  %p4416_p7 = scmp.lt.s32.totalorder %s4410_s10, %s4410_s10 }
  0x32   :  { %p4417_p8 = por %p4416_p7, %p4415_p6 }
  0x34   :  { %p4418_p9 = pnand %p4417_p8, %p4411_p5 }
  0x36   :  { %4421 = shalt.err (!%p4418_p9)
}
  0x37   :  { %40 = dma.hbm_to_vmem [thread:$0]  %s5239_s1, 256, %s35_s20, [#allocation5], %s4522_s18, %s4522_s18, %s4523_s19  }
  0x38   :  { %s4422_s21 = scalar_lea.hbm %s5246_s8, 512 }
  0x39   :  { %p4423_p10 = scmp.ne.s32.totalorder %s5246_s8, %s4422_s21  ;;  %p4426_p11 = scmp.lt.u32.totalorder %s4422_s21, %s5246_s8 }
  0x3b   :  { %p4428_p12 = pnand %p4426_p11, %p4423_p10 }
  0x3d   :  { %4431 = shalt.err (!%p4428_p12)
}
  0x3e   :  { %s4432_s29 = scalar_lea.vmem %s4657_s23, 512  ;;  %p4437_p0 = scmp.lt.s32.totalorder %s4657_s23, %s4657_s23 }
  0x3f   :  { %p4433_p13 = scmp.ne.s32.totalorder %s4657_s23, %s4432_s29  ;;  %p4438_p1 = scmp.lt.s32.totalorder %s4432_s29, %s4432_s29 }
  0x41   :  { %p4439_p2 = por %p4438_p1, %p4437_p0 }
  0x43   :  { %p4440_p3 = pnand %p4439_p2, %p4433_p13 }
  0x45   :  { %4443 = shalt.err (!%p4440_p3)
}
  0x46   :  { %74 = dma.hbm_to_vmem [thread:$0]  %s5246_s8, 512, %s4657_s23, [#allocation8], %s4522_s18, %s4522_s18, %s4523_s19  }
  0x47   :  { %s4526_s30 = smov [#allocation12]   ;;  %s4527_s10 = smov [#allocation13]  }
  0x48   :  { %s95_s0 = sshll.u32 %s4526_s30, 4  ;;  %s111_s24 = sshll.u32 %s4527_s10, 4  ;;  %s96_s0 = int_to_ptr.vmem [resolvable:$true] %s95_s0  ;;  %s112_s24 = int_to_ptr.vmem [resolvable:$true] %s111_s24 }
  0x49   :  { %s4444_s17 = scalar_lea.hbm %s5249_s11, 16 }
  0x4a   :  { %p4445_p4 = scmp.ne.s32.totalorder %s5249_s11, %s4444_s17  ;;  %p4448_p5 = scmp.lt.u32.totalorder %s4444_s17, %s5249_s11 }
  0x4c   :  { %p4450_p6 = pnand %p4448_p5, %p4445_p4 }
  0x4e   :  { %4453 = shalt.err (!%p4450_p6)
}
  0x4f   :  { %s4454_s8 = scalar_lea.vmem %s96_s0, 16  ;;  %s4458_s18 = scalar_lea.vmem %s96_s0, 32 }
  0x50   :  { %p4455_p7 = scmp.ne.s32.totalorder %s96_s0, %s4454_s8  ;;  %p4459_p8 = scmp.lt.s32.totalorder %s96_s0, %s96_s0 }
  0x51   :  { %p4460_p9 = scmp.lt.s32.totalorder %s4458_s18, %s4454_s8 }
  0x53   :  { %p4461_p10 = por %p4460_p9, %p4459_p8 }
  0x55   :  { %p4462_p11 = pnand %p4461_p10, %p4455_p7 }
  0x57   :  { %4465 = shalt.err (!%p4462_p11)
}
  0x58   :  { %98 = dma.hbm_to_vmem [thread:$0]  %s5249_s11, 16, %s96_s0, [#allocation11]  }
  0x59   :  { %s4466_s1 = scalar_lea.hbm %s5253_s15, 16 }
  0x5a   :  { %p4467_p12 = scmp.ne.s32.totalorder %s5253_s15, %s4466_s1  ;;  %p4470_p13 = scmp.lt.u32.totalorder %s4466_s1, %s5253_s15 }
  0x5c   :  { %p4472_p0 = pnand %p4470_p13, %p4467_p12 }
  0x5e   :  { %4475 = shalt.err (!%p4472_p0)
}
  0x5f   :  { %s4476_s22 = scalar_lea.vmem %s112_s24, 16  ;;  %s4480_s17 = scalar_lea.vmem %s112_s24, 32 }
  0x60   :  { %p4477_p1 = scmp.ne.s32.totalorder %s112_s24, %s4476_s22  ;;  %p4481_p2 = scmp.lt.s32.totalorder %s112_s24, %s112_s24 }
  0x61   :  { %p4482_p3 = scmp.lt.s32.totalorder %s4480_s17, %s4476_s22 }
  0x63   :  { %p4483_p4 = por %p4482_p3, %p4481_p2 }
  0x65   :  { %p4484_p5 = pnand %p4483_p4, %p4477_p1 }
  0x67   :  { %4487 = shalt.err (!%p4484_p5)
}
  0x68   :  { %114 = dma.hbm_to_vmem [thread:$0]  %s5253_s15, 16, %s112_s24, [#allocation14]  }
  0x69   :  { %4510 = dma.done.wait [#allocation5], 256  }
  0x6a   :  { %4511 = vsyncadd [#allocation5], 4294967040 }
  0x6b   :  { %4512 = dma.done.wait [#allocation8], 1024  }
  0x6c   :  { %4513 = vsyncadd [#allocation8], 4294966272 }
  0x6d   :  { %4514 = dma.done.wait [#allocation11], 528  }
  0x6e   :  { %4515 = vsyncadd [#allocation11], 4294966768 }
  0x6f   :  { %4516 = dma.done.wait [#allocation14], 16  }
  0x70   :  { %4517 = vsyncadd [#allocation14], 4294967280  ;;  %v4528_v0 = vmov 0.0|0.0   ;;  %vm4529_vm0 = vmmov 0   ;;  %v4530_v1 = vmov 0.0   ;;  %vm148_vm1 = vcmask 130048  }
  0x71   :  { %3947 = vmatprep.subr.bf16.mxu1 %v4528_v0  ;;  %3643 = vmatprep.mubr.msk.f32.mxu1 %vm4529_vm0, %v4530_v1  ;;  %v135_v2 = vld [vmem:[#allocation4] sm:$0xff]  ;;  %v136_v3 = vld [vmem:[#allocation4 + $0x8] sm:$0xff]  ;;  %v137_v4 = vld [vmem:[%s5240_s2] sm:$0xff]  ;;  %s5257_s8 = sld [smem:[#allocation21_spill]]  ;;  %s4531_s30 = smov 64   ;;  %vm333_vm2 = vcmask 254976  }
  0x72   :  { %v3943_v5 = vpack.c.bf16 %v136_v3, %v135_v2  ;;  %v138_v6 = vld [vmem:[%s5240_s2 + $0x8] sm:$0xff]  ;;  %v139_v9 = vld [vmem:[%s5240_s2 + $0x10] sm:$0xff]  ;;  %v140_v10 = vld [vmem:[%s5240_s2 + $0x18] sm:$0xff]  ;;  %vm230_vm3 = vcmask 261120   ;;  %vm442_vm4 = vcmask 257026   ;;  %vm666_vm5 = vcmask 261126  }
  0x73   :  { %v4730_v8 = vpack.c.bf16 %v138_v6, %v137_v4  ;;  %v4743_v12 = vpack.c.bf16 %v140_v10, %v139_v9  ;;  %v3421_v13 = vld [vmem:[%s5241_s3] ss:$0 sm:$0xff]  ;;  %s4532_s3 = smov 32   ;;  %vm554_vm6 = vcmask 259076   ;;  %vm3390_vm7 = vcmask 17408  }
  0x74   :  { %3944 = vmatprep.subr.bf16.mxu0 %v3943_v5 }
  0x75   :  { %3949 = vmatpush3.bf16.msra.mxu1 %v4730_v8  ;;  %3946 = vmatpush3.bf16.msra.mxu0 %v3943_v5 }
  0x76   :  { %3950 = vmatprep.subr.bf16.mxu1 %v4528_v0  ;;  %3953 = vmatprep.subr.bf16.mxu0 %v4528_v0 }
  0x77   :  { %v133_v7 = vld [vmem:[%s5257_s8] sm:$0xff]  ;;  %v134_v11 = vld [vmem:[%s5257_s8 + $0x8] sm:$0xff] }
  0x78   :  { %3632 = vmatprep.mubr.msk.f32.mxu0 %vm148_vm1, %v133_v7 }
  0x79   :  { %3633 = vmatmul.mubr.msk.f32.vlgmr.msra.gmra.mrb[0].mxu0 %vm148_vm1, %v134_v11  ;;  %3952 = vmatpush3.bf16.msra.mxu1 %v4743_v12 }
  0x7a   :  { %3955 = vmatpush3.bf16.msra.mxu0 %v4730_v8  ;;  %3654 = vmatprep.mubr.msk.f32.mxu0 %vm4529_vm0, %v4530_v1 }
  0x7b   :  { %3956 = vmatprep.subr.bf16.mxu0 %v4528_v0  ;;  %3959 = vmatprep.subr.bf16.mxu1 %v4528_v0 }
  0x7c   :  { %3644 = vmatmul.mubr.f32.vlgmr.msra.gmra.mrb[0].mxu1 %v4530_v1 }
  0x7d   :  { %3961 = vmatpush3.bf16.msra.mxu1 %v4730_v8  ;;  %3665 = vmatprep.mubr.msk.f32.mxu1 %vm4529_vm0, %v4530_v1 }
  0x7e   :  { %3958 = vmatpush3.bf16.msra.mxu0 %v4743_v12  ;;  %3962 = vmatprep.subr.bf16.mxu1 %v4528_v0 }
  0x7f   :  { %3965 = vmatprep.subr.bf16.mxu0 %v4528_v0 }
  0x81   :  { %3964 = vmatpush3.bf16.msra.mxu1 %v4743_v12 }
  0x82   :  { %3971 = vmatprep.subr.bf16.mxu1 %v4528_v0 }
 0x14c   :  { %v3634_v14 = vpop.f32.mrb[0].mxu0 }
 0x14d   :  { %v4766_v15 = vadd.f32 %v3634_v14, %v3421_v13  ;;  %v221_v16 = vpop.f32.mrb[1].mxu0 }
 0x14e   :  { %v4768_v17 = vadd.f32 %v3421_v13, %v221_v16 }
 0x14f   :  { %v300_v18 = vpop.f32.mrb[0].mxu1 }
 0x150   :  { %v304_v19 = vadd.f32 %v300_v18, %v4768_v17  ;;  %v3645_v20 = vpop.f32.mrb[1].mxu1 }
 0x152   :  { %4138 = vtanh.f32 %v304_v19  ;;  %v3424_v22 = vmul.f32 -1.442695, %v304_v19 }
 0x154   :  { %4140 = vpow2.f32 %v3424_v22 }
 0x15c   :  { %v4139_v21 = vpop.eup %4138 }
 0x15d   :  { %314 = vrot.lane.b32.xlu0 %v4139_v21, %s4531_s30 }
 0x15e   :  { %v4141_v23 = vpop.eup %4140 }
 0x15f   :  { %v308_v24 = vadd.f32 1.0, %v4141_v23 }
 0x161   :  { %4142 = vrcp.f32 %v308_v24 }
 0x16b   :  { %v4143_v25 = vpop.eup %4142 }
 0x16c   :  { %v312_v28 = vmul.f32 0.0, %v4143_v25 }
 0x1cf   :  { %v315_v26 = vpop.permute.xlu0 %314 }
 0x1d0   :  { %v317_v27 = vmul.f32 %v4143_v25, %v315_v26 }
 0x1d2   :  { %319 = vrot.lane.b32.xlu0 %v317_v27, %s4532_s3 }
 0x244   :  { %v320_v29 = vpop.permute.xlu0 %319 }
 0x245   :  { %v322_v30 = vadd.f32 %v320_v29, %v312_v28 }
 0x247   :  { %4144 = vtanh.f32 %v322_v30  ;;  %v419_v46 = vrot.slane %v322_v30, 6 }
 0x251   :  { %v4145_v31 = vpop.eup %4144 }
 0x252   :  { %325 = vrot.lane.b32.xlu1 %v4145_v31, %s4531_s30 }
 0x2c4   :  { %v326_v32 = vpop.permute.xlu1 %325 }
 0x2c5   :  { %v328_v33 = vmul.f32 %v4143_v25, %v326_v32 }
 0x2c7   :  { %330 = vrot.lane.b32.xlu1 %v328_v33, %s4532_s3 }
 0x339   :  { %v331_v34 = vpop.permute.xlu1 %330 }
 0x33a   :  { %334 = vst.msk [vmem:[#allocation2] sm:$0x3] %vm333_vm2, %v331_v34  ;;  %3655 = vmatmul.mubr.msk.f32.vlgmr.msra.gmra.mrb[2].mxu0 %vm230_vm3, %v331_v34 }
 0x33b   :  { %3967 = vmatpush3.bf16.msra.mxu0 %v4730_v8  ;;  %3676 = vmatprep.mubr.msk.f32.mxu0 %vm4529_vm0, %v4530_v1 }
 0x33c   :  { %3968 = vmatprep.subr.bf16.mxu0 %v4528_v0 }
 0x33f   :  { %3970 = vmatpush3.bf16.msra.mxu0 %v4743_v12 }
 0x340   :  { %3977 = vmatprep.subr.bf16.mxu0 %v4528_v0 }
 0x40d   :  { %v403_v35 = vpop.f32.mrb[2].mxu0 }
 0x40e   :  { %v408_v36 = vrot.slane %v403_v35, 6  ;;  %v3656_v37 = vpop.f32.mrb[3].mxu0 }
 0x410   :  { %v410_v38 = vadd.f32 %v408_v36, %v4768_v17 }
 0x412   :  { %4146 = vtanh.f32 %v410_v38  ;;  %v3426_v40 = vmul.f32 -1.442695, %v410_v38 }
 0x414   :  { %4148 = vpow2.f32 %v3426_v40 }
 0x41c   :  { %v4147_v39 = vpop.eup %4146 }
 0x41d   :  { %423 = vrot.lane.b32.xlu0 %v4147_v39, %s4531_s30 }
 0x41e   :  { %v4149_v41 = vpop.eup %4148 }
 0x41f   :  { %v414_v42 = vadd.f32 1.0, %v4149_v41 }
 0x421   :  { %4150 = vrcp.f32 %v414_v42 }
 0x42b   :  { %v4151_v43 = vpop.eup %4150 }
 0x42c   :  { %v421_v47 = vmul.f32 %v4151_v43, %v419_v46 }
 0x48f   :  { %v424_v44 = vpop.permute.xlu0 %423 }
 0x490   :  { %v426_v45 = vmul.f32 %v4151_v43, %v424_v44 }
 0x492   :  { %428 = vrot.lane.b32.xlu1 %v426_v45, %s4532_s3 }
 0x504   :  { %v429_v48 = vpop.permute.xlu1 %428 }
 0x505   :  { %v431_v49 = vadd.f32 %v429_v48, %v421_v47 }
 0x507   :  { %4152 = vtanh.f32 %v431_v49  ;;  %v531_v4 = vrot.slane %v431_v49, 6 }
 0x511   :  { %v4153_v50 = vpop.eup %4152 }
 0x512   :  { %434 = vrot.lane.b32.xlu0 %v4153_v50, %s4531_s30 }
 0x584   :  { %v435_v51 = vpop.permute.xlu0 %434 }
 0x585   :  { %v4787_v52 = vmul.f32 %v4151_v43, %v435_v51 }
 0x587   :  { %v444_v53 = vrot.slane %v4787_v52, 2 }
 0x589   :  { %445 = vrot.lane.b32.xlu1 %v444_v53, %s4532_s3 }
 0x5fb   :  { %v446_v54 = vpop.permute.xlu1 %445 }
 0x5fc   :  { %3666 = vmatmul.mubr.msk.f32.vlgmr.msra.gmra.mrb[2].mxu1 %vm230_vm3, %v446_v54 }
 0x5fd   :  { %3973 = vmatpush3.bf16.msra.mxu1 %v4730_v8  ;;  %3687 = vmatprep.mubr.msk.f32.mxu1 %vm4529_vm0, %v4530_v1 }
 0x5fe   :  { %3974 = vmatprep.subr.bf16.mxu1 %v4528_v0 }
 0x601   :  { %3976 = vmatpush3.bf16.msra.mxu1 %v4743_v12 }
 0x602   :  { %3983 = vmatprep.subr.bf16.mxu1 %v4528_v0 }
 0x6cf   :  { %v515_v55 = vpop.f32.mrb[2].mxu1 }
 0x6d0   :  { %v520_v56 = vrot.slane %v515_v55, 4  ;;  %v3667_v57 = vpop.f32.mrb[3].mxu1 }
 0x6d2   :  { %v522_v58 = vadd.f32 %v520_v56, %v4768_v17 }
 0x6d4   :  { %4154 = vtanh.f32 %v522_v58  ;;  %v3428_v60 = vmul.f32 -1.442695, %v522_v58 }
 0x6d6   :  { %4156 = vpow2.f32 %v3428_v60 }
 0x6de   :  { %v4155_v59 = vpop.eup %4154 }
 0x6df   :  { %535 = vrot.lane.b32.xlu0 %v4155_v59, %s4531_s30 }
 0x6e0   :  { %v4157_v61 = vpop.eup %4156 }
 0x6e1   :  { %v526_v62 = vadd.f32 1.0, %v4157_v61 }
 0x6e3   :  { %4158 = vrcp.f32 %v526_v62 }
 0x6ed   :  { %v4159_v63 = vpop.eup %4158 }
 0x6ee   :  { %v533_v5 = vmul.f32 %v4159_v63, %v531_v4 }
 0x751   :  { %v536_v2 = vpop.permute.xlu0 %535 }
 0x752   :  { %v538_v3 = vmul.f32 %v4159_v63, %v536_v2 }
 0x754   :  { %540 = vrot.lane.b32.xlu1 %v538_v3, %s4532_s3 }
 0x7c6   :  { %v541_v6 = vpop.permute.xlu1 %540 }
 0x7c7   :  { %v543_v7 = vadd.f32 %v541_v6, %v533_v5 }
 0x7c9   :  { %4160 = vtanh.f32 %v543_v7  ;;  %v643_v28 = vrot.slane %v543_v7, 6 }
 0x7d3   :  { %v4161_v9 = vpop.eup %4160 }
 0x7d4   :  { %546 = vrot.lane.b32.xlu0 %v4161_v9, %s4531_s30 }
 0x846   :  { %v547_v10 = vpop.permute.xlu0 %546 }
 0x847   :  { %v4802_v11 = vmul.f32 %v4159_v63, %v547_v10 }
 0x849   :  { %v556_v13 = vrot.slane %v4802_v11, 4 }
 0x84b   :  { %557 = vrot.lane.b32.xlu1 %v556_v13, %s4532_s3 }
 0x8bd   :  { %v558_v14 = vpop.permute.xlu1 %557 }
 0x8be   :  { %3677 = vmatmul.mubr.msk.f32.vlgmr.msra.gmra.mrb[4].mxu0 %vm230_vm3, %v558_v14 }
 0x8bf   :  { %3979 = vmatpush3.bf16.msra.mxu0 %v4730_v8  ;;  %3698 = vmatprep.mubr.msk.f32.mxu0 %vm4529_vm0, %v4530_v1 }
 0x8c0   :  { %3980 = vmatprep.subr.bf16.mxu0 %v4528_v0 }
 0x8c3   :  { %3982 = vmatpush3.bf16.msra.mxu0 %v4743_v12 }
 0x8c4   :  { %3989 = vmatprep.subr.bf16.mxu0 %v4528_v0 }
 0x991   :  { %v627_v16 = vpop.f32.mrb[4].mxu0 }
 0x992   :  { %v632_v18 = vrot.slane %v627_v16, 2  ;;  %v3678_v19 = vpop.f32.mrb[5].mxu0 }
 0x994   :  { %v634_v20 = vadd.f32 %v632_v18, %v4768_v17 }
 0x996   :  { %4162 = vtanh.f32 %v634_v20  ;;  %v3430_v22 = vmul.f32 -1.442695, %v634_v20 }
 0x998   :  { %4164 = vpow2.f32 %v3430_v22 }
 0x9a0   :  { %v4163_v21 = vpop.eup %4162 }
 0x9a1   :  { %647 = vrot.lane.b32.xlu0 %v4163_v21, %s4531_s30 }
 0x9a2   :  { %v4165_v23 = vpop.eup %4164 }
 0x9a3   :  { %v638_v24 = vadd.f32 1.0, %v4165_v23 }
 0x9a5   :  { %4166 = vrcp.f32 %v638_v24 }
 0x9af   :  { %v4167_v25 = vpop.eup %4166 }
 0x9b0   :  { %v645_v29 = vmul.f32 %v4167_v25, %v643_v28 }
 0xa13   :  { %v648_v26 = vpop.permute.xlu0 %647 }
 0xa14   :  { %v650_v27 = vmul.f32 %v4167_v25, %v648_v26 }
 0xa16   :  { %652 = vrot.lane.b32.xlu1 %v650_v27, %s4532_s3 }
 0xa88   :  { %v653_v30 = vpop.permute.xlu1 %652 }
 0xa89   :  { %v655_v31 = vadd.f32 %v653_v30, %v645_v29 }
 0xa8b   :  { %4168 = vtanh.f32 %v655_v31  ;;  %v752_v46 = vrot.slane %v655_v31, 6 }
 0xa95   :  { %v4169_v17 = vpop.eup %4168 }
 0xa96   :  { %658 = vrot.lane.b32.xlu0 %v4169_v17, %s4531_s30 }
 0xb08   :  { %v659_v32 = vpop.permute.xlu0 %658 }
 0xb09   :  { %v4817_v33 = vmul.f32 %v4167_v25, %v659_v32 }
 0xb0b   :  { %v668_v34 = vrot.slane %v4817_v33, 6 }
 0xb0d   :  { %669 = vrot.lane.b32.xlu1 %v668_v34, %s4532_s3 }
 0xb7f   :  { %v670_v35 = vpop.permute.xlu1 %669 }
 0xb80   :  { %3688 = vmatmul.mubr.msk.f32.vlgmr.msra.gmra.mrb[4].mxu1 %vm230_vm3, %v670_v35 }
 0xb81   :  { %3985 = vmatpush3.bf16.msra.mxu1 %v4730_v8  ;;  %3709 = vmatprep.mubr.msk.f32.mxu1 %vm4529_vm0, %v4530_v1 }
 0xb82   :  { %3986 = vmatprep.subr.bf16.mxu1 %v4528_v0 }
 0xb85   :  { %3988 = vmatpush3.bf16.msra.mxu1 %v4743_v12 }
 0xc53   :  { %v739_v36 = vpop.f32.mrb[4].mxu1 }
 0xc54   :  { %v743_v37 = vadd.f32 %v739_v36, %v4766_v15  ;;  %v3689_v38 = vpop.f32.mrb[5].mxu1 }
 0xc56   :  { %4170 = vtanh.f32 %v743_v37  ;;  %v3432_v40 = vmul.f32 -1.442695, %v743_v37 }
 0xc58   :  { %4172 = vpow2.f32 %v3432_v40 }
 0xc60   :  { %v4171_v39 = vpop.eup %4170 }
 0xc61   :  { %756 = vrot.lane.b32.xlu0 %v4171_v39, %s4531_s30 }
 0xc62   :  { %v4173_v41 = vpop.eup %4172 }
 0xc63   :  { %v747_v42 = vadd.f32 1.0, %v4173_v41 }
 0xc65   :  { %4174 = vrcp.f32 %v747_v42 }
 0xc6f   :  { %v4175_v43 = vpop.eup %4174 }
 0xc70   :  { %v754_v47 = vmul.f32 %v4175_v43, %v752_v46 }
 0xcd3   :  { %v757_v44 = vpop.permute.xlu0 %756 }
 0xcd4   :  { %v759_v45 = vmul.f32 %v4175_v43, %v757_v44 }
 0xcd6   :  { %761 = vrot.lane.b32.xlu1 %v759_v45, %s4532_s3 }
 0xd48   :  { %v762_v48 = vpop.permute.xlu1 %761 }
 0xd49   :  { %v764_v49 = vadd.f32 %v762_v48, %v754_v47 }
 0xd4b   :  { %4176 = vtanh.f32 %v764_v49 }
 0xd55   :  { %v4177_v50 = vpop.eup %4176 }
 0xd56   :  { %767 = vrot.lane.b32.xlu0 %v4177_v50, %s4531_s30 }
 0xdc8   :  { %v768_v51 = vpop.permute.xlu0 %767 }
 0xdc9   :  { %v770_v53 = vmul.f32 %v4175_v43, %v768_v51 }
 0xdcb   :  { %772 = vrot.lane.b32.xlu1 %v770_v53, %s4532_s3 }
 0xe3d   :  { %v773_v54 = vpop.permute.xlu1 %772 }
 0xe3e   :  { %775 = vst.msk [vmem:[#allocation2 + $0x8] sm:$0x3] %vm333_vm2, %v773_v54  ;;  %3699 = vmatmul.mubr.msk.f32.vlgmr.msra.gmra.mrb[6].mxu0 %vm230_vm3, %v773_v54  ;;  %v1109_v54 = vld [vmem:[%s5242_s4 + $0x8] sm:$0xff] }
 0xe3f   :  { %3991 = vmatpush3.bf16.msra.mxu0 %v4730_v8  ;;  %3720 = vmatprep.mubr.msk.f32.mxu0 %vm4529_vm0, %v4530_v1 }
 0xe40   :  { %3992 = vmatprep.subr.bf16.mxu0 %v4528_v0 }
 0xe43   :  { %3994 = vmatpush3.bf16.msra.mxu0 %v4743_v12  ;;  %v860_v12 = vrot.slane %v764_v49, 6 }
 0xe44   :  { %4003 = vmatprep.subr.bf16.mxu0 %v4528_v0 }
 0xf11   :  { %v844_v55 = vpop.f32.mrb[6].mxu0 }
 0xf12   :  { %v849_v56 = vrot.slane %v844_v55, 6  ;;  %v3700_v57 = vpop.f32.mrb[7].mxu0 }
 0xf13   :  { %v1110_v57 = vld [vmem:[%s5242_s4 + $0x10] sm:$0xff] }
 0xf14   :  { %v851_v58 = vadd.f32 %v849_v56, %v4766_v15  ;;  %v1112_v56 = vld [vmem:[%s5243_s5] sm:$0xff] }
 0xf16   :  { %4178 = vtanh.f32 %v851_v58  ;;  %v3434_v60 = vmul.f32 -1.442695, %v851_v58 }
 0xf18   :  { %4180 = vpow2.f32 %v3434_v60  ;;  %v1114_v60 = vld [vmem:[%s5243_s5 + $0x10] sm:$0xff] }
 0xf20   :  { %v4179_v59 = vpop.eup %4178 }
 0xf21   :  { %864 = vrot.lane.b32.xlu0 %v4179_v59, %s4531_s30  ;;  %v1111_v59 = vld [vmem:[%s5242_s4 + $0x18] sm:$0xff] }
 0xf22   :  { %v4181_v8 = vpop.eup %4180 }
 0xf23   :  { %v855_v61 = vadd.f32 1.0, %v4181_v8  ;;  %v1115_v8 = vld [vmem:[%s5243_s5 + $0x18] sm:$0xff] }
 0xf25   :  { %4182 = vrcp.f32 %v855_v61  ;;  %v3999_v61 = vpack.c.bf16 %v1111_v59, %v1110_v57 }
 0xf2f   :  { %v4183_v62 = vpop.eup %4182 }
 0xf30   :  { %v862_v3 = vmul.f32 %v4183_v62, %v860_v12 }
 0xf93   :  { %v865_v63 = vpop.permute.xlu0 %864 }
 0xf94   :  { %v867_v2 = vmul.f32 %v4183_v62, %v865_v63 }
 0xf96   :  { %869 = vrot.lane.b32.xlu1 %v867_v2, %s4532_s3 }
0x1008   :  { %v870_v4 = vpop.permute.xlu1 %869 }
0x1009   :  { %v872_v5 = vadd.f32 %v870_v4, %v862_v3 }
0x100b   :  { %4184 = vtanh.f32 %v872_v5  ;;  %v971_v27 = vrot.slane %v872_v5, 6 }
0x1015   :  { %v4185_v6 = vpop.eup %4184 }
0x1016   :  { %875 = vrot.lane.b32.xlu0 %v4185_v6, %s4531_s30 }
0x1088   :  { %v876_v7 = vpop.permute.xlu0 %875 }
0x1089   :  { %v4844_v9 = vmul.f32 %v4183_v62, %v876_v7  ;;  %v4900_v62 = vpack.c.bf16 %v1115_v8, %v1114_v60 }
0x108b   :  { %v884_v10 = vrot.slane %v4844_v9, 2 }
0x108d   :  { %885 = vrot.lane.b32.xlu1 %v884_v10, %s4532_s3  ;;  %v3439_v10 = vld [vmem:[%s5244_s6] ss:$0 sm:$0xff] }
0x10ff   :  { %v886_v13 = vpop.permute.xlu1 %885 }
0x1100   :  { %3710 = vmatmul.mubr.msk.f32.vlgmr.msra.gmra.mrb[6].mxu1 %vm230_vm3, %v886_v13 }
0x11d3   :  { %v955_v14 = vpop.f32.mrb[6].mxu1 }
0x11d4   :  { %v960_v16 = vrot.slane %v955_v14, 4  ;;  %v3711_v18 = vpop.f32.mrb[7].mxu1 }
0x11d6   :  { %v962_v19 = vadd.f32 %v960_v16, %v4766_v15 }
0x11d8   :  { %4186 = vtanh.f32 %v962_v19  ;;  %v3436_v21 = vmul.f32 -1.442695, %v962_v19 }
0x11da   :  { %4188 = vpow2.f32 %v3436_v21 }
0x11e2   :  { %v4187_v20 = vpop.eup %4186 }
0x11e3   :  { %975 = vrot.lane.b32.xlu0 %v4187_v20, %s4531_s30 }
0x11e4   :  { %v4189_v22 = vpop.eup %4188 }
0x11e5   :  { %v966_v23 = vadd.f32 1.0, %v4189_v22 }
0x11e7   :  { %4190 = vrcp.f32 %v966_v23 }
0x11f1   :  { %v4191_v24 = vpop.eup %4190 }
0x11f2   :  { %v973_v28 = vmul.f32 %v4191_v24, %v971_v27 }
0x1255   :  { %v976_v25 = vpop.permute.xlu0 %975 }
0x1256   :  { %v978_v26 = vmul.f32 %v4191_v24, %v976_v25 }
0x1258   :  { %980 = vrot.lane.b32.xlu1 %v978_v26, %s4532_s3 }
0x12ca   :  { %v981_v29 = vpop.permute.xlu1 %980 }
0x12cb   :  { %v983_v30 = vadd.f32 %v981_v29, %v973_v28 }
0x12cd   :  { %4192 = vtanh.f32 %v983_v30 }
0x12d7   :  { %v4193_v31 = vpop.eup %4192 }
0x12d8   :  { %986 = vrot.lane.b32.xlu0 %v4193_v31, %s4531_s30 }
0x134a   :  { %v987_v17 = vpop.permute.xlu0 %986 }
0x134b   :  { %v989_v32 = vmul.f32 %v4191_v24, %v987_v17 }
0x134d   :  { %v995_v34 = vrot.slane %v989_v32, 4 }
0x134f   :  { %996 = vrot.lane.b32.xlu1 %v995_v34, %s4532_s3 }
0x13c1   :  { %v997_v35 = vpop.permute.xlu1 %996 }
0x13c2   :  { %3721 = vmatmul.mubr.msk.f32.vlgmr.msra.gmra.mrb[8].mxu0 %vm230_vm3, %v997_v35 }
0x13c3   :  { %3742 = vmatprep.mubr.msk.f32.mxu0 %vm4529_vm0, %v4530_v1 }
0x1495   :  { %v1066_v36 = vpop.f32.mrb[8].mxu0 }
0x1496   :  { %v1071_v37 = vrot.slane %v1066_v36, 2  ;;  %v3722_v38 = vpop.f32.mrb[9].mxu0 }
0x1498   :  { %v1073_v39 = vadd.f32 %v1071_v37, %v4766_v15  ;;  %v1082_v15 = vrot.slane %v983_v30, 6 }
0x149a   :  { %4194 = vtanh.f32 %v1073_v39  ;;  %v3438_v41 = vmul.f32 -1.442695, %v1073_v39 }
0x149c   :  { %4196 = vpow2.f32 %v3438_v41 }
0x14a4   :  { %v4195_v40 = vpop.eup %4194 }
0x14a5   :  { %1086 = vrot.lane.b32.xlu0 %v4195_v40, %s4531_s30 }
0x14a6   :  { %v4197_v42 = vpop.eup %4196 }
0x14a7   :  { %v1077_v43 = vadd.f32 1.0, %v4197_v42 }
0x14a9   :  { %4198 = vrcp.f32 %v1077_v43 }
0x14b3   :  { %v4199_v44 = vpop.eup %4198 }
0x14b4   :  { %v1084_v47 = vmul.f32 %v4199_v44, %v1082_v15 }
0x1517   :  { %v1087_v45 = vpop.permute.xlu0 %1086 }
0x1518   :  { %v1089_v46 = vmul.f32 %v4199_v44, %v1087_v45 }
0x151a   :  { %1091 = vrot.lane.b32.xlu1 %v1089_v46, %s4532_s3 }
0x151e   :  { %439 = vrot.lane.b32.xlu1 %v4787_v52, %s4532_s3 }
0x1522   :  { %663 = vrot.lane.b32.xlu1 %v4817_v33, %s4532_s3  ;;  %v1108_v33 = vld [vmem:[%s5242_s4] sm:$0xff] }
0x1523   :  { %v3995_v55 = vpack.c.bf16 %v1109_v54, %v1108_v33 }
0x1525   :  { %3996 = vmatprep.subr.bf16.mxu1 %v3995_v55 }
0x1526   :  { %991 = vrot.lane.b32.xlu1 %v989_v32, %s4532_s3  ;;  %3998 = vmatpush3.bf16.msra.mxu1 %v3995_v55 }
0x1527   :  { %4000 = vmatprep.subr.bf16.mxu1 %v3999_v61 }
0x152a   :  { %4002 = vmatpush3.bf16.msra.mxu1 %v3999_v61 }
0x152b   :  { %4009 = vmatprep.subr.bf16.mxu1 %v4528_v0 }
0x158c   :  { %v1092_v48 = vpop.permute.xlu1 %1091 }
0x158d   :  { %v1094_v49 = vadd.f32 %v1092_v48, %v1084_v47 }
0x158f   :  { %4200 = vtanh.f32 %v1094_v49 }
0x1590   :  { %v440_v50 = vpop.permute.xlu1 %439 }
0x1591   :  { %443 = vst.msk [vmem:[#allocation2] sm:$0xc] %vm442_vm4, %v440_v50 }
0x1594   :  { %v664_v51 = vpop.permute.xlu1 %663 }
0x1595   :  { %667 = vst.msk [vmem:[#allocation2] sm:$0xc0] %vm666_vm5, %v664_v51 }
0x1598   :  { %v992_v52 = vpop.permute.xlu1 %991 }
0x1599   :  { %v4201_v53 = vpop.eup %4200  ;;  %994 = vst.msk [vmem:[#allocation2 + $0x8] sm:$0x30] %vm554_vm6, %v992_v52 }
0x159a   :  { %1097 = vrot.lane.b32.xlu0 %v4201_v53, %s4531_s30 }
0x159e   :  { %551 = vrot.lane.b32.xlu0 %v4802_v11, %s4532_s3  ;;  %v1113_v11 = vld [vmem:[%s5243_s5 + $0x8] sm:$0xff] }
0x159f   :  { %v4888_v58 = vpack.c.bf16 %v1113_v11, %v1112_v56 }
0x15a1   :  { %4005 = vmatpush3.bf16.msra.mxu0 %v4888_v58 }
0x15a2   :  { %880 = vrot.lane.b32.xlu0 %v4844_v9, %s4532_s3  ;;  %4006 = vmatprep.subr.bf16.mxu0 %v4528_v0 }
0x15a5   :  { %4008 = vmatpush3.bf16.msra.mxu0 %v4900_v62 }
0x15a6   :  { %4015 = vmatprep.subr.bf16.mxu0 %v4528_v0 }
0x15a8   :  { %3743 = vmatmul.mubr.f32.vlgmr.msra.gmra.mrb[10].mxu0 %v4530_v1 }
0x15a9   :  { %4017 = vmatpush3.bf16.msra.mxu0 %v4888_v58  ;;  %3764 = vmatprep.mubr.msk.f32.mxu0 %vm4529_vm0, %v4530_v1 }
0x15aa   :  { %4018 = vmatprep.subr.bf16.mxu0 %v4528_v0 }
0x15ad   :  { %4020 = vmatpush3.bf16.msra.mxu0 %v4900_v62 }
0x15ae   :  { %4027 = vmatprep.subr.bf16.mxu0 %v4528_v0 }
0x160c   :  { %v1098_v63 = vpop.permute.xlu0 %1097 }
0x160d   :  { %v1100_v2 = vmul.f32 %v4199_v44, %v1098_v63 }
0x160f   :  { %1102 = vrot.lane.b32.xlu0 %v1100_v2, %s4532_s3 }
0x1610   :  { %v552_v12 = vpop.permute.xlu0 %551 }
0x1611   :  { %555 = vst.msk [vmem:[#allocation2] sm:$0x30] %vm554_vm6, %v552_v12 }
0x1614   :  { %v881_v3 = vpop.permute.xlu0 %880 }
0x1615   :  { %883 = vst.msk [vmem:[#allocation2 + $0x8] sm:$0xc] %vm442_vm4, %v881_v3 }
0x1618   :  { %v1106_v4 = vld [vmem:[#allocation2] sm:$0xff] }
0x1619   :  { %3731 = vmatprep.mubr.msk.f32.mxu1 %vm230_vm3, %v1106_v4 }
0x167b   :  { %v1270_v7 = vpop.f32.mrb[10].mxu0 }
0x167c   :  { %v3744_v9 = vpop.f32.mrb[11].mxu0 }
0x1681   :  { %v1103_v5 = vpop.permute.xlu0 %1102 }
0x1682   :  { %1105 = vst.msk [vmem:[#allocation2 + $0x8] sm:$0xc0] %vm666_vm5, %v1103_v5 }
0x1689   :  { %v1107_v6 = vld [vmem:[#allocation2 + $0x8] sm:$0xff] }
0x168a   :  { %3732 = vmatmul.mubr.msk.f32.vlgmr.msra.gmra.mrb[8].mxu1 %vm230_vm3, %v1107_v6 }
0x168b   :  { %4011 = vmatpush3.bf16.msra.mxu1 %v4888_v58  ;;  %3753 = vmatprep.mubr.msk.f32.mxu1 %vm4529_vm0, %v4530_v1 }
0x168c   :  { %4012 = vmatprep.subr.bf16.mxu1 %v4528_v0 }
0x168f   :  { %4014 = vmatpush3.bf16.msra.mxu1 %v4900_v62 }
0x1690   :  { %4021 = vmatprep.subr.bf16.mxu1 %v4528_v0 }
0x175d   :  { %v3733_v13 = vpop.f32.mrb[8].mxu1 }
0x175e   :  { %v4928_v14 = vadd.f32 %v3733_v13, %v3439_v10  ;;  %v1195_v16 = vpop.f32.mrb[9].mxu1 }
0x175f   :  { %v4930_v18 = vadd.f32 %v3439_v10, %v1195_v16 }
0x1761   :  { %v1274_v19 = vadd.f32 %v1270_v7, %v4930_v18 }
0x1763   :  { %4202 = vtanh.f32 %v1274_v19  ;;  %v3442_v21 = vmul.f32 -1.442695, %v1274_v19 }
0x1765   :  { %4204 = vpow2.f32 %v3442_v21 }
0x176d   :  { %v4203_v20 = vpop.eup %4202 }
0x176e   :  { %1284 = vrot.lane.b32.xlu1 %v4203_v20, %s4531_s30 }
0x176f   :  { %v4205_v22 = vpop.eup %4204 }
0x1770   :  { %v1278_v23 = vadd.f32 1.0, %v4205_v22 }
0x1772   :  { %4206 = vrcp.f32 %v1278_v23 }
0x177c   :  { %v4207_v24 = vpop.eup %4206 }
0x177d   :  { %v1282_v27 = vmul.f32 0.0, %v4207_v24 }
0x17e0   :  { %v1285_v25 = vpop.permute.xlu1 %1284 }
0x17e1   :  { %v1287_v26 = vmul.f32 %v4207_v24, %v1285_v25 }
0x17e3   :  { %1289 = vrot.lane.b32.xlu0 %v1287_v26, %s4532_s3 }
0x1855   :  { %v1290_v28 = vpop.permute.xlu0 %1289 }
0x1856   :  { %v1292_v29 = vadd.f32 %v1290_v28, %v1282_v27 }
0x1858   :  { %4208 = vtanh.f32 %v1292_v29  ;;  %v1388_v45 = vrot.slane %v1292_v29, 6 }
0x1862   :  { %v4209_v30 = vpop.eup %4208 }
0x1863   :  { %1295 = vrot.lane.b32.xlu1 %v4209_v30, %s4531_s30 }
0x18d5   :  { %v1296_v31 = vpop.permute.xlu1 %1295 }
0x18d6   :  { %v1298_v17 = vmul.f32 %v4207_v24, %v1296_v31 }
0x18d8   :  { %1300 = vrot.lane.b32.xlu0 %v1298_v17, %s4532_s3 }
0x194a   :  { %v1301_v32 = vpop.permute.xlu0 %1300 }
0x194b   :  { %1303 = vst.msk [vmem:[#allocation2 + $0x10] sm:$0x3] %vm333_vm2, %v1301_v32  ;;  %3754 = vmatmul.mubr.msk.f32.vlgmr.msra.gmra.mrb[10].mxu1 %vm230_vm3, %v1301_v32 }
0x194c   :  { %4023 = vmatpush3.bf16.msra.mxu1 %v4888_v58  ;;  %3775 = vmatprep.mubr.msk.f32.mxu1 %vm4529_vm0, %v4530_v1 }
0x194d   :  { %4024 = vmatprep.subr.bf16.mxu1 %v4528_v0 }
0x1950   :  { %4026 = vmatpush3.bf16.msra.mxu1 %v4900_v62 }
0x1951   :  { %4033 = vmatprep.subr.bf16.mxu1 %v4528_v0 }
0x1a1e   :  { %v1372_v34 = vpop.f32.mrb[10].mxu1 }
0x1a1f   :  { %v1377_v35 = vrot.slane %v1372_v34, 6  ;;  %v3755_v36 = vpop.f32.mrb[11].mxu1 }
0x1a21   :  { %v1379_v37 = vadd.f32 %v1377_v35, %v4930_v18 }
0x1a23   :  { %4210 = vtanh.f32 %v1379_v37  ;;  %v3444_v39 = vmul.f32 -1.442695, %v1379_v37 }
0x1a25   :  { %4212 = vpow2.f32 %v3444_v39 }
0x1a2d   :  { %v4211_v38 = vpop.eup %4210 }
0x1a2e   :  { %1392 = vrot.lane.b32.xlu1 %v4211_v38, %s4531_s30 }
0x1a2f   :  { %v4213_v40 = vpop.eup %4212 }
0x1a30   :  { %v1383_v41 = vadd.f32 1.0, %v4213_v40 }
0x1a32   :  { %4214 = vrcp.f32 %v1383_v41 }
0x1a3c   :  { %v4215_v42 = vpop.eup %4214 }
0x1a3d   :  { %v1390_v46 = vmul.f32 %v4215_v42, %v1388_v45 }
0x1aa0   :  { %v1393_v43 = vpop.permute.xlu1 %1392 }
0x1aa1   :  { %v1395_v44 = vmul.f32 %v4215_v42, %v1393_v43 }
0x1aa3   :  { %1397 = vrot.lane.b32.xlu0 %v1395_v44, %s4532_s3 }
0x1b15   :  { %v1398_v15 = vpop.permute.xlu0 %1397 }
0x1b16   :  { %v1400_v47 = vadd.f32 %v1398_v15, %v1390_v46 }
0x1b18   :  { %4216 = vtanh.f32 %v1400_v47  ;;  %v1499_v63 = vrot.slane %v1400_v47, 6 }
0x1b22   :  { %v4217_v48 = vpop.eup %4216 }
0x1b23   :  { %1403 = vrot.lane.b32.xlu1 %v4217_v48, %s4531_s30 }
0x1b95   :  { %v1404_v49 = vpop.permute.xlu1 %1403 }
0x1b96   :  { %v4949_v50 = vmul.f32 %v4215_v42, %v1404_v49 }
0x1b98   :  { %v1412_v51 = vrot.slane %v4949_v50, 2 }
0x1b9a   :  { %1413 = vrot.lane.b32.xlu0 %v1412_v51, %s4532_s3 }
0x1c0c   :  { %v1414_v52 = vpop.permute.xlu0 %1413 }
0x1c0d   :  { %3765 = vmatmul.mubr.msk.f32.vlgmr.msra.gmra.mrb[12].mxu0 %vm230_vm3, %v1414_v52 }
0x1c0e   :  { %4029 = vmatpush3.bf16.msra.mxu0 %v4888_v58  ;;  %3786 = vmatprep.mubr.msk.f32.mxu0 %vm4529_vm0, %v4530_v1 }
0x1c0f   :  { %4030 = vmatprep.subr.bf16.mxu0 %v4528_v0 }
0x1c12   :  { %4032 = vmatpush3.bf16.msra.mxu0 %v4900_v62 }
0x1c13   :  { %4039 = vmatprep.subr.bf16.mxu0 %v4528_v0 }
0x1ce0   :  { %v1483_v53 = vpop.f32.mrb[12].mxu0 }
0x1ce1   :  { %v1488_v33 = vrot.slane %v1483_v53, 4  ;;  %v3766_v54 = vpop.f32.mrb[13].mxu0 }
0x1ce3   :  { %v1490_v55 = vadd.f32 %v1488_v33, %v4930_v18 }
0x1ce5   :  { %4218 = vtanh.f32 %v1490_v55  ;;  %v3446_v11 = vmul.f32 -1.442695, %v1490_v55 }
0x1ce7   :  { %4220 = vpow2.f32 %v3446_v11 }
0x1cef   :  { %v4219_v56 = vpop.eup %4218 }
0x1cf0   :  { %1503 = vrot.lane.b32.xlu1 %v4219_v56, %s4531_s30 }
0x1cf1   :  { %v4221_v57 = vpop.eup %4220 }
0x1cf2   :  { %v1494_v59 = vadd.f32 1.0, %v4221_v57 }
0x1cf4   :  { %4222 = vrcp.f32 %v1494_v59 }
0x1cfe   :  { %v4223_v60 = vpop.eup %4222 }
0x1cff   :  { %v1501_v2 = vmul.f32 %v4223_v60, %v1499_v63 }
0x1d62   :  { %v1504_v8 = vpop.permute.xlu1 %1503 }
0x1d63   :  { %v1506_v61 = vmul.f32 %v4223_v60, %v1504_v8 }
0x1d65   :  { %1508 = vrot.lane.b32.xlu0 %v1506_v61, %s4532_s3 }
0x1dd7   :  { %v1509_v12 = vpop.permute.xlu0 %1508 }
0x1dd8   :  { %v1511_v3 = vadd.f32 %v1509_v12, %v1501_v2 }
0x1dda   :  { %4224 = vtanh.f32 %v1511_v3  ;;  %v1610_v27 = vrot.slane %v1511_v3, 6 }
0x1de4   :  { %v4225_v4 = vpop.eup %4224 }
0x1de5   :  { %1514 = vrot.lane.b32.xlu1 %v4225_v4, %s4531_s30 }
0x1e57   :  { %v1515_v5 = vpop.permute.xlu1 %1514 }
0x1e58   :  { %v4964_v6 = vmul.f32 %v4223_v60, %v1515_v5 }
0x1e5a   :  { %v1523_v7 = vrot.slane %v4964_v6, 4 }
0x1e5c   :  { %1524 = vrot.lane.b32.xlu0 %v1523_v7, %s4532_s3 }
0x1ece   :  { %v1525_v9 = vpop.permute.xlu0 %1524 }
0x1ecf   :  { %3776 = vmatmul.mubr.msk.f32.vlgmr.msra.gmra.mrb[12].mxu1 %vm230_vm3, %v1525_v9 }
0x1ed0   :  { %4035 = vmatpush3.bf16.msra.mxu1 %v4888_v58  ;;  %3797 = vmatprep.mubr.msk.f32.mxu1 %vm4529_vm0, %v4530_v1 }
0x1ed1   :  { %4036 = vmatprep.subr.bf16.mxu1 %v4528_v0 }
0x1ed4   :  { %4038 = vmatpush3.bf16.msra.mxu1 %v4900_v62 }
0x1ed5   :  { %4045 = vmatprep.subr.bf16.mxu1 %v4528_v0 }
0x1fa2   :  { %v1594_v10 = vpop.f32.mrb[12].mxu1 }
0x1fa3   :  { %v1599_v13 = vrot.slane %v1594_v10, 2  ;;  %v3777_v16 = vpop.f32.mrb[13].mxu1 }
0x1fa5   :  { %v1601_v19 = vadd.f32 %v1599_v13, %v4930_v18 }
0x1fa7   :  { %4226 = vtanh.f32 %v1601_v19  ;;  %v3448_v21 = vmul.f32 -1.442695, %v1601_v19 }
0x1fa9   :  { %4228 = vpow2.f32 %v3448_v21 }
0x1fb1   :  { %v4227_v20 = vpop.eup %4226 }
0x1fb2   :  { %1614 = vrot.lane.b32.xlu1 %v4227_v20, %s4531_s30 }
0x1fb3   :  { %v4229_v22 = vpop.eup %4228 }
0x1fb4   :  { %v1605_v23 = vadd.f32 1.0, %v4229_v22 }
0x1fb6   :  { %4230 = vrcp.f32 %v1605_v23 }
0x1fc0   :  { %v4231_v24 = vpop.eup %4230 }
0x1fc1   :  { %v1612_v28 = vmul.f32 %v4231_v24, %v1610_v27 }
0x2024   :  { %v1615_v25 = vpop.permute.xlu1 %1614 }
0x2025   :  { %v1617_v26 = vmul.f32 %v4231_v24, %v1615_v25 }
0x2027   :  { %1619 = vrot.lane.b32.xlu0 %v1617_v26, %s4532_s3 }
0x2099   :  { %v1620_v29 = vpop.permute.xlu0 %1619 }
0x209a   :  { %v1622_v30 = vadd.f32 %v1620_v29, %v1612_v28 }
0x209c   :  { %4232 = vtanh.f32 %v1622_v30  ;;  %v1718_v45 = vrot.slane %v1622_v30, 6 }
0x20a6   :  { %v4233_v18 = vpop.eup %4232 }
0x20a7   :  { %1625 = vrot.lane.b32.xlu1 %v4233_v18, %s4531_s30 }
0x2119   :  { %v1626_v31 = vpop.permute.xlu1 %1625 }
0x211a   :  { %v4979_v17 = vmul.f32 %v4231_v24, %v1626_v31 }
0x211c   :  { %v1634_v32 = vrot.slane %v4979_v17, 6 }
0x211e   :  { %1635 = vrot.lane.b32.xlu0 %v1634_v32, %s4532_s3 }
0x2190   :  { %v1636_v34 = vpop.permute.xlu0 %1635 }
0x2191   :  { %3787 = vmatmul.mubr.msk.f32.vlgmr.msra.gmra.mrb[14].mxu0 %vm230_vm3, %v1636_v34 }
0x2192   :  { %4041 = vmatpush3.bf16.msra.mxu0 %v4888_v58  ;;  %3808 = vmatprep.mubr.msk.f32.mxu0 %vm4529_vm0, %v4530_v1 }
0x2193   :  { %4042 = vmatprep.subr.bf16.mxu0 %v4528_v0 }
0x2196   :  { %4044 = vmatpush3.bf16.msra.mxu0 %v4900_v62 }
0x2264   :  { %v1705_v35 = vpop.f32.mrb[14].mxu0 }
0x2265   :  { %v1709_v36 = vadd.f32 %v1705_v35, %v4928_v14  ;;  %v3788_v37 = vpop.f32.mrb[15].mxu0 }
0x2267   :  { %4234 = vtanh.f32 %v1709_v36  ;;  %v3450_v39 = vmul.f32 -1.442695, %v1709_v36 }
0x2269   :  { %4236 = vpow2.f32 %v3450_v39 }
0x2271   :  { %v4235_v38 = vpop.eup %4234 }
0x2272   :  { %1722 = vrot.lane.b32.xlu1 %v4235_v38, %s4531_s30 }
0x2273   :  { %v4237_v40 = vpop.eup %4236 }
0x2274   :  { %v1713_v41 = vadd.f32 1.0, %v4237_v40 }
0x2276   :  { %4238 = vrcp.f32 %v1713_v41 }
0x2280   :  { %v4239_v42 = vpop.eup %4238 }
0x2281   :  { %v1720_v46 = vmul.f32 %v4239_v42, %v1718_v45 }
0x22e4   :  { %v1723_v43 = vpop.permute.xlu1 %1722 }
0x22e5   :  { %v1725_v44 = vmul.f32 %v4239_v42, %v1723_v43 }
0x22e7   :  { %1727 = vrot.lane.b32.xlu0 %v1725_v44, %s4532_s3 }
0x2359   :  { %v1728_v15 = vpop.permute.xlu0 %1727 }
0x235a   :  { %v1730_v47 = vadd.f32 %v1728_v15, %v1720_v46 }
0x235c   :  { %4240 = vtanh.f32 %v1730_v47 }
0x2366   :  { %v4241_v48 = vpop.eup %4240 }
0x2367   :  { %1733 = vrot.lane.b32.xlu1 %v4241_v48, %s4531_s30 }
0x23d9   :  { %v1734_v49 = vpop.permute.xlu1 %1733 }
0x23da   :  { %v1736_v51 = vmul.f32 %v4239_v42, %v1734_v49 }
0x23dc   :  { %1738 = vrot.lane.b32.xlu0 %v1736_v51, %s4532_s3 }
0x244e   :  { %v1739_v52 = vpop.permute.xlu0 %1738 }
0x244f   :  { %1741 = vst.msk [vmem:[#allocation2 + $0x18] sm:$0x3] %vm333_vm2, %v1739_v52  ;;  %3798 = vmatmul.mubr.msk.f32.vlgmr.msra.gmra.mrb[14].mxu1 %vm230_vm3, %v1739_v52 }
0x2450   :  { %4047 = vmatpush3.bf16.msra.mxu1 %v4888_v58  ;;  %3819 = vmatprep.mubr.msk.f32.mxu1 %vm4529_vm0, %v4530_v1 }
0x2451   :  { %4048 = vmatprep.subr.bf16.mxu1 %v4528_v0 }
0x2454   :  { %4050 = vmatpush3.bf16.msra.mxu1 %v4900_v62  ;;  %v1826_v62 = vrot.slane %v1730_v47, 6 }
0x2455   :  { %4059 = vmatprep.subr.bf16.mxu1 %v4528_v0 }
0x2522   :  { %v1810_v53 = vpop.f32.mrb[14].mxu1 }
0x2523   :  { %v1815_v33 = vrot.slane %v1810_v53, 6  ;;  %v3799_v54 = vpop.f32.mrb[15].mxu1 }
0x2524   :  { %v2079_v54 = vld [vmem:[#allocation9 + $0x8] sm:$0xff] }
0x2525   :  { %v1817_v55 = vadd.f32 %v1815_v33, %v4928_v14  ;;  %v2078_v33 = vld [vmem:[#allocation9] sm:$0xff] }
0x2527   :  { %4242 = vtanh.f32 %v1817_v55  ;;  %v3452_v11 = vmul.f32 -1.442695, %v1817_v55  ;;  %v2076_v55 = vld [vmem:[#allocation7 + $0x10] sm:$0xff] }
0x2529   :  { %4244 = vpow2.f32 %v3452_v11  ;;  %v2077_v11 = vld [vmem:[#allocation7 + $0x18] sm:$0xff] }
0x2531   :  { %v4243_v56 = vpop.eup %4242 }
0x2532   :  { %1830 = vrot.lane.b32.xlu1 %v4243_v56, %s4531_s30  ;;  %v5035_v56 = vpack.c.bf16 %v2079_v54, %v2078_v33 }
0x2533   :  { %v4245_v58 = vpop.eup %4244 }
0x2534   :  { %v1821_v57 = vadd.f32 1.0, %v4245_v58  ;;  %v2080_v58 = vld [vmem:[#allocation9 + $0x10] sm:$0xff] }
0x2536   :  { %4246 = vrcp.f32 %v1821_v57  ;;  %v2081_v57 = vld [vmem:[#allocation9 + $0x18] sm:$0xff] }
0x2540   :  { %v4247_v59 = vpop.eup %4246 }
0x2541   :  { %v1828_v61 = vmul.f32 %v4247_v59, %v1826_v62 }
0x25a4   :  { %v1831_v60 = vpop.permute.xlu1 %1830 }
0x25a5   :  { %v1833_v8 = vmul.f32 %v4247_v59, %v1831_v60 }
0x25a7   :  { %1835 = vrot.lane.b32.xlu0 %v1833_v8, %s4532_s3 }
0x2619   :  { %v1836_v63 = vpop.permute.xlu0 %1835 }
0x261a   :  { %v1838_v2 = vadd.f32 %v1836_v63, %v1828_v61 }
0x261c   :  { %4248 = vtanh.f32 %v1838_v2  ;;  %v1937_v26 = vrot.slane %v1838_v2, 6 }
0x2626   :  { %v4249_v12 = vpop.eup %4248 }
0x2627   :  { %1841 = vrot.lane.b32.xlu1 %v4249_v12, %s4531_s30 }
0x2699   :  { %v1842_v3 = vpop.permute.xlu1 %1841 }
0x269a   :  { %v5006_v4 = vmul.f32 %v4247_v59, %v1842_v3  ;;  %v4055_v59 = vpack.c.bf16 %v2077_v11, %v2076_v55 }
0x269c   :  { %v1850_v5 = vrot.slane %v5006_v4, 2 }
0x269e   :  { %1851 = vrot.lane.b32.xlu0 %v1850_v5, %s4532_s3  ;;  %v3457_v5 = vld [vmem:[%s5247_s9] ss:$0 sm:$0xff] }
0x2710   :  { %v1852_v7 = vpop.permute.xlu0 %1851 }
0x2711   :  { %3809 = vmatmul.mubr.msk.f32.vlgmr.msra.gmra.mrb[16].mxu0 %vm230_vm3, %v1852_v7 }
0x27e4   :  { %v1921_v9 = vpop.f32.mrb[16].mxu0 }
0x27e5   :  { %v1926_v10 = vrot.slane %v1921_v9, 4  ;;  %v3810_v13 = vpop.f32.mrb[17].mxu0 }
0x27e7   :  { %v1928_v16 = vadd.f32 %v1926_v10, %v4928_v14 }
0x27e9   :  { %4250 = vtanh.f32 %v1928_v16  ;;  %v3454_v20 = vmul.f32 -1.442695, %v1928_v16 }
0x27eb   :  { %4252 = vpow2.f32 %v3454_v20 }
0x27f3   :  { %v4251_v19 = vpop.eup %4250 }
0x27f4   :  { %1941 = vrot.lane.b32.xlu1 %v4251_v19, %s4531_s30 }
0x27f5   :  { %v4253_v21 = vpop.eup %4252 }
0x27f6   :  { %v1932_v22 = vadd.f32 1.0, %v4253_v21 }
0x27f8   :  { %4254 = vrcp.f32 %v1932_v22 }
0x2802   :  { %v4255_v23 = vpop.eup %4254 }
0x2803   :  { %v1939_v27 = vmul.f32 %v4255_v23, %v1937_v26 }
0x2866   :  { %v1942_v24 = vpop.permute.xlu1 %1941 }
0x2867   :  { %v1944_v25 = vmul.f32 %v4255_v23, %v1942_v24 }
0x2869   :  { %1946 = vrot.lane.b32.xlu0 %v1944_v25, %s4532_s3 }
0x28db   :  { %v1947_v28 = vpop.permute.xlu0 %1946 }
0x28dc   :  { %v1949_v29 = vadd.f32 %v1947_v28, %v1939_v27 }
0x28de   :  { %4256 = vtanh.f32 %v1949_v29 }
0x28e8   :  { %v4257_v30 = vpop.eup %4256 }
0x28e9   :  { %1952 = vrot.lane.b32.xlu1 %v4257_v30, %s4531_s30 }
0x295b   :  { %v1953_v18 = vpop.permute.xlu1 %1952 }
0x295c   :  { %v1955_v31 = vmul.f32 %v4255_v23, %v1953_v18 }
0x295e   :  { %v1961_v32 = vrot.slane %v1955_v31, 4 }
0x2960   :  { %1962 = vrot.lane.b32.xlu0 %v1961_v32, %s4532_s3 }
0x29d2   :  { %v1963_v34 = vpop.permute.xlu0 %1962 }
0x29d3   :  { %3820 = vmatmul.mubr.msk.f32.vlgmr.msra.gmra.mrb[16].mxu1 %vm230_vm3, %v1963_v34 }
0x29d4   :  { %3841 = vmatprep.mubr.msk.f32.mxu1 %vm4529_vm0, %v4530_v1  ;;  %4061 = vmatpush3.bf16.msra.mxu1 %v5035_v56 }
0x29d5   :  { %4062 = vmatprep.subr.bf16.mxu1 %v4528_v0 }
0x2aa6   :  { %v2032_v35 = vpop.f32.mrb[16].mxu1 }
0x2aa7   :  { %v2037_v36 = vrot.slane %v2032_v35, 2  ;;  %v3821_v37 = vpop.f32.mrb[17].mxu1 }
0x2aa9   :  { %v2039_v38 = vadd.f32 %v2037_v36, %v4928_v14  ;;  %v2048_v14 = vrot.slane %v1949_v29, 6 }
0x2aab   :  { %4258 = vtanh.f32 %v2039_v38  ;;  %v3456_v40 = vmul.f32 -1.442695, %v2039_v38 }
0x2aad   :  { %4260 = vpow2.f32 %v3456_v40 }
0x2ab5   :  { %v4259_v39 = vpop.eup %4258 }
0x2ab6   :  { %2052 = vrot.lane.b32.xlu1 %v4259_v39, %s4531_s30 }
0x2ab7   :  { %v4261_v41 = vpop.eup %4260 }
0x2ab8   :  { %v2043_v42 = vadd.f32 1.0, %v4261_v41 }
0x2aba   :  { %4262 = vrcp.f32 %v2043_v42 }
0x2ac4   :  { %v4263_v43 = vpop.eup %4262 }
0x2ac5   :  { %v2050_v46 = vmul.f32 %v4263_v43, %v2048_v14 }
0x2b28   :  { %v2053_v44 = vpop.permute.xlu1 %2052 }
0x2b29   :  { %v2055_v45 = vmul.f32 %v4263_v43, %v2053_v44 }
0x2b2b   :  { %2057 = vrot.lane.b32.xlu0 %v2055_v45, %s4532_s3 }
0x2b2f   :  { %1408 = vrot.lane.b32.xlu0 %v4949_v50, %s4532_s3  ;;  %v2074_v50 = vld [vmem:[#allocation7] sm:$0xff] }
0x2b33   :  { %1630 = vrot.lane.b32.xlu0 %v4979_v17, %s4532_s3  ;;  %v2075_v17 = vld [vmem:[#allocation7 + $0x8] sm:$0xff] }
0x2b34   :  { %v4051_v53 = vpack.c.bf16 %v2075_v17, %v2074_v50 }
0x2b36   :  { %4052 = vmatprep.subr.bf16.mxu0 %v4051_v53 }
0x2b37   :  { %1957 = vrot.lane.b32.xlu0 %v1955_v31, %s4532_s3  ;;  %4054 = vmatpush3.bf16.msra.mxu0 %v4051_v53 }
0x2b38   :  { %4056 = vmatprep.subr.bf16.mxu0 %v4055_v59 }
0x2b3b   :  { %4058 = vmatpush3.bf16.msra.mxu0 %v4055_v59 }
0x2b3c   :  { %4065 = vmatprep.subr.bf16.mxu0 %v4528_v0 }
0x2b9d   :  { %v2058_v15 = vpop.permute.xlu0 %2057 }
0x2b9e   :  { %v2060_v47 = vadd.f32 %v2058_v15, %v2050_v46 }
0x2ba0   :  { %4264 = vtanh.f32 %v2060_v47 }
0x2ba1   :  { %v1409_v48 = vpop.permute.xlu0 %1408 }
0x2ba2   :  { %1411 = vst.msk [vmem:[#allocation2 + $0x10] sm:$0xc] %vm442_vm4, %v1409_v48 }
0x2ba5   :  { %v1631_v49 = vpop.permute.xlu0 %1630 }
0x2ba6   :  { %1633 = vst.msk [vmem:[#allocation2 + $0x10] sm:$0xc0] %vm666_vm5, %v1631_v49 }
0x2ba9   :  { %v1958_v51 = vpop.permute.xlu0 %1957 }
0x2baa   :  { %v4265_v52 = vpop.eup %4264  ;;  %1960 = vst.msk [vmem:[#allocation2 + $0x18] sm:$0x30] %vm554_vm6, %v1958_v51 }
0x2bab   :  { %2063 = vrot.lane.b32.xlu1 %v4265_v52, %s4531_s30 }
0x2baf   :  { %1519 = vrot.lane.b32.xlu1 %v4964_v6, %s4532_s3  ;;  %v5038_v6 = vpack.c.bf16 %v2081_v57, %v2080_v58 }
0x2bb1   :  { %4064 = vmatpush3.bf16.msra.mxu1 %v5038_v6 }
0x2bb2   :  { %4071 = vmatprep.subr.bf16.mxu1 %v4528_v0 }
0x2bb3   :  { %1846 = vrot.lane.b32.xlu1 %v5006_v4, %s4532_s3 }
0x2bb4   :  { %3842 = vmatmul.mubr.f32.vlgmr.msra.gmra.mrb[18].mxu1 %v4530_v1 }
0x2bb5   :  { %4073 = vmatpush3.bf16.msra.mxu1 %v5035_v56  ;;  %3863 = vmatprep.mubr.msk.f32.mxu1 %vm4529_vm0, %v4530_v1 }
0x2bb6   :  { %4074 = vmatprep.subr.bf16.mxu1 %v4528_v0 }
0x2bb9   :  { %4076 = vmatpush3.bf16.msra.mxu1 %v5038_v6 }
0x2bba   :  { %4083 = vmatprep.subr.bf16.mxu1 %v4528_v0 }
0x2c1d   :  { %v2064_v60 = vpop.permute.xlu1 %2063 }
0x2c1e   :  { %v2066_v8 = vmul.f32 %v4263_v43, %v2064_v60 }
0x2c20   :  { %2068 = vrot.lane.b32.xlu1 %v2066_v8, %s4532_s3 }
0x2c21   :  { %v1520_v62 = vpop.permute.xlu1 %1519 }
0x2c22   :  { %1522 = vst.msk [vmem:[#allocation2 + $0x10] sm:$0x30] %vm554_vm6, %v1520_v62 }
0x2c25   :  { %v1847_v61 = vpop.permute.xlu1 %1846 }
0x2c26   :  { %1849 = vst.msk [vmem:[#allocation2 + $0x18] sm:$0xc] %vm442_vm4, %v1847_v61 }
0x2c29   :  { %v2072_v63 = vld [vmem:[#allocation2 + $0x10] sm:$0xff] }
0x2c2a   :  { %3830 = vmatprep.mubr.msk.f32.mxu0 %vm230_vm3, %v2072_v63 }
0x2c87   :  { %v2236_v3 = vpop.f32.mrb[18].mxu1 }
0x2c88   :  { %v3843_v4 = vpop.f32.mrb[19].mxu1 }
0x2c92   :  { %v2069_v2 = vpop.permute.xlu1 %2068 }
0x2c93   :  { %2071 = vst.msk [vmem:[#allocation2 + $0x18] sm:$0xc0] %vm666_vm5, %v2069_v2 }
0x2c9a   :  { %v2073_v12 = vld [vmem:[#allocation2 + $0x18] sm:$0xff] }
0x2c9b   :  { %3831 = vmatmul.mubr.msk.f32.vlgmr.msra.gmra.mrb[18].mxu0 %vm230_vm3, %v2073_v12 }
0x2c9c   :  { %4067 = vmatpush3.bf16.msra.mxu0 %v5035_v56  ;;  %3852 = vmatprep.mubr.msk.f32.mxu0 %vm4529_vm0, %v4530_v1 }
0x2c9d   :  { %4068 = vmatprep.subr.bf16.mxu0 %v4528_v0 }
0x2ca0   :  { %4070 = vmatpush3.bf16.msra.mxu0 %v5038_v6 }
0x2ca1   :  { %4077 = vmatprep.subr.bf16.mxu0 %v4528_v0 }
0x2d6e   :  { %v3832_v7 = vpop.f32.mrb[18].mxu0 }
0x2d6f   :  { %v5066_v9 = vadd.f32 %v3832_v7, %v3457_v5  ;;  %v2161_v10 = vpop.f32.mrb[19].mxu0 }
0x2d70   :  { %v5068_v13 = vadd.f32 %v3457_v5, %v2161_v10 }
0x2d72   :  { %v2240_v16 = vadd.f32 %v2236_v3, %v5068_v13 }
0x2d74   :  { %4266 = vtanh.f32 %v2240_v16  ;;  %v3460_v20 = vmul.f32 -1.442695, %v2240_v16 }
0x2d76   :  { %4268 = vpow2.f32 %v3460_v20 }
0x2d7e   :  { %v4267_v19 = vpop.eup %4266 }
0x2d7f   :  { %2250 = vrot.lane.b32.xlu0 %v4267_v19, %s4531_s30 }
0x2d80   :  { %v4269_v21 = vpop.eup %4268 }
0x2d81   :  { %v2244_v22 = vadd.f32 1.0, %v4269_v21 }
0x2d83   :  { %4270 = vrcp.f32 %v2244_v22 }
0x2d8d   :  { %v4271_v23 = vpop.eup %4270 }
0x2d8e   :  { %v2248_v26 = vmul.f32 0.0, %v4271_v23 }
0x2df1   :  { %v2251_v24 = vpop.permute.xlu0 %2250 }
0x2df2   :  { %v2253_v25 = vmul.f32 %v4271_v23, %v2251_v24 }
0x2df4   :  { %2255 = vrot.lane.b32.xlu1 %v2253_v25, %s4532_s3 }
0x2e66   :  { %v2256_v27 = vpop.permute.xlu1 %2255 }
0x2e67   :  { %v2258_v28 = vadd.f32 %v2256_v27, %v2248_v26 }
0x2e69   :  { %4272 = vtanh.f32 %v2258_v28  ;;  %v2354_v44 = vrot.slane %v2258_v28, 6 }
0x2e73   :  { %v4273_v29 = vpop.eup %4272 }
0x2e74   :  { %2261 = vrot.lane.b32.xlu0 %v4273_v29, %s4531_s30 }
0x2ee6   :  { %v2262_v30 = vpop.permute.xlu0 %2261 }
0x2ee7   :  { %v5074_v18 = vmul.f32 %v4271_v23, %v2262_v30 }
0x2ee9   :  { %2266 = vrot.lane.b32.xlu1 %v5074_v18, %s4532_s3 }
0x2f5b   :  { %v2267_v31 = vpop.permute.xlu1 %2266 }
0x2f5c   :  { %2269 = vst.msk [vmem:[#allocation2 + $0x20] sm:$0x3] %vm333_vm2, %v2267_v31  ;;  %3853 = vmatmul.mubr.msk.f32.vlgmr.msra.gmra.mrb[20].mxu0 %vm230_vm3, %v2267_v31 }
0x2f5d   :  { %4079 = vmatpush3.bf16.msra.mxu0 %v5035_v56  ;;  %3874 = vmatprep.mubr.msk.f32.mxu0 %vm4529_vm0, %v4530_v1 }
0x2f5e   :  { %4080 = vmatprep.subr.bf16.mxu0 %v4528_v0 }
0x2f61   :  { %4082 = vmatpush3.bf16.msra.mxu0 %v5038_v6 }
0x2f62   :  { %4089 = vmatprep.subr.bf16.mxu0 %v4528_v0 }
0x302f   :  { %v2338_v32 = vpop.f32.mrb[20].mxu0 }
0x3030   :  { %v2343_v34 = vrot.slane %v2338_v32, 6  ;;  %v3854_v35 = vpop.f32.mrb[21].mxu0 }
0x3032   :  { %v2345_v36 = vadd.f32 %v2343_v34, %v5068_v13 }
0x3034   :  { %4274 = vtanh.f32 %v2345_v36  ;;  %v3462_v38 = vmul.f32 -1.442695, %v2345_v36 }
0x3036   :  { %4276 = vpow2.f32 %v3462_v38 }
0x303e   :  { %v4275_v37 = vpop.eup %4274 }
0x303f   :  { %2358 = vrot.lane.b32.xlu0 %v4275_v37, %s4531_s30 }
0x3040   :  { %v4277_v39 = vpop.eup %4276 }
0x3041   :  { %v2349_v40 = vadd.f32 1.0, %v4277_v39 }
0x3043   :  { %4278 = vrcp.f32 %v2349_v40 }
0x304d   :  { %v4279_v41 = vpop.eup %4278 }
0x304e   :  { %v2356_v45 = vmul.f32 %v4279_v41, %v2354_v44 }
0x30b1   :  { %v2359_v42 = vpop.permute.xlu0 %2358 }
0x30b2   :  { %v2361_v43 = vmul.f32 %v4279_v41, %v2359_v42 }
0x30b4   :  { %2363 = vrot.lane.b32.xlu1 %v2361_v43, %s4532_s3 }
0x3126   :  { %v2364_v14 = vpop.permute.xlu1 %2363 }
0x3127   :  { %v2366_v46 = vadd.f32 %v2364_v14, %v2356_v45 }
0x3129   :  { %4280 = vtanh.f32 %v2366_v46  ;;  %v2465_v60 = vrot.slane %v2366_v46, 6 }
0x3133   :  { %v4281_v15 = vpop.eup %4280 }
0x3134   :  { %2369 = vrot.lane.b32.xlu0 %v4281_v15, %s4531_s30 }
0x31a6   :  { %v2370_v47 = vpop.permute.xlu0 %2369 }
0x31a7   :  { %v5090_v48 = vmul.f32 %v4279_v41, %v2370_v47 }
0x31a9   :  { %v2378_v49 = vrot.slane %v5090_v48, 2 }
0x31ab   :  { %2379 = vrot.lane.b32.xlu1 %v2378_v49, %s4532_s3 }
0x321d   :  { %v2380_v51 = vpop.permute.xlu1 %2379 }
0x321e   :  { %3864 = vmatmul.mubr.msk.f32.vlgmr.msra.gmra.mrb[20].mxu1 %vm230_vm3, %v2380_v51 }
0x321f   :  { %4085 = vmatpush3.bf16.msra.mxu1 %v5035_v56  ;;  %3885 = vmatprep.mubr.msk.f32.mxu1 %vm4529_vm0, %v4530_v1 }
0x3220   :  { %4086 = vmatprep.subr.bf16.mxu1 %v4528_v0 }
0x3223   :  { %4088 = vmatpush3.bf16.msra.mxu1 %v5038_v6 }
0x3224   :  { %4095 = vmatprep.subr.bf16.mxu1 %v4528_v0 }
0x32f1   :  { %v2449_v52 = vpop.f32.mrb[20].mxu1 }
0x32f2   :  { %v2454_v50 = vrot.slane %v2449_v52, 4  ;;  %v3865_v17 = vpop.f32.mrb[21].mxu1 }
0x32f4   :  { %v2456_v53 = vadd.f32 %v2454_v50, %v5068_v13 }
0x32f6   :  { %4282 = vtanh.f32 %v2456_v53  ;;  %v3464_v54 = vmul.f32 -1.442695, %v2456_v53 }
0x32f8   :  { %4284 = vpow2.f32 %v3464_v54 }
0x3300   :  { %v4283_v33 = vpop.eup %4282 }
0x3301   :  { %2469 = vrot.lane.b32.xlu0 %v4283_v33, %s4531_s30 }
0x3302   :  { %v4285_v55 = vpop.eup %4284 }
0x3303   :  { %v2460_v11 = vadd.f32 1.0, %v4285_v55 }
0x3305   :  { %4286 = vrcp.f32 %v2460_v11 }
0x330f   :  { %v4287_v58 = vpop.eup %4286 }
0x3310   :  { %v2467_v8 = vmul.f32 %v4287_v58, %v2465_v60 }
0x3373   :  { %v2470_v57 = vpop.permute.xlu0 %2469 }
0x3374   :  { %v2472_v59 = vmul.f32 %v4287_v58, %v2470_v57 }
0x3376   :  { %2474 = vrot.lane.b32.xlu1 %v2472_v59, %s4532_s3 }
0x33e8   :  { %v2475_v62 = vpop.permute.xlu1 %2474 }
0x33e9   :  { %v2477_v61 = vadd.f32 %v2475_v62, %v2467_v8 }
0x33eb   :  { %4288 = vtanh.f32 %v2477_v61  ;;  %v2576_v26 = vrot.slane %v2477_v61, 6 }
0x33f5   :  { %v4289_v63 = vpop.eup %4288 }
0x33f6   :  { %2480 = vrot.lane.b32.xlu0 %v4289_v63, %s4531_s30 }
0x3468   :  { %v2481_v2 = vpop.permute.xlu0 %2480 }
0x3469   :  { %v5105_v12 = vmul.f32 %v4287_v58, %v2481_v2 }
0x346b   :  { %v2489_v3 = vrot.slane %v5105_v12, 4 }
0x346d   :  { %2490 = vrot.lane.b32.xlu1 %v2489_v3, %s4532_s3 }
0x34df   :  { %v2491_v4 = vpop.permute.xlu1 %2490 }
0x34e0   :  { %3875 = vmatmul.mubr.msk.f32.vlgmr.msra.gmra.mrb[22].mxu0 %vm230_vm3, %v2491_v4 }
0x34e1   :  { %4091 = vmatpush3.bf16.msra.mxu0 %v5035_v56  ;;  %3896 = vmatprep.mubr.msk.f32.mxu0 %vm4529_vm0, %v4530_v1 }
0x34e2   :  { %4092 = vmatprep.subr.bf16.mxu0 %v4528_v0 }
0x34e5   :  { %4094 = vmatpush3.bf16.msra.mxu0 %v5038_v6 }
0x34e6   :  { %4101 = vmatprep.subr.bf16.mxu0 %v4528_v0 }
0x35b3   :  { %v2560_v5 = vpop.f32.mrb[22].mxu0 }
0x35b4   :  { %v2565_v7 = vrot.slane %v2560_v5, 2  ;;  %v3876_v10 = vpop.f32.mrb[23].mxu0 }
0x35b6   :  { %v2567_v16 = vadd.f32 %v2565_v7, %v5068_v13 }
0x35b8   :  { %4290 = vtanh.f32 %v2567_v16  ;;  %v3466_v20 = vmul.f32 -1.442695, %v2567_v16 }
0x35ba   :  { %4292 = vpow2.f32 %v3466_v20 }
0x35c2   :  { %v4291_v19 = vpop.eup %4290 }
0x35c3   :  { %2580 = vrot.lane.b32.xlu0 %v4291_v19, %s4531_s30 }
0x35c4   :  { %v4293_v21 = vpop.eup %4292 }
0x35c5   :  { %v2571_v22 = vadd.f32 1.0, %v4293_v21 }
0x35c7   :  { %4294 = vrcp.f32 %v2571_v22 }
0x35d1   :  { %v4295_v23 = vpop.eup %4294 }
0x35d2   :  { %v2578_v27 = vmul.f32 %v4295_v23, %v2576_v26 }
0x3635   :  { %v2581_v24 = vpop.permute.xlu0 %2580 }
0x3636   :  { %v2583_v25 = vmul.f32 %v4295_v23, %v2581_v24 }
0x3638   :  { %2585 = vrot.lane.b32.xlu1 %v2583_v25, %s4532_s3 }
0x36aa   :  { %v2586_v28 = vpop.permute.xlu1 %2585 }
0x36ab   :  { %v2588_v29 = vadd.f32 %v2586_v28, %v2578_v27 }
0x36ad   :  { %4296 = vtanh.f32 %v2588_v29  ;;  %v2684_v45 = vrot.slane %v2588_v29, 6 }
0x36b7   :  { %v4297_v13 = vpop.eup %4296 }
0x36b8   :  { %2591 = vrot.lane.b32.xlu0 %v4297_v13, %s4531_s30 }
0x372a   :  { %v2592_v30 = vpop.permute.xlu0 %2591 }
0x372b   :  { %v5120_v31 = vmul.f32 %v4295_v23, %v2592_v30 }
0x372d   :  { %v2600_v32 = vrot.slane %v5120_v31, 6 }
0x372f   :  { %2601 = vrot.lane.b32.xlu1 %v2600_v32, %s4532_s3 }
0x37a1   :  { %v2602_v34 = vpop.permute.xlu1 %2601 }
0x37a2   :  { %3886 = vmatmul.mubr.msk.f32.vlgmr.msra.gmra.mrb[22].mxu1 %vm230_vm3, %v2602_v34 }
0x37a3   :  { %4097 = vmatpush3.bf16.msra.mxu1 %v5035_v56  ;;  %3907 = vmatprep.mubr.msk.f32.mxu1 %vm4529_vm0, %v4530_v1 }
0x37a4   :  { %4098 = vmatprep.subr.bf16.mxu1 %v4528_v0 }
0x37a7   :  { %4100 = vmatpush3.bf16.msra.mxu1 %v5038_v6 }
0x3875   :  { %v2671_v35 = vpop.f32.mrb[22].mxu1 }
0x3876   :  { %v2675_v36 = vadd.f32 %v2671_v35, %v5066_v9  ;;  %v3887_v37 = vpop.f32.mrb[23].mxu1 }
0x3878   :  { %4298 = vtanh.f32 %v2675_v36  ;;  %v3468_v39 = vmul.f32 -1.442695, %v2675_v36 }
0x387a   :  { %4300 = vpow2.f32 %v3468_v39 }
0x3882   :  { %v4299_v38 = vpop.eup %4298 }
0x3883   :  { %2688 = vrot.lane.b32.xlu0 %v4299_v38, %s4531_s30 }
0x3884   :  { %v4301_v40 = vpop.eup %4300 }
0x3885   :  { %v2679_v41 = vadd.f32 1.0, %v4301_v40 }
0x3887   :  { %4302 = vrcp.f32 %v2679_v41 }
0x3891   :  { %v4303_v42 = vpop.eup %4302 }
0x3892   :  { %v2686_v14 = vmul.f32 %v4303_v42, %v2684_v45 }
0x38f5   :  { %v2689_v43 = vpop.permute.xlu0 %2688 }
0x38f6   :  { %v2691_v44 = vmul.f32 %v4303_v42, %v2689_v43 }
0x38f8   :  { %2693 = vrot.lane.b32.xlu1 %v2691_v44, %s4532_s3 }
0x396a   :  { %v2694_v46 = vpop.permute.xlu1 %2693 }
0x396b   :  { %v2696_v15 = vadd.f32 %v2694_v46, %v2686_v14 }
0x396d   :  { %4304 = vtanh.f32 %v2696_v15 }
0x3977   :  { %v4305_v47 = vpop.eup %4304 }
0x3978   :  { %2699 = vrot.lane.b32.xlu0 %v4305_v47, %s4531_s30 }
0x39ea   :  { %v2700_v49 = vpop.permute.xlu0 %2699 }
0x39eb   :  { %v5134_v51 = vmul.f32 %v4303_v42, %v2700_v49 }
0x39ed   :  { %2704 = vrot.lane.b32.xlu1 %v5134_v51, %s4532_s3 }
0x3a5f   :  { %v2705_v52 = vpop.permute.xlu1 %2704 }
0x3a60   :  { %2707 = vst.msk [vmem:[#allocation2 + $0x28] sm:$0x3] %vm333_vm2, %v2705_v52  ;;  %3897 = vmatmul.mubr.msk.f32.vlgmr.msra.gmra.mrb[24].mxu0 %vm230_vm3, %v2705_v52 }
0x3a61   :  { %4103 = vmatpush3.bf16.msra.mxu0 %v5035_v56  ;;  %3918 = vmatprep.mubr.msk.f32.mxu0 %vm4529_vm0, %v4530_v1 }
0x3a62   :  { %4104 = vmatprep.subr.bf16.mxu0 %v4528_v0 }
0x3a65   :  { %4106 = vmatpush3.bf16.msra.mxu0 %v5038_v6  ;;  %v2792_v6 = vrot.slane %v2696_v15, 6 }
0x3a66   :  { %4115 = vmatprep.subr.bf16.mxu0 %v4528_v0 }
0x3b33   :  { %v2776_v50 = vpop.f32.mrb[24].mxu0 }
0x3b34   :  { %v2781_v17 = vrot.slane %v2776_v50, 6  ;;  %v3898_v53 = vpop.f32.mrb[25].mxu0 }
0x3b35   :  { %v3041_v53 = vld [vmem:[#allocation10 + $0x8] sm:$0xff] }
0x3b36   :  { %v2783_v33 = vadd.f32 %v2781_v17, %v5066_v9  ;;  %v3040_v17 = vld [vmem:[#allocation10] sm:$0xff] }
0x3b38   :  { %4306 = vtanh.f32 %v2783_v33  ;;  %v3470_v55 = vmul.f32 -1.442695, %v2783_v33  ;;  %v4107_v33 = vpack.c.bf16 %v3041_v53, %v3040_v17 }
0x3b3a   :  { %4308 = vpow2.f32 %v3470_v55  ;;  %4108 = vmatprep.subr.bf16.mxu1 %v4107_v33  ;;  %v3043_v55 = vld [vmem:[#allocation10 + $0x18] sm:$0xff] }
0x3b42   :  { %v4307_v54 = vpop.eup %4306 }
0x3b43   :  { %2796 = vrot.lane.b32.xlu0 %v4307_v54, %s4531_s30  ;;  %v3042_v54 = vld [vmem:[#allocation10 + $0x10] sm:$0xff] }
0x3b44   :  { %v4309_v56 = vpop.eup %4308 }
0x3b45   :  { %v2787_v11 = vadd.f32 1.0, %v4309_v56  ;;  %v4111_v56 = vpack.c.bf16 %v3043_v55, %v3042_v54 }
0x3b47   :  { %4310 = vrcp.f32 %v2787_v11 }
0x3b51   :  { %v4311_v58 = vpop.eup %4310 }
0x3b52   :  { %v2794_v60 = vmul.f32 %v4311_v58, %v2792_v6 }
0x3bb5   :  { %v2797_v57 = vpop.permute.xlu0 %2796 }
0x3bb6   :  { %v2799_v59 = vmul.f32 %v4311_v58, %v2797_v57 }
0x3bb8   :  { %2801 = vrot.lane.b32.xlu1 %v2799_v59, %s4532_s3 }
0x3c2a   :  { %v2802_v8 = vpop.permute.xlu1 %2801 }
0x3c2b   :  { %v2804_v62 = vadd.f32 %v2802_v8, %v2794_v60 }
0x3c2d   :  { %4312 = vtanh.f32 %v2804_v62  ;;  %v2903_v26 = vrot.slane %v2804_v62, 6  ;;  %v3475_v62 = vld [vmem:[#allocation12] ss:$0 sm:$0xff] }
0x3c37   :  { %v4313_v61 = vpop.eup %4312 }
0x3c38   :  { %2807 = vrot.lane.b32.xlu0 %v4313_v61, %s4531_s30 }
0x3caa   :  { %v2808_v63 = vpop.permute.xlu0 %2807 }
0x3cab   :  { %v5150_v2 = vmul.f32 %v4311_v58, %v2808_v63 }
0x3cad   :  { %v2816_v3 = vrot.slane %v5150_v2, 2 }
0x3caf   :  { %2817 = vrot.lane.b32.xlu1 %v2816_v3, %s4532_s3 }
0x3d21   :  { %v2818_v4 = vpop.permute.xlu1 %2817 }
0x3d22   :  { %3908 = vmatmul.mubr.msk.f32.vlgmr.msra.gmra.mrb[24].mxu1 %vm230_vm3, %v2818_v4 }
0x3d23   :  { %4110 = vmatpush3.bf16.msra.mxu1 %v4107_v33 }
0x3d24   :  { %4112 = vmatprep.subr.bf16.mxu1 %v4111_v56 }
0x3d27   :  { %4114 = vmatpush3.bf16.msra.mxu1 %v4111_v56 }
0x3df5   :  { %v2887_v5 = vpop.f32.mrb[24].mxu1 }
0x3df6   :  { %v2892_v7 = vrot.slane %v2887_v5, 4  ;;  %v3909_v10 = vpop.f32.mrb[25].mxu1  ;;  %v3478_v5 = vld [vmem:[%s5250_s12] ss:$0 sm:$0xff] }
0x3df8   :  { %v2894_v16 = vadd.f32 %v2892_v7, %v5066_v9 }
0x3dfa   :  { %4314 = vtanh.f32 %v2894_v16  ;;  %v3472_v20 = vmul.f32 -1.442695, %v2894_v16 }
0x3dfc   :  { %4316 = vpow2.f32 %v3472_v20 }
0x3e04   :  { %v4315_v19 = vpop.eup %4314 }
0x3e05   :  { %2907 = vrot.lane.b32.xlu0 %v4315_v19, %s4531_s30 }
0x3e06   :  { %v4317_v21 = vpop.eup %4316 }
0x3e07   :  { %v2898_v22 = vadd.f32 1.0, %v4317_v21 }
0x3e09   :  { %4318 = vrcp.f32 %v2898_v22  ;;  %v4533_v22 = vmov 0  }
0x3e0a   :  { %4137 = vset.pattern.permute.xlu1 %v4533_v22  ;;  %4136 = vset.pattern.permute.xlu0 %v4533_v22 }
0x3e13   :  { %v4319_v23 = vpop.eup %4318 }
0x3e14   :  { %v2905_v27 = vmul.f32 %v4319_v23, %v2903_v26 }
0x3e77   :  { %v2908_v24 = vpop.permute.xlu0 %2907 }
0x3e78   :  { %v2910_v25 = vmul.f32 %v4319_v23, %v2908_v24 }
0x3e7a   :  { %2912 = vrot.lane.b32.xlu1 %v2910_v25, %s4532_s3 }
0x3eec   :  { %v2913_v28 = vpop.permute.xlu1 %2912 }
0x3eed   :  { %v2915_v29 = vadd.f32 %v2913_v28, %v2905_v27 }
0x3eef   :  { %4320 = vtanh.f32 %v2915_v29 }
0x3ef9   :  { %v4321_v13 = vpop.eup %4320 }
0x3efa   :  { %2918 = vrot.lane.b32.xlu0 %v4321_v13, %s4531_s30 }
0x3f6c   :  { %v2919_v30 = vpop.permute.xlu0 %2918 }
0x3f6d   :  { %v5159_v32 = vmul.f32 %v4319_v23, %v2919_v30  ;;  %v3150_v23 = vstv %s5251_s13 }
0x3f6f   :  { %v2927_v34 = vrot.slane %v5159_v32, 4 }
0x3f71   :  { %2928 = vrot.lane.b32.xlu1 %v2927_v34, %s4532_s3 }
0x3fe3   :  { %v2929_v35 = vpop.permute.xlu1 %2928 }
0x3fe4   :  { %3919 = vmatmul.mubr.msk.f32.vlgmr.msra.gmra.mrb[26].mxu0 %vm230_vm3, %v2929_v35 }
0x3fe5   :  { %3940 = vmatprep.mubr.msk.f32.mxu0 %vm4529_vm0, %v4530_v1  ;;  %v3014_v1 = vrot.slane %v2915_v29, 6 }
0x40b7   :  { %v2998_v36 = vpop.f32.mrb[26].mxu0 }
0x40b8   :  { %v3003_v37 = vrot.slane %v2998_v36, 2  ;;  %v3920_v38 = vpop.f32.mrb[27].mxu0 }
0x40ba   :  { %v3005_v39 = vadd.f32 %v3003_v37, %v5066_v9 }
0x40bc   :  { %4322 = vtanh.f32 %v3005_v39  ;;  %v3474_v41 = vmul.f32 -1.442695, %v3005_v39 }
0x40be   :  { %4324 = vpow2.f32 %v3474_v41 }
0x40c6   :  { %v4323_v40 = vpop.eup %4322 }
0x40c7   :  { %3018 = vrot.lane.b32.xlu0 %v4323_v40, %s4531_s30 }
0x40c8   :  { %v4325_v42 = vpop.eup %4324 }
0x40c9   :  { %v3009_v43 = vadd.f32 1.0, %v4325_v42 }
0x40cb   :  { %4326 = vrcp.f32 %v3009_v43 }
0x40d5   :  { %v4327_v44 = vpop.eup %4326 }
0x40d6   :  { %v3016_v9 = vmul.f32 %v4327_v44, %v3014_v1 }
0x4139   :  { %v3019_v45 = vpop.permute.xlu0 %3018 }
0x413a   :  { %v3021_v14 = vmul.f32 %v4327_v44, %v3019_v45 }
0x413c   :  { %3023 = vrot.lane.b32.xlu1 %v3021_v14, %s4532_s3 }
0x4140   :  { %2374 = vrot.lane.b32.xlu1 %v5090_v48, %s4532_s3 }
0x4144   :  { %2596 = vrot.lane.b32.xlu1 %v5120_v31, %s4532_s3 }
0x4148   :  { %2923 = vrot.lane.b32.xlu1 %v5159_v32, %s4532_s3 }
0x41ae   :  { %v3024_v46 = vpop.permute.xlu1 %3023 }
0x41af   :  { %v3026_v15 = vadd.f32 %v3024_v46, %v3016_v9 }
0x41b1   :  { %4328 = vtanh.f32 %v3026_v15 }
0x41b2   :  { %v2375_v47 = vpop.permute.xlu1 %2374 }
0x41b3   :  { %2377 = vst.msk [vmem:[#allocation2 + $0x20] sm:$0xc] %vm442_vm4, %v2375_v47 }
0x41b6   :  { %v2597_v49 = vpop.permute.xlu1 %2596 }
0x41b7   :  { %2599 = vst.msk [vmem:[#allocation2 + $0x20] sm:$0xc0] %vm666_vm5, %v2597_v49 }
0x41ba   :  { %v2924_v52 = vpop.permute.xlu1 %2923 }
0x41bb   :  { %v4329_v50 = vpop.eup %4328  ;;  %2926 = vst.msk [vmem:[#allocation2 + $0x28] sm:$0x30] %vm554_vm6, %v2924_v52 }
0x41bc   :  { %3029 = vrot.lane.b32.xlu0 %v4329_v50, %s4531_s30 }
0x41c0   :  { %2485 = vrot.lane.b32.xlu0 %v5105_v12, %s4532_s3 }
0x41c4   :  { %2812 = vrot.lane.b32.xlu0 %v5150_v2, %s4532_s3 }
0x422e   :  { %v3030_v11 = vpop.permute.xlu0 %3029 }
0x422f   :  { %v5183_v58 = vmul.f32 %v4327_v44, %v3030_v11 }
0x4231   :  { %3034 = vrot.lane.b32.xlu0 %v5183_v58, %s4532_s3 }
0x4232   :  { %v2486_v57 = vpop.permute.xlu0 %2485 }
0x4233   :  { %2488 = vst.msk [vmem:[#allocation2 + $0x20] sm:$0x30] %vm554_vm6, %v2486_v57 }
0x4236   :  { %v2813_v59 = vpop.permute.xlu0 %2812 }
0x4237   :  { %2815 = vst.msk [vmem:[#allocation2 + $0x28] sm:$0xc] %vm442_vm4, %v2813_v59 }
0x423a   :  { %v3038_v6 = vld [vmem:[#allocation2 + $0x20] sm:$0xff] }
0x423b   :  { %3929 = vmatprep.mubr.msk.f32.mxu1 %vm230_vm3, %v3038_v6 }
0x42a3   :  { %v3035_v60 = vpop.permute.xlu0 %3034 }
0x42a4   :  { %3037 = vst.msk [vmem:[#allocation2 + $0x28] sm:$0xc0] %vm666_vm5, %v3035_v60 }
0x42ab   :  { %v3039_v8 = vld [vmem:[#allocation2 + $0x28] sm:$0xff] }
0x42ac   :  { %3930 = vmatmul.mubr.msk.f32.vlgmr.msra.gmra.mrb[26].mxu1 %vm230_vm3, %v3039_v8 }
0x437f   :  { %v3931_v61 = vpop.f32.mrb[26].mxu1 }
0x4380   :  { %v3129_v63 = vadd.f32 %v3931_v61, %v3475_v62  ;;  %v3123_v3 = vpop.f32.mrb[27].mxu1 }
0x4381   :  { %v3124_v4 = vadd.f32 %v3475_v62, %v3123_v3 }
0x4382   :  { %4330 = vtanh.f32 %v3129_v63 }
0x4383   :  { %4332 = vtanh.f32 %v3124_v4 }
0x438c   :  { %v4331_v7 = vpop.eup %4330 }
0x438d   :  { %v4333_v10 = vpop.eup %4332  ;;  %v3142_v16 = vmul.f32 %v4331_v7, %v3478_v5 }
0x438e   :  { %v3141_v19 = vmul.f32 %v4333_v10, %v3478_v5 }
0x438f   :  { %v3146_v20 = vsel %vm230_vm3, %v3142_v16, 0.0 }
0x4390   :  { %3147 = vadd.xlane.f32.xlu0 %v3146_v20  ;;  %v3143_v21 = vsel %vm230_vm3, %v3141_v19, 0.0 }
0x4391   :  { %3144 = vadd.xlane.f32.xlu1 %v3143_v21 }
0x441d   :  { %v3148_v27 = vpop.xlane.xlu0 %3147 }
0x441e   :  { %v3145_v24 = vpop.xlane.xlu1 %3144  ;;  %v3152_v13 = vadd.f32 %v3150_v23, %v3148_v27  ;;  %v3304_v27 = vld [vmem:[%s5252_s14] sm:$0xff] }
0x441f   :  { %v3151_v25 = vadd.f32 %v3150_v23, %v3145_v24 }
0x4420   :  { %v3165_v36 = vrot.slane %v3152_v13, 2  ;;  %v3168_v38 = vrot.slane %v3152_v13, 4  ;;  %v3171_v40 = vrot.slane %v3152_v13, 6 }
0x4421   :  { %v3154_v26 = vrot.slane %v3151_v25, 2  ;;  %v3157_v29 = vrot.slane %v3151_v25, 4  ;;  %v3160_v34 = vrot.slane %v3151_v25, 6 }
0x4423   :  { %v3156_v28 = vmax.f32 %v3151_v25, %v3154_v26 }
0x4425   :  { %v3159_v30 = vmax.f32 %v3156_v28, %v3157_v29  ;;  %v3305_v28 = vld [vmem:[%s5252_s14 + $0x8] sm:$0xff]  ;;  %v3306_v29 = vld [vmem:[%s5252_s14 + $0x10] sm:$0xff] }
0x4427   :  { %v3162_v35 = vmax.f32 %v3159_v30, %v3160_v34  ;;  %v3307_v30 = vld [vmem:[%s5252_s14 + $0x18] sm:$0xff]  ;;  %s4534_s14 = smov [#allocation15]  }
0x4428   :  { %v4119_v34 = vpack.c.bf16 %v3307_v30, %v3306_v29 }
0x4429   :  { %v3163_v37 = vmax.f32 %v3162_v35, %v3152_v13 }
0x442b   :  { %v3167_v39 = vmax.f32 %v3163_v37, %v3165_v36 }
0x442d   :  { %v3170_v41 = vmax.f32 %v3167_v39, %v3168_v38 }
0x442f   :  { %v3173_v42 = vmax.f32 %v3170_v41, %v3171_v40 }
0x4431   :  { %v3174_v43 = vsub.f32 %v3151_v25, %v3173_v42  ;;  %v3178_v44 = vrot.slane %v3173_v42, 6  ;;  %v3183_v45 = vrot.slane %v3173_v42, 4  ;;  %v3188_v14 = vrot.slane %v3173_v42, 2 }
0x4432   :  { %v3193_v1 = vsub.f32 %v3152_v13, %v3173_v42 }
0x4433   :  { %v3175_v9 = vmul.f32 1.442695, %v3174_v43  ;;  %v3180_v46 = vsub.f32 %v3151_v25, %v3178_v44  ;;  %v3185_v15 = vsub.f32 %v3151_v25, %v3183_v45  ;;  %v3190_v47 = vsub.f32 %v3151_v25, %v3188_v14 }
0x4434   :  { %v3196_v49 = vsub.f32 %v3152_v13, %v3178_v44  ;;  %v3194_v52 = vmul.f32 1.442695, %v3193_v1  ;;  %v3199_v33 = vsub.f32 %v3152_v13, %v3183_v45  ;;  %v3202_v55 = vsub.f32 %v3152_v13, %v3188_v14 }
0x4435   :  { %4334 = vpow2.f32 %v3175_v9  ;;  %v3181_v50 = vmul.f32 1.442695, %v3180_v46  ;;  %v3186_v17 = vmul.f32 1.442695, %v3185_v15  ;;  %v3191_v53 = vmul.f32 1.442695, %v3190_v47 }
0x4436   :  { %4336 = vpow2.f32 %v3194_v52  ;;  %v3197_v54 = vmul.f32 1.442695, %v3196_v49  ;;  %v3200_v56 = vmul.f32 1.442695, %v3199_v33  ;;  %v3203_v11 = vmul.f32 1.442695, %v3202_v55 }
0x4437   :  { %4338 = vpow2.f32 %v3181_v50  ;;  %v4116_v13 = vpack.c.bf16 %v3305_v28, %v3304_v27 }
0x4438   :  { %4340 = vpow2.f32 %v3186_v17 }
0x4439   :  { %4342 = vpow2.f32 %v3191_v53  ;;  %4117 = vmatpush3.bf16.msra.mxu0 %v4116_v13 }
0x443a   :  { %4344 = vpow2.f32 %v3197_v54  ;;  %4118 = vmatprep.subr.bf16.mxu0 %v4528_v0 }
0x443b   :  { %4346 = vpow2.f32 %v3200_v56 }
0x443c   :  { %4348 = vpow2.f32 %v3203_v11 }
0x443d   :  { %4120 = vmatpush3.bf16.msra.mxu0 %v4119_v34 }
0x443f   :  { %v4335_v57 = vpop.eup %4334 }
0x4440   :  { %v4337_v59 = vpop.eup %4336  ;;  %3233 = vperm.xlu1 %4137, %v4335_v57  }
0x4441   :  { %v4339_v6 = vpop.eup %4338 }
0x4442   :  { %v4341_v60 = vpop.eup %4340  ;;  %v3206_v8 = vrot.slane %v4339_v6, 2  ;;  %3238 = vperm.xlu0 %4136, %v4339_v6  }
0x4443   :  { %v4343_v62 = vpop.eup %4342  ;;  %v3210_v63 = vrot.slane %v4341_v60, 4 }
0x4444   :  { %v3208_v61 = vadd.f32 %v4335_v57, %v3206_v8  ;;  %3266 = vperm.xlu1 %4137, %v4337_v59   ;;  %v3214_v4 = vrot.slane %v4343_v62, 6  ;;  %v4345_v5 = vpop.eup %4344 }
0x4445   :  { %v4347_v10 = vpop.eup %4346  ;;  %v3219_v16 = vrot.slane %v4345_v5, 2 }
0x4446   :  { %v3212_v3 = vadd.f32 %v3210_v63, %v3208_v61  ;;  %v4349_v20 = vpop.eup %4348  ;;  %v3223_v22 = vrot.slane %v4347_v10, 4 }
0x4447   :  { %v3227_v24 = vrot.slane %v4349_v20, 6 }
0x4448   :  { %v3216_v7 = vadd.f32 %v3214_v4, %v3212_v3  ;;  %3247 = vperm.xlu1 %4137, %v4341_v60  }
0x444a   :  { %v3217_v19 = vadd.f32 %v4337_v59, %v3216_v7 }
0x444c   :  { %3256 = vperm.xlu1 %4137, %v4343_v62   ;;  %v3221_v21 = vadd.f32 %v3219_v16, %v3217_v19 }
0x444e   :  { %v3225_v23 = vadd.f32 %v3223_v22, %v3221_v21 }
0x4450   :  { %3272 = vperm.xlu1 %4137, %v4345_v5   ;;  %v3229_v25 = vadd.f32 %v3227_v24, %v3225_v23 }
0x4452   :  { %4350 = vrcp.f32 %v3229_v25 }
0x4454   :  { %3281 = vperm.xlu1 %4137, %v4347_v10  }
0x4458   :  { %3290 = vperm.xlu1 %4137, %v4349_v20  }
0x445c   :  { %v4351_v26 = vpop.eup %4350 }
0x445d   :  { %3300 = vperm.xlu1 %4137, %v4351_v26  }
0x44bf   :  { %v3234_v35 = vpop.permute.xlu1 %3233 }
0x44c0   :  { %v3236_v42 = vmul.f32 %v3234_v35, %v5074_v18 }
0x44c1   :  { %v3239_v36 = vpop.permute.xlu0 %3238 }
0x44c2   :  { %v3241_v38 = vmul.f32 %v3239_v36, %v5090_v48 }
0x44c3   :  { %v3267_v37 = vpop.permute.xlu1 %3266 }
0x44c4   :  { %v3243_v40 = vrot.slane %v3241_v38, 2  ;;  %v3269_v47 = vmul.f32 %v3267_v37, %v5134_v51  ;;  %v3479_v51 = vld [vmem:[#allocation13] ss:$0 sm:$0xff] }
0x44c6   :  { %v3245_v45 = vadd.f32 %v3243_v40, %v3236_v42 }
0x44c7   :  { %v3248_v39 = vpop.permute.xlu1 %3247 }
0x44c8   :  { %v3250_v41 = vmul.f32 %v3248_v39, %v5105_v12 }
0x44ca   :  { %v3252_v43 = vrot.slane %v3250_v41, 4 }
0x44cb   :  { %v3257_v44 = vpop.permute.xlu1 %3256 }
0x44cc   :  { %v3259_v14 = vmul.f32 %v3257_v44, %v5120_v31  ;;  %v3254_v1 = vadd.f32 %v3252_v43, %v3245_v45 }
0x44ce   :  { %v3261_v9 = vrot.slane %v3259_v14, 6 }
0x44cf   :  { %v3273_v0 = vpop.permute.xlu1 %3272 }
0x44d0   :  { %v3263_v46 = vadd.f32 %v3261_v9, %v3254_v1  ;;  %v3275_v15 = vmul.f32 %v3273_v0, %v5150_v2 }
0x44d2   :  { %v3270_v49 = vadd.f32 %v3269_v47, %v3263_v46  ;;  %v3277_v52 = vrot.slane %v3275_v15, 2 }
0x44d3   :  { %v3282_v48 = vpop.permute.xlu1 %3281 }
0x44d4   :  { %v3284_v12 = vmul.f32 %v3282_v48, %v5159_v32  ;;  %v3279_v17 = vadd.f32 %v3277_v52, %v3270_v49 }
0x44d6   :  { %v3286_v50 = vrot.slane %v3284_v12, 4 }
0x44d7   :  { %v3291_v18 = vpop.permute.xlu1 %3290 }
0x44d8   :  { %v3293_v53 = vmul.f32 %v3291_v18, %v5183_v58  ;;  %v3288_v33 = vadd.f32 %v3286_v50, %v3279_v17 }
0x44da   :  { %v3295_v31 = vrot.slane %v3293_v53, 6 }
0x44dc   :  { %v3297_v54 = vadd.f32 %v3295_v31, %v3288_v33  ;;  %v3301_v55 = vpop.permute.xlu1 %3300 }
0x44de   :  { %v3303_v56 = vmul.f32 %v3301_v55, %v3297_v54 }
0x44e0   :  { %3316 = vrot.lane.b32.xlu0 %v3303_v56, %s4532_s3  ;;  %s3409_s3 = sshll.u32 %s4534_s14, 4  ;;  %s3410_s3 = int_to_ptr.vmem [resolvable:$true] %s3409_s3 }
0x44e1   :  { %s4488_s11 = scalar_lea.vmem %s3410_s3, 32  ;;  %p4493_p7 = scmp.lt.s32.totalorder %s3410_s3, %s3410_s3 }
0x44e2   :  { %p4489_p6 = scmp.ne.s32.totalorder %s3410_s3, %s4488_s11  ;;  %p4494_p8 = scmp.lt.s32.totalorder %s4488_s11, %s4488_s11 }
0x44e4   :  { %p4495_p9 = por %p4494_p8, %p4493_p7 }
0x44e6   :  { %p4496_p10 = pnand %p4495_p9, %p4489_p6 }
0x4552   :  { %v3317_v2 = vpop.permute.xlu0 %3316 }
0x4553   :  { %3941 = vmatmul.mubr.msk.f32.vlgmr.msra.gmra.mrb[28].mxu0 %vm230_vm3, %v3317_v2 }
0x4626   :  { %v3386_v11 = vpop.f32.mrb[28].mxu0 }
0x4627   :  { %v3387_v57 = vadd.f32 %v3479_v51, %v3386_v11  ;;  %v3942_v32 = vpop.f32.mrb[29].mxu0 }
0x4629   :  { %v3391_v59 = vsel %vm3390_vm7, %v3387_v57, -inf }
0x462a   :  { %3392 = vmax.xlane.f32.xlu1 %v3391_v59 }
0x46b7   :  { %v3393_v6 = vpop.xlane.xlu1 %3392 }
0x46b8   :  { %v3394_v58 = vsub.f32 %v3387_v57, %v3393_v6 }
0x46ba   :  { %v3395_v60 = vmul.f32 1.442695, %v3394_v58 }
0x46bc   :  { %4352 = vpow2.f32 %v3395_v60 }
0x46c6   :  { %v4353_v8 = vpop.eup %4352 }
0x46c7   :  { %v3397_v62 = vsel %vm3390_vm7, %v4353_v8, 0.0 }
0x46c8   :  { %3398 = vadd.xlane.f32.xlu0 %v3397_v62 }
0x4755   :  { %v3399_v61 = vpop.xlane.xlu0 %3398 }
0x4756   :  { %4354 = vrcp.f32 %v3399_v61 }
0x4760   :  { %v4355_v63 = vpop.eup %4354 }
0x4761   :  { %v3401_v3 = vmul.f32 %v4355_v63, %v4353_v8 }
0x4763   :  { %3402 = vst.msk [vmem:[#allocation15] sm:$0x3] %vm3390_vm7, %v3401_v3 }
0x4764   :  { %4499 = shalt.err (!%p4496_p10)
}
0x4765   :  { %s4500_s24 = scalar_lea.hbm %s5254_s16, 32 }
0x4766   :  { %p4501_p11 = scmp.ne.s32.totalorder %s5254_s16, %s4500_s24  ;;  %p4504_p12 = scmp.lt.u32.totalorder %s4500_s24, %s5254_s16 }
0x4768   :  { %p4506_p13 = pnand %p4504_p12, %p4501_p11 }
0x476a   :  { %4509 = shalt.err (!%p4506_p13)
}
0x476b   :  { %3412 = dma.vmem_to_hbm [thread:$0]  %s3410_s3, 32, %s5254_s16, [#allocation6]  }
0x476c   :  { %4518 = dma.done.wait [#allocation6], 32  }
0x476d   :  { %4519 = vsyncadd [#allocation6], 4294967264 }
0x476e   :  { %3416 = vsyncpa [#allocation5], 1 }
0x476f   :  { %3417 = vsyncpa [#allocation8], 1 }
0x4770   :  { %3418 = vsyncpa [#allocation11], 1 }
0x4771   :  { %3419 = vsyncpa [#allocation14], 1 }
0x4772   :  { %3420 = vsyncpa [#allocation6], 1 }

</bundles_post_ra>
